<compile_context>
chip_gen: v6e
topology: v6e:2x2x1
jax: 0.10.0
libtpu: 0.0.40
codegen_flags: <defaults>
</compile_context>

<pallas_src>
import functools
import math

import jax
import jax.numpy as jnp
from jax import lax
from jax.experimental import pallas as pl
from jax.experimental.pallas import tpu as pltpu

_NT_DIMS = (((1,), (1,)), ((), ()))   # A @ B^T (contract last dims of both)
_TILE_CANDS = (2048, 1024, 512, 256, 128)


# ----------------------------------------------------------------------------
# Chip / tiling helpers
# ----------------------------------------------------------------------------
def _round_up(x, m):
    return ((x + m - 1) // m) * m


def _vmem_capacity():
    try:
        return int(pltpu.get_tpu_info().vmem_capacity_bytes)
    except Exception:
        return 128 * 1024 * 1024


def _chip_config():
    """Generation-aware VMEM budgets (v5e/v6e: 128 MiB VMEM, v7x: 64 MiB)."""
    vmem = _vmem_capacity()
    if vmem >= 96 * 1024 * 1024:          # v5e / v6e
        return {"vmem_limit": 64 * 1024 * 1024, "tile_budget": 40 * 1024 * 1024}
    return {"vmem_limit": 40 * 1024 * 1024, "tile_budget": 16 * 1024 * 1024}  # v7x


def _search_tiles(dim_m, dim_k, ws_fn, budget):
    """Largest (tm, tk) candidate pair dividing the (padded) dims under budget."""
    best = None
    for tm in _TILE_CANDS:
        if dim_m % tm:
            continue
        for tk in _TILE_CANDS:
            if dim_k % tk:
                continue
            if ws_fn(tm, tk) <= budget and (best is None or tm * tk > best[0] * best[1]):
                best = (tm, tk)
    if best is None:
        best = (128, 128)
    return best


def _cparams(sem, vmem_limit):
    return pltpu.CompilerParams(dimension_semantics=sem,
                                vmem_limit_bytes=vmem_limit)


def _pad_rows(x, n):
    pad = n - x.shape[0]
    if pad == 0:
        return x
    return jnp.pad(x, ((0, pad), (0, 0)))


# ----------------------------------------------------------------------------
# Kernel 1: fused dual adjacency propagation (wide 2D-lane accumulator)
#   acc = adj @ [ego | sigmoid(mask_k * den)]   (one MXU dot per adj tile)
#   epilogue: ego_out / den_out (f32) and the NEXT layer's bf16 gated RHS
# ----------------------------------------------------------------------------
def _dual_prop_kernel(adj_ref, rhs_ref, mask_ref,
                      ego_ref, den_ref, rhs_next_ref, acc_ref):
    k = pl.program_id(1)

    @pl.when(k == 0)
    def _():
        acc_ref[...] = jnp.zeros_like(acc_ref)

    acc_ref[...] += jnp.dot(adj_ref[...], rhs_ref[...],
                            preferred_element_type=jnp.float32)

    @pl.when(k == pl.num_programs(1) - 1)
    def _():
        d = ego_ref.shape[1]
        res = acc_ref[...]
        ego = res[:, :d]
        den = res[:, d:]
        ego_ref[...] = ego
        den_ref[...] = den
        # Next layer's streamed operand, gated once here (not per adj tile).
        gated = jax.nn.sigmoid(mask_ref[...] * den)
        rhs_next_ref[...] = jnp.concatenate([ego, gated], axis=1).astype(jnp.bfloat16)


def dual_adj_prop(adj_bf, rhs_bf, mask_next, cfg):
    N, d2 = rhs_bf.shape
    d = d2 // 2

    def ws(tm, tk):
        return (2 * tm * tk * 2            # adj bf16 (double buffered)
                + 2 * tk * d2 * 2          # wide bf16 RHS (double buffered)
                + tm * d2 * 4              # f32 accumulator
                + 2 * (2 * tm * d * 4 + tm * d2 * 2))   # outputs (double buffered)

    tm, tk = _search_tiles(N, N, ws, cfg["tile_budget"])
    f32 = jnp.float32
    return pl.pallas_call(
        _dual_prop_kernel,
        out_shape=(jax.ShapeDtypeStruct((N, d), f32),
                   jax.ShapeDtypeStruct((N, d), f32),
                   jax.ShapeDtypeStruct((N, d2), jnp.bfloat16)),
        grid_spec=pltpu.PrefetchScalarGridSpec(
            num_scalar_prefetch=0,
            grid=(N // tm, N // tk),
            in_specs=[
                pl.BlockSpec((tm, tk), lambda i, k: (i, k)),   # adj (streamed)
                pl.BlockSpec((tk, d2), lambda i, k: (k, 0)),   # [ego|gated den] bf16
                pl.BlockSpec((1, d), lambda i, k: (0, 0)),     # next layer's mask
            ],
            out_specs=(
                pl.BlockSpec((tm, d), lambda i, k: (i, 0)),
                pl.BlockSpec((tm, d), lambda i, k: (i, 0)),
                pl.BlockSpec((tm, d2), lambda i, k: (i, 0)),
            ),
            scratch_shapes=[pltpu.VMEM((tm, d2), jnp.float32)],
        ),
        compiler_params=_cparams(("parallel", "arbitrary"), cfg["vmem_limit"]),
    )(adj_bf, rhs_bf, mask_next)


# ----------------------------------------------------------------------------
# Kernel 2: fused VGAE generator (bf16 MXU, 256-wide mean|std matmul)
# ----------------------------------------------------------------------------
def _vgae_kernel(x_ref, n_ref, wms_ref, wd_ref, mean_ref, std_ref, dec_ref):
    d = mean_ref.shape[1]
    x = x_ref[...].astype(jnp.bfloat16)
    ms = jnp.maximum(jnp.dot(x, wms_ref[...], preferred_element_type=jnp.float32), 0.0)
    mean = ms[:, :d]
    std = ms[:, d:]
    z = n_ref[...] * std + mean
    dec = jnp.dot(z.astype(jnp.bfloat16), wd_ref[...],
                  preferred_element_type=jnp.float32)
    mean_ref[...] = mean
    std_ref[...] = std
    dec_ref[...] = jnp.maximum(dec, 0.0)


def vgae_generate(x, noise, wms_bf, wd_bf, cfg):
    N, d = x.shape

    def ws(tm, _):
        return (2 * 2 * tm * d * 4                      # x + noise (double buffered)
                + 2 * (d * 2 * d * 2 + d * d * 2)       # resident weights
                + 2 * 3 * tm * d * 4)                   # outputs (double buffered)

    tm, _ = _search_tiles(N, N, ws, cfg["tile_budget"])
    sds = jax.ShapeDtypeStruct((N, d), jnp.float32)
    row = pl.BlockSpec((tm, d), lambda i: (i, 0))
    return pl.pallas_call(
        _vgae_kernel,
        out_shape=(sds, sds, sds),
        grid_spec=pltpu.PrefetchScalarGridSpec(
            num_scalar_prefetch=0,
            grid=(N // tm,),
            in_specs=[row, row,
                      pl.BlockSpec((d, 2 * d), lambda i: (0, 0)),
                      pl.BlockSpec((d, d), lambda i: (0, 0))],
            out_specs=(row, row, row),
        ),
        compiler_params=_cparams(("parallel",), cfg["vmem_limit"]),
    )(x, noise, wms_bf, wd_bf)


# ----------------------------------------------------------------------------
# Kernel 3: gen_graph = dec_u @ dec_i^T with fused:
#   f32 output, bf16 copy, bf16 transposed copy (second MXU dot, no XLU
#   transpose), and per-tile L1 abs-sum partials for row/col normalization.
# ----------------------------------------------------------------------------
def _gen_graph_kernel(a_ref, b_ref, gg_ref, ggbf_ref, ggt_ref, rsum_ref, csum_ref):
    a = a_ref[...].astype(jnp.bfloat16)
    b = b_ref[...].astype(jnp.bfloat16)
    g = lax.dot_general(a, b, _NT_DIMS, preferred_element_type=jnp.float32)
    gg_ref[...] = g
    ggbf_ref[...] = g.astype(jnp.bfloat16)
    # Transposed bf16 copy via a second MXU dot; amortized over n_layers reuses
    # in the Gauss-Seidel loop (avoids per-layer TN transposes).
    ggt_ref[...] = lax.dot_general(b, a, _NT_DIMS,
                                   preferred_element_type=jnp.float32
                                   ).astype(jnp.bfloat16)
    ab = jnp.abs(g)
    rsum_ref[0] = jnp.sum(ab, axis=1, keepdims=True)    # (tm, 1)
    csum_ref[0] = jnp.sum(ab, axis=0, keepdims=True)    # (1, tn)


def gen_graph_products(dec_u, dec_i, cfg):
    U, d = dec_u.shape
    I, _ = dec_i.shape

    def ws(tm, tn):
        return (2 * (tm * d * 4 + tn * d * 4)
                + 2 * (tm * tn * 4 + 2 * tm * tn * 2 + tm * 4 + tn * 4))

    tm, tn = _search_tiles(U, I, ws, cfg["tile_budget"])
    ni, nj = U // tm, I // tn
    return pl.pallas_call(
        _gen_graph_kernel,
        out_shape=(jax.ShapeDtypeStruct((U, I), jnp.float32),
                   jax.ShapeDtypeStruct((U, I), jnp.bfloat16),
                   jax.ShapeDtypeStruct((I, U), jnp.bfloat16),
                   jax.ShapeDtypeStruct((nj, U, 1), jnp.float32),
                   jax.ShapeDtypeStruct((ni, 1, I), jnp.float32)),
        grid_spec=pltpu.PrefetchScalarGridSpec(
            num_scalar_prefetch=0,
            grid=(ni, nj),
            in_specs=[pl.BlockSpec((tm, d), lambda i, j: (i, 0)),
                      pl.BlockSpec((tn, d), lambda i, j: (j, 0))],
            out_specs=(pl.BlockSpec((tm, tn), lambda i, j: (i, j)),
                       pl.BlockSpec((tm, tn), lambda i, j: (i, j)),
                       pl.BlockSpec((tn, tm), lambda i, j: (j, i)),
                       pl.BlockSpec((1, tm, 1), lambda i, j: (j, i, 0)),
                       pl.BlockSpec((1, 1, tn), lambda i, j: (i, 0, j))),
        ),
        compiler_params=_cparams(("parallel", "parallel"), cfg["vmem_limit"]),
    )(dec_u, dec_i)


# ----------------------------------------------------------------------------
# Kernel 4: mask_graph accumulation: out = prev + sigmoid(A @ B^T)
#   (prev aliased into the output; D is a single contraction block)
# ----------------------------------------------------------------------------
def _mask_acc_kernel(prev_ref, u_ref, v_ref, o_ref):
    g = lax.dot_general(u_ref[...].astype(jnp.bfloat16),
                        v_ref[...].astype(jnp.bfloat16),
                        _NT_DIMS, preferred_element_type=jnp.float32)
    o_ref[...] = prev_ref[...] + jax.nn.sigmoid(g)


def mask_graph_accum(prev, den_u, den_v, cfg):
    U, d = den_u.shape
    I, _ = den_v.shape

    def ws(tm, tn):
        return 2 * (tm * d * 4 + tn * d * 4) + 2 * 2 * tm * tn * 4

    tm, tn = _search_tiles(U, I, ws, cfg["tile_budget"])
    return pl.pallas_call(
        _mask_acc_kernel,
        out_shape=jax.ShapeDtypeStruct((U, I), jnp.float32),
        grid_spec=pltpu.PrefetchScalarGridSpec(
            num_scalar_prefetch=0,
            grid=(U // tm, I // tn),
            in_specs=[pl.BlockSpec((tm, tn), lambda i, j: (i, j)),
                      pl.BlockSpec((tm, d), lambda i, j: (i, 0)),
                      pl.BlockSpec((tn, d), lambda i, j: (j, 0))],
            out_specs=pl.BlockSpec((tm, tn), lambda i, j: (i, j)),
        ),
        compiler_params=_cparams(("parallel", "parallel"), cfg["vmem_limit"]),
        input_output_aliases={0: 0},
    )(prev, den_u, den_v)


# ----------------------------------------------------------------------------
# Kernel 5: out = diag(scale) @ (A @ B), accumulated directly into the
# k-invariant resident output ref (used for both Gauss-Seidel updates; the
# "transposed" product uses the pre-materialized bf16 gen_graph^T).
# ----------------------------------------------------------------------------
def _ab_rowscaled_kernel(a_ref, b_ref, s_ref, o_ref):
    k = pl.program_id(1)

    @pl.when(k == 0)
    def _():
        o_ref[...] = jnp.zeros_like(o_ref)

    o_ref[...] += jnp.dot(a_ref[...], b_ref[...],
                          preferred_element_type=jnp.float32)

    @pl.when(k == pl.num_programs(1) - 1)
    def _():
        o_ref[...] = o_ref[...] * s_ref[...]


def matmul_rowscaled(a_bf, b_bf, scale, cfg):
    M, K = a_bf.shape
    _, d = b_bf.shape

    def ws(tm, tk):
        return 2 * tm * tk * 2 + 2 * tk * d * 2 + 2 * tm * d * 4 + 2 * tm * 4

    tm, tk = _search_tiles(M, K, ws, cfg["tile_budget"])
    return pl.pallas_call(
        _ab_rowscaled_kernel,
        out_shape=jax.ShapeDtypeStruct((M, d), jnp.float32),
        grid_spec=pltpu.PrefetchScalarGridSpec(
            num_scalar_prefetch=0,
            grid=(M // tm, K // tk),
            in_specs=[pl.BlockSpec((tm, tk), lambda i, k: (i, k)),
                      pl.BlockSpec((tk, d), lambda i, k: (k, 0)),
                      pl.BlockSpec((tm, 1), lambda i, k: (i, 0))],
            out_specs=pl.BlockSpec((tm, d), lambda i, k: (i, 0)),
        ),
        compiler_params=_cparams(("parallel", "arbitrary"), cfg["vmem_limit"]),
    )(a_bf, b_bf, scale)


# ----------------------------------------------------------------------------
# AdaGCL_Encoder forward (glue in plain JAX, hot paths in Pallas)
# ----------------------------------------------------------------------------
def adagcl_forward(params, adj, noise, *, user_num, item_num, n_layers):
    cfg = _chip_config()
    U0, I0 = user_num, item_num
    D = params["user_emb"].shape[1]
    assert D % 128 == 0, "emb_size must be a multiple of 128 (lane width)"

    # Pad user/item counts to multiples of 128 so tiles stay lane-dense and the
    # tile search never falls back to full-dimension blocks.
    U, I = _round_up(U0, 128), _round_up(I0, 128)
    N = U + I
    inv = 1.0 / (n_layers + 1)

    ue = _pad_rows(params["user_emb"], U)
    ie = _pad_rows(params["item_emb"], I)
    ego0 = jnp.concatenate([ue, ie], axis=0)

    if U == U0 and I == I0:
        adj_p = adj
        noise_p = noise
    else:
        adj_p = jnp.zeros((N, N), jnp.float32)
        adj_p = adj_p.at[:U0, :U0].set(adj[:U0, :U0])
        adj_p = adj_p.at[:U0, U:U + I0].set(adj[:U0, U0:])
        adj_p = adj_p.at[U:U + I0, :U0].set(adj[U0:, :U0])
        adj_p = adj_p.at[U:U + I0, U:U + I0].set(adj[U0:, U0:])
        noise_p = jnp.zeros((N, D), jnp.float32)
        noise_p = noise_p.at[:U0].set(noise[:U0])
        noise_p = noise_p.at[U:U + I0].set(noise[U0:])

    # bf16 adjacency: halves the dominant HBM stream, native MXU rate.
    # TODO(synk): on v7x evaluate fp8 (e4m3) adjacency storage (needs accuracy check).
    adj_bf = adj_p.astype(jnp.bfloat16)

    masks = [params["mask"][k] for k in range(n_layers)]
    zero_mask = jnp.zeros((1, D), jnp.float32)

    # Layer-0 streamed operand: [ego0 | sigmoid(mask0 * ego0)] in bf16.
    gate0 = jax.nn.sigmoid(masks[0] * ego0) if n_layers > 0 else ego0
    rhs = jnp.concatenate([ego0, gate0], axis=1).astype(jnp.bfloat16)

    # Torch builds all_embeddings as cumulative residual sums
    # (all_embeddings[k] = e0 + ... + ek) and averages them; the den list is
    # the plain per-layer outputs. Running sums reproduce both exactly.
    all_cum = ego0
    all_sum = ego0
    den_sum = ego0
    mask_graph = jnp.zeros((U, I), jnp.float32)

    for k in range(n_layers):
        mask_next = masks[k + 1] if k + 1 < n_layers else zero_mask
        ego, den_new, rhs = dual_adj_prop(adj_bf, rhs, mask_next, cfg)
        all_cum = all_cum + ego
        all_sum = all_sum + all_cum
        den_sum = den_sum + den_new
        mask_graph = mask_graph_accum(mask_graph, den_new[:U], den_new[U:], cfg)

    all_embeddings = all_sum * inv
    den_all = den_sum * inv

    # --- fused VGAE generator -------------------------------------------------
    wms_bf = jnp.concatenate([params["mean"], params["std"]], axis=1).astype(jnp.bfloat16)
    wd_bf = params["decoder"].astype(jnp.bfloat16)
    mean_p, std_p, dec = vgae_generate(all_embeddings, noise_p, wms_bf, wd_bf, cfg)

    # --- gen_graph + fused L1 normalizers + bf16 (and transposed) copies ------
    gg, gg_bf, ggt_bf, rpart, cpart = gen_graph_products(dec[:U], dec[U:], cfg)
    row_inv = 1.0 / jnp.maximum(jnp.sum(rpart, axis=0), 1e-12)               # (U, 1)
    col_inv = 1.0 / jnp.maximum(jnp.sum(cpart, axis=0)[0][:, None], 1e-12)   # (I, 1)

    gu, gi = ue, ie
    gu_sum, gi_sum = ue, ie
    for _ in range(n_layers):
        gu = matmul_rowscaled(gg_bf, gi.astype(jnp.bfloat16), row_inv, cfg)
        gi = matmul_rowscaled(ggt_bf, gu.astype(jnp.bfloat16), col_inv, cfg)
        gu_sum = gu_sum + gu
        gi_sum = gi_sum + gi
    gen_user = gu_sum * inv
    gen_item = gi_sum * inv

    # Slice padded rows back to the original user/item counts.
    user_all = all_embeddings[:U0]
    item_all = all_embeddings[U:U + I0]
    den_user = den_all[:U0]
    den_item = den_all[U:U + I0]
    mean = jnp.concatenate([mean_p[:U0], mean_p[U:U + I0]], axis=0)
    std = jnp.concatenate([std_p[:U0], std_p[U:U + I0]], axis=0)
    return (user_all, item_all, gen_user[:U0], gen_item[:I0],
            den_user, den_item, mean, std,
            gg[:U0, :I0], mask_graph[:U0, :I0])


# ----------------------------------------------------------------------------
# Deterministic parameter / input construction
# ----------------------------------------------------------------------------
def xavier_uniform(key, shape):
    fan_in, fan_out = shape
    bound = math.sqrt(6.0 / (fan_in + fan_out))
    return jax.random.uniform(key, shape, jnp.float32, -bound, bound)


def build_norm_adj(key, user_num, item_num):
    N = user_num + item_num
    R = (jax.random.uniform(key, (user_num, item_num)) < 0.15).astype(jnp.float32)
    A = jnp.zeros((N, N), jnp.float32)
    A = A.at[:user_num, user_num:].set(R)
    A = A.at[user_num:, :user_num].set(R.T)
    deg = jnp.sum(A, axis=1)
    d_inv_sqrt = jnp.where(deg > 0, 1.0 / jnp.sqrt(jnp.maximum(deg, 1.0)), 0.0)
    return A * d_inv_sqrt[:, None] * d_inv_sqrt[None, :]


if __name__ == "__main__":
    # user_num is not a multiple of 128 on purpose to exercise the padding path.
    user_num, item_num, emb_size, n_layers = 96, 64, 128, 2
    N = user_num + item_num

    root = jax.random.PRNGKey(0)
    keys = jax.random.split(root, 8)

    params = {
        "user_emb": xavier_uniform(keys[0], (user_num, emb_size)),
        "item_emb": xavier_uniform(keys[1], (item_num, emb_size)),
        "mean": xavier_uniform(keys[2], (emb_size, emb_size)),
        "std": xavier_uniform(keys[3], (emb_size, emb_size)),
        "decoder": xavier_uniform(keys[4], (emb_size, emb_size)),
        "mask": [xavier_uniform(jax.random.fold_in(keys[5], k), (1, emb_size))
                 for k in range(n_layers)],
    }
    adj = build_norm_adj(keys[6], user_num, item_num)
    # deterministic stand-in for torch.randn in the reparameterization trick
    noise = jax.random.normal(keys[7], (N, emb_size), jnp.float32)

    fwd = jax.jit(functools.partial(adagcl_forward,
                                    user_num=user_num, item_num=item_num,
                                    n_layers=n_layers))
    outs = fwd(params, adj, noise)
    jax.block_until_ready(outs)
    print("KERNEL_OK")
</pallas_src>

<mosaic_0001>
module attributes {stable_mosaic.version = 11 : i64} {
  func.func @_dual_prop_kernel(%arg0: i32, %arg1: i32, %arg2: memref<256x256xbf16, #tpu.memory_space<vmem>>, %arg3: memref<256x256xbf16, #tpu.memory_space<vmem>>, %arg4: memref<1x128xf32, #tpu.memory_space<vmem>>, %arg5: memref<256x128xf32, #tpu.memory_space<vmem>>, %arg6: memref<256x128xf32, #tpu.memory_space<vmem>>, %arg7: memref<256x256xbf16, #tpu.memory_space<vmem>>, %arg8: memref<256x256xf32, #tpu.memory_space<vmem>>) attributes {dimension_semantics = [#tpu.dimension_semantics<parallel>, #tpu.dimension_semantics<arbitrary>], iteration_bounds = array<i64: 1, 1>, scalar_prefetch = 0 : i64, scratch_operands = 1 : i64, tpu.core_type = #tpu.core_type<tc>, window_params = [{transform_indices = @transform_0, window_bounds = array<i64: 256, 256>}, {transform_indices = @transform_1, window_bounds = array<i64: 256, 256>}, {pipeline_mode = #tpu.pipeline_mode<synchronous>, transform_indices = @transform_2, window_bounds = array<i64: 1, 128>}, {transform_indices = @transform_3, window_bounds = array<i64: 256, 128>}, {transform_indices = @transform_4, window_bounds = array<i64: 256, 128>}, {transform_indices = @transform_5, window_bounds = array<i64: 256, 256>}]} {
    %c0_i32 = arith.constant 0 : i32
    %0 = arith.cmpi eq, %arg1, %c0_i32 : i32
    %1 = arith.extui %0 : i1 to i32
    %c0_i32_0 = arith.constant 0 : i32
    %2 = arith.cmpi ne, %1, %c0_i32_0 : i32
    scf.if %2 {
      %cst_10 = arith.constant 0.000000e+00 : f32
      %12 = vector.broadcast %cst_10 : f32 to vector<256x256xf32>
      %c0_11 = arith.constant 0 : index
      %c0_12 = arith.constant 0 : index
      %13 = vector.load %arg8[%c0_11, %c0_12] : memref<256x256xf32, #tpu.memory_space<vmem>>, vector<256x256xf32>
      tpu.vector_store %arg8[%c0_11, %c0_12], %12 {strides = array<i32>} : memref<256x256xf32, #tpu.memory_space<vmem>>, vector<256x256xf32>,
    } else {
    }
    %c0 = arith.constant 0 : index
    %c0_1 = arith.constant 0 : index
    %3 = vector.load %arg8[%c0, %c0_1] : memref<256x256xf32, #tpu.memory_space<vmem>>, vector<256x256xf32>
    %c0_2 = arith.constant 0 : index
    %c0_3 = arith.constant 0 : index
    %4 = vector.load %arg2[%c0_2, %c0_3] : memref<256x256xbf16, #tpu.memory_space<vmem>>, vector<256x256xbf16>
    %c0_4 = arith.constant 0 : index
    %c0_5 = arith.constant 0 : index
    %5 = vector.load %arg3[%c0_4, %c0_5] : memref<256x256xbf16, #tpu.memory_space<vmem>>, vector<256x256xbf16>
    %cst = arith.constant dense<0.000000e+00> : vector<256x256xf32>
    %6 = tpu.matmul %4, %5, %cst {dimension_numbers = #tpu.dot_dimension_numbers<[1], [0], [0], [1], [0, 0, 1, 1], [], []>} : vector<256x256xbf16>, vector<256x256xbf16>, vector<256x256xf32> -> vector<256x256xf32>
    %7 = arith.addf %3, %6 : vector<256x256xf32>
    %c0_6 = arith.constant 0 : index
    %c0_7 = arith.constant 0 : index
    %8 = vector.load %arg8[%c0_6, %c0_7] : memref<256x256xf32, #tpu.memory_space<vmem>>, vector<256x256xf32>
    tpu.vector_store %arg8[%c0_6, %c0_7], %7 {strides = array<i32>} : memref<256x256xf32, #tpu.memory_space<vmem>>, vector<256x256xf32>,
    %c0_i32_8 = arith.constant 0 : i32
    %9 = arith.cmpi eq, %arg1, %c0_i32_8 : i32
    %10 = arith.extui %9 : i1 to i32
    %c0_i32_9 = arith.constant 0 : i32
    %11 = arith.cmpi ne, %10, %c0_i32_9 : i32
    scf.if %11 {
      %c0_10 = arith.constant 0 : index
      %c0_11 = arith.constant 0 : index
      %12 = vector.load %arg8[%c0_10, %c0_11] : memref<256x256xf32, #tpu.memory_space<vmem>>, vector<256x256xf32>
      %13 = vector.extract_strided_slice %12 {offsets = [0, 0], sizes = [256, 128], strides = [1, 1]} : vector<256x256xf32> to vector<256x128xf32>
      %14 = vector.extract_strided_slice %12 {offsets = [0, 128], sizes = [256, 128], strides = [1, 1]} : vector<256x256xf32> to vector<256x128xf32>
      %c0_12 = arith.constant 0 : index
      %c0_13 = arith.constant 0 : index
      %15 = vector.load %arg5[%c0_12, %c0_13] : memref<256x128xf32, #tpu.memory_space<vmem>>, vector<256x128xf32>
      tpu.vector_store %arg5[%c0_12, %c0_13], %13 {strides = array<i32>} : memref<256x128xf32, #tpu.memory_space<vmem>>, vector<256x128xf32>,
      %c0_14 = arith.constant 0 : index
      %c0_15 = arith.constant 0 : index
      %16 = vector.load %arg6[%c0_14, %c0_15] : memref<256x128xf32, #tpu.memory_space<vmem>>, vector<256x128xf32>
      tpu.vector_store %arg6[%c0_14, %c0_15], %14 {strides = array<i32>} : memref<256x128xf32, #tpu.memory_space<vmem>>, vector<256x128xf32>,
      %c0_16 = arith.constant 0 : index
      %c0_17 = arith.constant 0 : index
      %17 = vector.load %arg4[%c0_16, %c0_17] : memref<1x128xf32, #tpu.memory_space<vmem>>, vector<1x128xf32>
      %18 = vector.broadcast %17 : vector<1x128xf32> to vector<256x128xf32>
      %19 = arith.mulf %18, %14 : vector<256x128xf32>
      %20 = arith.negf %19 : vector<256x128xf32>
      %21 = math.exp %20 : vector<256x128xf32>
      %cst_18 = arith.constant 1.000000e+00 : f32
      %22 = vector.broadcast %cst_18 : f32 to vector<256x128xf32>
      %23 = arith.addf %22, %21 : vector<256x128xf32>
      %24 = arith.divf %22, %23 : vector<256x128xf32>
      %25 = tpu.concatenate %13, %24 in 1 : vector<256x128xf32>, vector<256x128xf32> -> vector<256x256xf32>
      %26 = arith.truncf %25 : vector<256x256xf32> to vector<256x256xbf16>
      %c0_19 = arith.constant 0 : index
      %c0_20 = arith.constant 0 : index
      %27 = vector.load %arg7[%c0_19, %c0_20] : memref<256x256xbf16, #tpu.memory_space<vmem>>, vector<256x256xbf16>
      tpu.vector_store %arg7[%c0_19, %c0_20], %26 {strides = array<i32>} : memref<256x256xbf16, #tpu.memory_space<vmem>>, vector<256x256xbf16>,
    } else {
    }
    return
  }
  func.func @transform_0(%arg0: i32, %arg1: i32) -> (i32, i32) {
    %c0_i32 = arith.constant 0 : i32
    return %arg0, %arg1 : i32, i32
  }
  func.func @transform_1(%arg0: i32, %arg1: i32) -> (i32, i32) {
    %c0_i32 = arith.constant 0 : i32
    %c0_i32_0 = arith.constant 0 : i32
    return %arg1, %c0_i32 : i32, i32
  }
  func.func @transform_2(%arg0: i32, %arg1: i32) -> (i32, i32) {
    %c0_i32 = arith.constant 0 : i32
    %c0_i32_0 = arith.constant 0 : i32
    %c0_i32_1 = arith.constant 0 : i32
    return %c0_i32, %c0_i32_0 : i32, i32
  }
  func.func @transform_3(%arg0: i32, %arg1: i32) -> (i32, i32) {
    %c0_i32 = arith.constant 0 : i32
    %c0_i32_0 = arith.constant 0 : i32
    return %arg0, %c0_i32 : i32, i32
  }
  func.func @transform_4(%arg0: i32, %arg1: i32) -> (i32, i32) {
    %c0_i32 = arith.constant 0 : i32
    %c0_i32_0 = arith.constant 0 : i32
    return %arg0, %c0_i32 : i32, i32
  }
  func.func @transform_5(%arg0: i32, %arg1: i32) -> (i32, i32) {
    %c0_i32 = arith.constant 0 : i32
    %c0_i32_0 = arith.constant 0 : i32
    return %arg0, %c0_i32 : i32, i32
  }
}

module attributes {stable_mosaic.version = 11 : i64} {
  func.func @_mask_acc_kernel(%arg0: i32, %arg1: i32, %arg2: memref<128x128xf32, #tpu.memory_space<vmem>>, %arg3: memref<128x128xf32, #tpu.memory_space<vmem>>, %arg4: memref<128x128xf32, #tpu.memory_space<vmem>>, %arg5: memref<128x128xf32, #tpu.memory_space<vmem>>) attributes {dimension_semantics = [#tpu.dimension_semantics<parallel>, #tpu.dimension_semantics<parallel>], iteration_bounds = array<i64: 1, 1>, scalar_prefetch = 0 : i64, scratch_operands = 0 : i64, tpu.core_type = #tpu.core_type<tc>, window_params = [{transform_indices = @transform_0, window_bounds = array<i64: 128, 128>}, {transform_indices = @transform_1, window_bounds = array<i64: 128, 128>}, {transform_indices = @transform_2, window_bounds = array<i64: 128, 128>}, {transform_indices = @transform_3, window_bounds = array<i64: 128, 128>}]} {
    %c0 = arith.constant 0 : index
    %c0_0 = arith.constant 0 : index
    %0 = vector.load %arg3[%c0, %c0_0] : memref<128x128xf32, #tpu.memory_space<vmem>>, vector<128x128xf32>
    %1 = arith.truncf %0 : vector<128x128xf32> to vector<128x128xbf16>
    %c0_1 = arith.constant 0 : index
    %c0_2 = arith.constant 0 : index
    %2 = vector.load %arg4[%c0_1, %c0_2] : memref<128x128xf32, #tpu.memory_space<vmem>>, vector<128x128xf32>
    %3 = arith.truncf %2 : vector<128x128xf32> to vector<128x128xbf16>
    %cst = arith.constant dense<0.000000e+00> : vector<128x128xf32>
    %4 = tpu.matmul %1, %3, %cst {dimension_numbers = #tpu.dot_dimension_numbers<[1], [1], [0], [0], [0, 0, 1, 0], [], []>} : vector<128x128xbf16>, vector<128x128xbf16>, vector<128x128xf32> -> vector<128x128xf32>
    %c0_3 = arith.constant 0 : index
    %c0_4 = arith.constant 0 : index
    %5 = vector.load %arg2[%c0_3, %c0_4] : memref<128x128xf32, #tpu.memory_space<vmem>>, vector<128x128xf32>
    %6 = arith.negf %4 : vector<128x128xf32>
    %7 = math.exp %6 : vector<128x128xf32>
    %cst_5 = arith.constant 1.000000e+00 : f32
    %8 = vector.broadcast %cst_5 : f32 to vector<128x128xf32>
    %9 = arith.addf %8, %7 : vector<128x128xf32>
    %10 = arith.divf %8, %9 : vector<128x128xf32>
    %11 = arith.addf %5, %10 : vector<128x128xf32>
    %c0_6 = arith.constant 0 : index
    %c0_7 = arith.constant 0 : index
    %12 = vector.load %arg5[%c0_6, %c0_7] : memref<128x128xf32, #tpu.memory_space<vmem>>, vector<128x128xf32>
    tpu.vector_store %arg5[%c0_6, %c0_7], %11 {strides = array<i32>} : memref<128x128xf32, #tpu.memory_space<vmem>>, vector<128x128xf32>,
    return
  }
  func.func @transform_0(%arg0: i32, %arg1: i32) -> (i32, i32) {
    %c0_i32 = arith.constant 0 : i32
    return %arg0, %arg1 : i32, i32
  }
  func.func @transform_1(%arg0: i32, %arg1: i32) -> (i32, i32) {
    %c0_i32 = arith.constant 0 : i32
    %c0_i32_0 = arith.constant 0 : i32
    return %arg0, %c0_i32 : i32, i32
  }
  func.func @transform_2(%arg0: i32, %arg1: i32) -> (i32, i32) {
    %c0_i32 = arith.constant 0 : i32
    %c0_i32_0 = arith.constant 0 : i32
    return %arg1, %c0_i32 : i32, i32
  }
  func.func @transform_3(%arg0: i32, %arg1: i32) -> (i32, i32) {
    %c0_i32 = arith.constant 0 : i32
    return %arg0, %arg1 : i32, i32
  }
}

module attributes {stable_mosaic.version = 11 : i64} {
  func.func @_dual_prop_kernel(%arg0: i32, %arg1: i32, %arg2: memref<256x256xbf16, #tpu.memory_space<vmem>>, %arg3: memref<256x256xbf16, #tpu.memory_space<vmem>>, %arg4: memref<1x128xf32, #tpu.memory_space<vmem>>, %arg5: memref<256x128xf32, #tpu.memory_space<vmem>>, %arg6: memref<256x128xf32, #tpu.memory_space<vmem>>, %arg7: memref<256x256xbf16, #tpu.memory_space<vmem>>, %arg8: memref<256x256xf32, #tpu.memory_space<vmem>>) attributes {dimension_semantics = [#tpu.dimension_semantics<parallel>, #tpu.dimension_semantics<arbitrary>], iteration_bounds = array<i64: 1, 1>, scalar_prefetch = 0 : i64, scratch_operands = 1 : i64, tpu.core_type = #tpu.core_type<tc>, window_params = [{transform_indices = @transform_0, window_bounds = array<i64: 256, 256>}, {transform_indices = @transform_1, window_bounds = array<i64: 256, 256>}, {pipeline_mode = #tpu.pipeline_mode<synchronous>, transform_indices = @transform_2, window_bounds = array<i64: 1, 128>}, {transform_indices = @transform_3, window_bounds = array<i64: 256, 128>}, {transform_indices = @transform_4, window_bounds = array<i64: 256, 128>}, {transform_indices = @transform_5, window_bounds = array<i64: 256, 256>}]} {
    %c0_i32 = arith.constant 0 : i32
    %0 = arith.cmpi eq, %arg1, %c0_i32 : i32
    %1 = arith.extui %0 : i1 to i32
    %c0_i32_0 = arith.constant 0 : i32
    %2 = arith.cmpi ne, %1, %c0_i32_0 : i32
    scf.if %2 {
      %cst_10 = arith.constant 0.000000e+00 : f32
      %12 = vector.broadcast %cst_10 : f32 to vector<256x256xf32>
      %c0_11 = arith.constant 0 : index
      %c0_12 = arith.constant 0 : index
      %13 = vector.load %arg8[%c0_11, %c0_12] : memref<256x256xf32, #tpu.memory_space<vmem>>, vector<256x256xf32>
      tpu.vector_store %arg8[%c0_11, %c0_12], %12 {strides = array<i32>} : memref<256x256xf32, #tpu.memory_space<vmem>>, vector<256x256xf32>,
    } else {
    }
    %c0 = arith.constant 0 : index
    %c0_1 = arith.constant 0 : index
    %3 = vector.load %arg8[%c0, %c0_1] : memref<256x256xf32, #tpu.memory_space<vmem>>, vector<256x256xf32>
    %c0_2 = arith.constant 0 : index
    %c0_3 = arith.constant 0 : index
    %4 = vector.load %arg2[%c0_2, %c0_3] : memref<256x256xbf16, #tpu.memory_space<vmem>>, vector<256x256xbf16>
    %c0_4 = arith.constant 0 : index
    %c0_5 = arith.constant 0 : index
    %5 = vector.load %arg3[%c0_4, %c0_5] : memref<256x256xbf16, #tpu.memory_space<vmem>>, vector<256x256xbf16>
    %cst = arith.constant dense<0.000000e+00> : vector<256x256xf32>
    %6 = tpu.matmul %4, %5, %cst {dimension_numbers = #tpu.dot_dimension_numbers<[1], [0], [0], [1], [0, 0, 1, 1], [], []>} : vector<256x256xbf16>, vector<256x256xbf16>, vector<256x256xf32> -> vector<256x256xf32>
    %7 = arith.addf %3, %6 : vector<256x256xf32>
    %c0_6 = arith.constant 0 : index
    %c0_7 = arith.constant 0 : index
    %8 = vector.load %arg8[%c0_6, %c0_7] : memref<256x256xf32, #tpu.memory_space<vmem>>, vector<256x256xf32>
    tpu.vector_store %arg8[%c0_6, %c0_7], %7 {strides = array<i32>} : memref<256x256xf32, #tpu.memory_space<vmem>>, vector<256x256xf32>,
    %c0_i32_8 = arith.constant 0 : i32
    %9 = arith.cmpi eq, %arg1, %c0_i32_8 : i32
    %10 = arith.extui %9 : i1 to i32
    %c0_i32_9 = arith.constant 0 : i32
    %11 = arith.cmpi ne, %10, %c0_i32_9 : i32
    scf.if %11 {
      %c0_10 = arith.constant 0 : index
      %c0_11 = arith.constant 0 : index
      %12 = vector.load %arg8[%c0_10, %c0_11] : memref<256x256xf32, #tpu.memory_space<vmem>>, vector<256x256xf32>
      %13 = vector.extract_strided_slice %12 {offsets = [0, 0], sizes = [256, 128], strides = [1, 1]} : vector<256x256xf32> to vector<256x128xf32>
      %14 = vector.extract_strided_slice %12 {offsets = [0, 128], sizes = [256, 128], strides = [1, 1]} : vector<256x256xf32> to vector<256x128xf32>
      %c0_12 = arith.constant 0 : index
      %c0_13 = arith.constant 0 : index
      %15 = vector.load %arg5[%c0_12, %c0_13] : memref<256x128xf32, #tpu.memory_space<vmem>>, vector<256x128xf32>
      tpu.vector_store %arg5[%c0_12, %c0_13], %13 {strides = array<i32>} : memref<256x128xf32, #tpu.memory_space<vmem>>, vector<256x128xf32>,
      %c0_14 = arith.constant 0 : index
      %c0_15 = arith.constant 0 : index
      %16 = vector.load %arg6[%c0_14, %c0_15] : memref<256x128xf32, #tpu.memory_space<vmem>>, vector<256x128xf32>
      tpu.vector_store %arg6[%c0_14, %c0_15], %14 {strides = array<i32>} : memref<256x128xf32, #tpu.memory_space<vmem>>, vector<256x128xf32>,
      %c0_16 = arith.constant 0 : index
      %c0_17 = arith.constant 0 : index
      %17 = vector.load %arg4[%c0_16, %c0_17] : memref<1x128xf32, #tpu.memory_space<vmem>>, vector<1x128xf32>
      %18 = vector.broadcast %17 : vector<1x128xf32> to vector<256x128xf32>
      %19 = arith.mulf %18, %14 : vector<256x128xf32>
      %20 = arith.negf %19 : vector<256x128xf32>
      %21 = math.exp %20 : vector<256x128xf32>
      %cst_18 = arith.constant 1.000000e+00 : f32
      %22 = vector.broadcast %cst_18 : f32 to vector<256x128xf32>
      %23 = arith.addf %22, %21 : vector<256x128xf32>
      %24 = arith.divf %22, %23 : vector<256x128xf32>
      %25 = tpu.concatenate %13, %24 in 1 : vector<256x128xf32>, vector<256x128xf32> -> vector<256x256xf32>
      %26 = arith.truncf %25 : vector<256x256xf32> to vector<256x256xbf16>
      %c0_19 = arith.constant 0 : index
      %c0_20 = arith.constant 0 : index
      %27 = vector.load %arg7[%c0_19, %c0_20] : memref<256x256xbf16, #tpu.memory_space<vmem>>, vector<256x256xbf16>
      tpu.vector_store %arg7[%c0_19, %c0_20], %26 {strides = array<i32>} : memref<256x256xbf16, #tpu.memory_space<vmem>>, vector<256x256xbf16>,
    } else {
    }
    return
  }
  func.func @transform_0(%arg0: i32, %arg1: i32) -> (i32, i32) {
    %c0_i32 = arith.constant 0 : i32
    return %arg0, %arg1 : i32, i32
  }
  func.func @transform_1(%arg0: i32, %arg1: i32) -> (i32, i32) {
    %c0_i32 = arith.constant 0 : i32
    %c0_i32_0 = arith.constant 0 : i32
    return %arg1, %c0_i32 : i32, i32
  }
  func.func @transform_2(%arg0: i32, %arg1: i32) -> (i32, i32) {
    %c0_i32 = arith.constant 0 : i32
    %c0_i32_0 = arith.constant 0 : i32
    %c0_i32_1 = arith.constant 0 : i32
    return %c0_i32, %c0_i32_0 : i32, i32
  }
  func.func @transform_3(%arg0: i32, %arg1: i32) -> (i32, i32) {
    %c0_i32 = arith.constant 0 : i32
    %c0_i32_0 = arith.constant 0 : i32
    return %arg0, %c0_i32 : i32, i32
  }
  func.func @transform_4(%arg0: i32, %arg1: i32) -> (i32, i32) {
    %c0_i32 = arith.constant 0 : i32
    %c0_i32_0 = arith.constant 0 : i32
    return %arg0, %c0_i32 : i32, i32
  }
  func.func @transform_5(%arg0: i32, %arg1: i32) -> (i32, i32) {
    %c0_i32 = arith.constant 0 : i32
    %c0_i32_0 = arith.constant 0 : i32
    return %arg0, %c0_i32 : i32, i32
  }
}

module attributes {stable_mosaic.version = 11 : i64} {
  func.func @_vgae_kernel(%arg0: i32, %arg1: memref<256x128xf32, #tpu.memory_space<vmem>>, %arg2: memref<256x128xf32, #tpu.memory_space<vmem>>, %arg3: memref<128x256xbf16, #tpu.memory_space<vmem>>, %arg4: memref<128x128xbf16, #tpu.memory_space<vmem>>, %arg5: memref<256x128xf32, #tpu.memory_space<vmem>>, %arg6: memref<256x128xf32, #tpu.memory_space<vmem>>, %arg7: memref<256x128xf32, #tpu.memory_space<vmem>>) attributes {dimension_semantics = [#tpu.dimension_semantics<parallel>], iteration_bounds = array<i64: 1>, scalar_prefetch = 0 : i64, scratch_operands = 0 : i64, tpu.core_type = #tpu.core_type<tc>, window_params = [{transform_indices = @transform_0, window_bounds = array<i64: 256, 128>}, {transform_indices = @transform_1, window_bounds = array<i64: 256, 128>}, {pipeline_mode = #tpu.pipeline_mode<synchronous>, transform_indices = @transform_2, window_bounds = array<i64: 128, 256>}, {pipeline_mode = #tpu.pipeline_mode<synchronous>, transform_indices = @transform_3, window_bounds = array<i64: 128, 128>}, {transform_indices = @transform_4, window_bounds = array<i64: 256, 128>}, {transform_indices = @transform_5, window_bounds = array<i64: 256, 128>}, {transform_indices = @transform_6, window_bounds = array<i64: 256, 128>}]} {
    %c0 = arith.constant 0 : index
    %c0_0 = arith.constant 0 : index
    %0 = vector.load %arg1[%c0, %c0_0] : memref<256x128xf32, #tpu.memory_space<vmem>>, vector<256x128xf32>
    %1 = arith.truncf %0 : vector<256x128xf32> to vector<256x128xbf16>
    %c0_1 = arith.constant 0 : index
    %c0_2 = arith.constant 0 : index
    %2 = vector.load %arg3[%c0_1, %c0_2] : memref<128x256xbf16, #tpu.memory_space<vmem>>, vector<128x256xbf16>
    %cst = arith.constant dense<0.000000e+00> : vector<256x256xf32>
    %3 = tpu.matmul %1, %2, %cst {dimension_numbers = #tpu.dot_dimension_numbers<[1], [0], [0], [1], [0, 0, 1, 1], [], []>} : vector<256x128xbf16>, vector<128x256xbf16>, vector<256x256xf32> -> vector<256x256xf32>
    %cst_3 = arith.constant 0.000000e+00 : f32
    %4 = vector.broadcast %cst_3 : f32 to vector<256x256xf32>
    %5 = arith.maximumf %3, %4 : vector<256x256xf32>
    %6 = vector.extract_strided_slice %5 {offsets = [0, 0], sizes = [256, 128], strides = [1, 1]} : vector<256x256xf32> to vector<256x128xf32>
    %7 = vector.extract_strided_slice %5 {offsets = [0, 128], sizes = [256, 128], strides = [1, 1]} : vector<256x256xf32> to vector<256x128xf32>
    %c0_4 = arith.constant 0 : index
    %c0_5 = arith.constant 0 : index
    %8 = vector.load %arg2[%c0_4, %c0_5] : memref<256x128xf32, #tpu.memory_space<vmem>>, vector<256x128xf32>
    %9 = arith.mulf %8, %7 : vector<256x128xf32>
    %10 = arith.addf %9, %6 : vector<256x128xf32>
    %11 = arith.truncf %10 : vector<256x128xf32> to vector<256x128xbf16>
    %c0_6 = arith.constant 0 : index
    %c0_7 = arith.constant 0 : index
    %12 = vector.load %arg4[%c0_6, %c0_7] : memref<128x128xbf16, #tpu.memory_space<vmem>>, vector<128x128xbf16>
    %cst_8 = arith.constant dense<0.000000e+00> : vector<256x128xf32>
    %13 = tpu.matmul %11, %12, %cst_8 {dimension_numbers = #tpu.dot_dimension_numbers<[1], [0], [0], [1], [0, 0, 1, 1], [], []>} : vector<256x128xbf16>, vector<128x128xbf16>, vector<256x128xf32> -> vector<256x128xf32>
    %c0_9 = arith.constant 0 : index
    %c0_10 = arith.constant 0 : index
    %14 = vector.load %arg5[%c0_9, %c0_10] : memref<256x128xf32, #tpu.memory_space<vmem>>, vector<256x128xf32>
    tpu.vector_store %arg5[%c0_9, %c0_10], %6 {strides = array<i32>} : memref<256x128xf32, #tpu.memory_space<vmem>>, vector<256x128xf32>,
    %c0_11 = arith.constant 0 : index
    %c0_12 = arith.constant 0 : index
    %15 = vector.load %arg6[%c0_11, %c0_12] : memref<256x128xf32, #tpu.memory_space<vmem>>, vector<256x128xf32>
    tpu.vector_store %arg6[%c0_11, %c0_12], %7 {strides = array<i32>} : memref<256x128xf32, #tpu.memory_space<vmem>>, vector<256x128xf32>,
    %cst_13 = arith.constant 0.000000e+00 : f32
    %16 = vector.broadcast %cst_13 : f32 to vector<256x128xf32>
    %17 = arith.maximumf %13, %16 : vector<256x128xf32>
    %c0_14 = arith.constant 0 : index
    %c0_15 = arith.constant 0 : index
    %18 = vector.load %arg7[%c0_14, %c0_15] : memref<256x128xf32, #tpu.memory_space<vmem>>, vector<256x128xf32>
    tpu.vector_store %arg7[%c0_14, %c0_15], %17 {strides = array<i32>} : memref<256x128xf32, #tpu.memory_space<vmem>>, vector<256x128xf32>,
    return
  }
  func.func @transform_0(%arg0: i32) -> (i32, i32) {
    %c0_i32 = arith.constant 0 : i32
    %c0_i32_0 = arith.constant 0 : i32
    return %arg0, %c0_i32 : i32, i32
  }
  func.func @transform_1(%arg0: i32) -> (i32, i32) {
    %c0_i32 = arith.constant 0 : i32
    %c0_i32_0 = arith.constant 0 : i32
    return %arg0, %c0_i32 : i32, i32
  }
  func.func @transform_2(%arg0: i32) -> (i32, i32) {
    %c0_i32 = arith.constant 0 : i32
    %c0_i32_0 = arith.constant 0 : i32
    %c0_i32_1 = arith.constant 0 : i32
    return %c0_i32, %c0_i32_0 : i32, i32
  }
  func.func @transform_3(%arg0: i32) -> (i32, i32) {
    %c0_i32 = arith.constant 0 : i32
    %c0_i32_0 = arith.constant 0 : i32
    %c0_i32_1 = arith.constant 0 : i32
    return %c0_i32, %c0_i32_0 : i32, i32
  }
  func.func @transform_4(%arg0: i32) -> (i32, i32) {
    %c0_i32 = arith.constant 0 : i32
    %c0_i32_0 = arith.constant 0 : i32
    return %arg0, %c0_i32 : i32, i32
  }
  func.func @transform_5(%arg0: i32) -> (i32, i32) {
    %c0_i32 = arith.constant 0 : i32
    %c0_i32_0 = arith.constant 0 : i32
    return %arg0, %c0_i32 : i32, i32
  }
  func.func @transform_6(%arg0: i32) -> (i32, i32) {
    %c0_i32 = arith.constant 0 : i32
    %c0_i32_0 = arith.constant 0 : i32
    return %arg0, %c0_i32 : i32, i32
  }
}

module attributes {stable_mosaic.version = 11 : i64} {
  func.func @_gen_graph_kernel(%arg0: i32, %arg1: i32, %arg2: memref<128x128xf32, #tpu.memory_space<vmem>>, %arg3: memref<128x128xf32, #tpu.memory_space<vmem>>, %arg4: memref<128x128xf32, #tpu.memory_space<vmem>>, %arg5: memref<128x128xbf16, #tpu.memory_space<vmem>>, %arg6: memref<128x128xbf16, #tpu.memory_space<vmem>>, %arg7: memref<1x128x1xf32, #tpu.memory_space<vmem>>, %arg8: memref<1x1x128xf32, #tpu.memory_space<vmem>>) attributes {dimension_semantics = [#tpu.dimension_semantics<parallel>, #tpu.dimension_semantics<parallel>], iteration_bounds = array<i64: 1, 1>, scalar_prefetch = 0 : i64, scratch_operands = 0 : i64, tpu.core_type = #tpu.core_type<tc>, window_params = [{transform_indices = @transform_0, window_bounds = array<i64: 128, 128>}, {transform_indices = @transform_1, window_bounds = array<i64: 128, 128>}, {transform_indices = @transform_2, window_bounds = array<i64: 128, 128>}, {transform_indices = @transform_3, window_bounds = array<i64: 128, 128>}, {transform_indices = @transform_4, window_bounds = array<i64: 128, 128>}, {transform_indices = @transform_5, window_bounds = array<i64: 1, 128, 1>}, {transform_indices = @transform_6, window_bounds = array<i64: 1, 1, 128>}]} {
    %c0 = arith.constant 0 : index
    %c0_0 = arith.constant 0 : index
    %0 = vector.load %arg2[%c0, %c0_0] : memref<128x128xf32, #tpu.memory_space<vmem>>, vector<128x128xf32>
    %1 = arith.truncf %0 : vector<128x128xf32> to vector<128x128xbf16>
    %c0_1 = arith.constant 0 : index
    %c0_2 = arith.constant 0 : index
    %2 = vector.load %arg3[%c0_1, %c0_2] : memref<128x128xf32, #tpu.memory_space<vmem>>, vector<128x128xf32>
    %3 = arith.truncf %2 : vector<128x128xf32> to vector<128x128xbf16>
    %cst = arith.constant dense<0.000000e+00> : vector<128x128xf32>
    %4 = tpu.matmul %1, %3, %cst {dimension_numbers = #tpu.dot_dimension_numbers<[1], [1], [0], [0], [0, 0, 1, 0], [], []>} : vector<128x128xbf16>, vector<128x128xbf16>, vector<128x128xf32> -> vector<128x128xf32>
    %c0_3 = arith.constant 0 : index
    %c0_4 = arith.constant 0 : index
    %5 = vector.load %arg4[%c0_3, %c0_4] : memref<128x128xf32, #tpu.memory_space<vmem>>, vector<128x128xf32>
    tpu.vector_store %arg4[%c0_3, %c0_4], %4 {strides = array<i32>} : memref<128x128xf32, #tpu.memory_space<vmem>>, vector<128x128xf32>,
    %6 = arith.truncf %4 : vector<128x128xf32> to vector<128x128xbf16>
    %c0_5 = arith.constant 0 : index
    %c0_6 = arith.constant 0 : index
    %7 = vector.load %arg5[%c0_5, %c0_6] : memref<128x128xbf16, #tpu.memory_space<vmem>>, vector<128x128xbf16>
    tpu.vector_store %arg5[%c0_5, %c0_6], %6 {strides = array<i32>} : memref<128x128xbf16, #tpu.memory_space<vmem>>, vector<128x128xbf16>,
    %cst_7 = arith.constant dense<0.000000e+00> : vector<128x128xf32>
    %8 = tpu.matmul %3, %1, %cst_7 {dimension_numbers = #tpu.dot_dimension_numbers<[1], [1], [0], [0], [0, 0, 1, 0], [], []>} : vector<128x128xbf16>, vector<128x128xbf16>, vector<128x128xf32> -> vector<128x128xf32>
    %9 = arith.truncf %8 : vector<128x128xf32> to vector<128x128xbf16>
    %c0_8 = arith.constant 0 : index
    %c0_9 = arith.constant 0 : index
    %10 = vector.load %arg6[%c0_8, %c0_9] : memref<128x128xbf16, #tpu.memory_space<vmem>>, vector<128x128xbf16>
    tpu.vector_store %arg6[%c0_8, %c0_9], %9 {strides = array<i32>} : memref<128x128xbf16, #tpu.memory_space<vmem>>, vector<128x128xbf16>,
    %11 = math.absf %4 : vector<128x128xf32>
    %cst_10 = arith.constant dense<0.000000e+00> : vector<128xf32>
    %12 = vector.multi_reduction <add>, %11, %cst_10 [1] : vector<128x128xf32> to vector<128xf32>
    %13 = vector.shape_cast %12 : vector<128xf32> to vector<128x1xf32>
    %c0_11 = arith.constant 0 : index
    %c0_12 = arith.constant 0 : index
    %c0_13 = arith.constant 0 : index
    %14 = vector.load %arg7[%c0_11, %c0_12, %c0_13] : memref<1x128x1xf32, #tpu.memory_space<vmem>>, vector<1x128x1xf32>
    %15 = vector.shape_cast %14 : vector<1x128x1xf32> to vector<128x1xf32>
    %16 = vector.shape_cast %13 : vector<128x1xf32> to vector<1x128x1xf32>
    tpu.vector_store %arg7[%c0_11, %c0_12, %c0_13], %16 {strides = array<i32>} : memref<1x128x1xf32, #tpu.memory_space<vmem>>, vector<1x128x1xf32>,
    %cst_14 = arith.constant dense<0.000000e+00> : vector<128xf32>
    %17 = vector.multi_reduction <add>, %11, %cst_14 [0] : vector<128x128xf32> to vector<128xf32>
    %18 = vector.shape_cast %17 : vector<128xf32> to vector<1x128xf32>
    %c0_15 = arith.constant 0 : index
    %c0_16 = arith.constant 0 : index
    %c0_17 = arith.constant 0 : index
    %19 = vector.load %arg8[%c0_15, %c0_16, %c0_17] : memref<1x1x128xf32, #tpu.memory_space<vmem>>, vector<1x1x128xf32>
    %20 = vector.shape_cast %19 : vector<1x1x128xf32> to vector<1x128xf32>
    %21 = vector.shape_cast %18 : vector<1x128xf32> to vector<1x1x128xf32>
    tpu.vector_store %arg8[%c0_15, %c0_16, %c0_17], %21 {strides = array<i32>} : memref<1x1x128xf32, #tpu.memory_space<vmem>>, vector<1x1x128xf32>,
    return
  }
  func.func @transform_0(%arg0: i32, %arg1: i32) -> (i32, i32) {
    %c0_i32 = arith.constant 0 : i32
    %c0_i32_0 = arith.constant 0 : i32
    return %arg0, %c0_i32 : i32, i32
  }
  func.func @transform_1(%arg0: i32, %arg1: i32) -> (i32, i32) {
    %c0_i32 = arith.constant 0 : i32
    %c0_i32_0 = arith.constant 0 : i32
    return %arg1, %c0_i32 : i32, i32
  }
  func.func @transform_2(%arg0: i32, %arg1: i32) -> (i32, i32) {
    %c0_i32 = arith.constant 0 : i32
    return %arg0, %arg1 : i32, i32
  }
  func.func @transform_3(%arg0: i32, %arg1: i32) -> (i32, i32) {
    %c0_i32 = arith.constant 0 : i32
    return %arg0, %arg1 : i32, i32
  }
  func.func @transform_4(%arg0: i32, %arg1: i32) -> (i32, i32) {
    %c0_i32 = arith.constant 0 : i32
    return %arg1, %arg0 : i32, i32
  }
  func.func @transform_5(%arg0: i32, %arg1: i32) -> (i32, i32, i32) {
    %c0_i32 = arith.constant 0 : i32
    %c0_i32_0 = arith.constant 0 : i32
    return %arg1, %arg0, %c0_i32 : i32, i32, i32
  }
  func.func @transform_6(%arg0: i32, %arg1: i32) -> (i32, i32, i32) {
    %c0_i32 = arith.constant 0 : i32
    %c0_i32_0 = arith.constant 0 : i32
    return %arg0, %c0_i32, %arg1 : i32, i32, i32
  }
}

module attributes {stable_mosaic.version = 11 : i64} {
  func.func @_ab_rowscaled_kernel(%arg0: i32, %arg1: i32, %arg2: memref<128x128xbf16, #tpu.memory_space<vmem>>, %arg3: memref<128x128xbf16, #tpu.memory_space<vmem>>, %arg4: memref<128x1xf32, #tpu.memory_space<vmem>>, %arg5: memref<128x128xf32, #tpu.memory_space<vmem>>) attributes {dimension_semantics = [#tpu.dimension_semantics<parallel>, #tpu.dimension_semantics<arbitrary>], iteration_bounds = array<i64: 1, 1>, scalar_prefetch = 0 : i64, scratch_operands = 0 : i64, tpu.core_type = #tpu.core_type<tc>, window_params = [{transform_indices = @transform_0, window_bounds = array<i64: 128, 128>}, {transform_indices = @transform_1, window_bounds = array<i64: 128, 128>}, {transform_indices = @transform_2, window_bounds = array<i64: 128, 1>}, {transform_indices = @transform_3, window_bounds = array<i64: 128, 128>}]} {
    %c0_i32 = arith.constant 0 : i32
    %0 = arith.cmpi eq, %arg1, %c0_i32 : i32
    %1 = arith.extui %0 : i1 to i32
    %c0_i32_0 = arith.constant 0 : i32
    %2 = arith.cmpi ne, %1, %c0_i32_0 : i32
    scf.if %2 {
      %cst_10 = arith.constant 0.000000e+00 : f32
      %12 = vector.broadcast %cst_10 : f32 to vector<128x128xf32>
      %c0_11 = arith.constant 0 : index
      %c0_12 = arith.constant 0 : index
      %13 = vector.load %arg5[%c0_11, %c0_12] : memref<128x128xf32, #tpu.memory_space<vmem>>, vector<128x128xf32>
      tpu.vector_store %arg5[%c0_11, %c0_12], %12 {strides = array<i32>} : memref<128x128xf32, #tpu.memory_space<vmem>>, vector<128x128xf32>,
    } else {
    }
    %c0 = arith.constant 0 : index
    %c0_1 = arith.constant 0 : index
    %3 = vector.load %arg5[%c0, %c0_1] : memref<128x128xf32, #tpu.memory_space<vmem>>, vector<128x128xf32>
    %c0_2 = arith.constant 0 : index
    %c0_3 = arith.constant 0 : index
    %4 = vector.load %arg2[%c0_2, %c0_3] : memref<128x128xbf16, #tpu.memory_space<vmem>>, vector<128x128xbf16>
    %c0_4 = arith.constant 0 : index
    %c0_5 = arith.constant 0 : index
    %5 = vector.load %arg3[%c0_4, %c0_5] : memref<128x128xbf16, #tpu.memory_space<vmem>>, vector<128x128xbf16>
    %cst = arith.constant dense<0.000000e+00> : vector<128x128xf32>
    %6 = tpu.matmul %4, %5, %cst {dimension_numbers = #tpu.dot_dimension_numbers<[1], [0], [0], [1], [0, 0, 1, 1], [], []>} : vector<128x128xbf16>, vector<128x128xbf16>, vector<128x128xf32> -> vector<128x128xf32>
    %7 = arith.addf %3, %6 : vector<128x128xf32>
    %c0_6 = arith.constant 0 : index
    %c0_7 = arith.constant 0 : index
    %8 = vector.load %arg5[%c0_6, %c0_7] : memref<128x128xf32, #tpu.memory_space<vmem>>, vector<128x128xf32>
    tpu.vector_store %arg5[%c0_6, %c0_7], %7 {strides = array<i32>} : memref<128x128xf32, #tpu.memory_space<vmem>>, vector<128x128xf32>,
    %c0_i32_8 = arith.constant 0 : i32
    %9 = arith.cmpi eq, %arg1, %c0_i32_8 : i32
    %10 = arith.extui %9 : i1 to i32
    %c0_i32_9 = arith.constant 0 : i32
    %11 = arith.cmpi ne, %10, %c0_i32_9 : i32
    scf.if %11 {
      %c0_10 = arith.constant 0 : index
      %c0_11 = arith.constant 0 : index
      %12 = vector.load %arg5[%c0_10, %c0_11] : memref<128x128xf32, #tpu.memory_space<vmem>>, vector<128x128xf32>
      %c0_12 = arith.constant 0 : index
      %c0_13 = arith.constant 0 : index
      %13 = vector.load %arg4[%c0_12, %c0_13] : memref<128x1xf32, #tpu.memory_space<vmem>>, vector<128x1xf32>
      %14 = vector.broadcast %13 : vector<128x1xf32> to vector<128x128xf32>
      %15 = arith.mulf %12, %14 : vector<128x128xf32>
      %c0_14 = arith.constant 0 : index
      %c0_15 = arith.constant 0 : index
      %16 = vector.load %arg5[%c0_14, %c0_15] : memref<128x128xf32, #tpu.memory_space<vmem>>, vector<128x128xf32>
      tpu.vector_store %arg5[%c0_14, %c0_15], %15 {strides = array<i32>} : memref<128x128xf32, #tpu.memory_space<vmem>>, vector<128x128xf32>,
    } else {
    }
    return
  }
  func.func @transform_0(%arg0: i32, %arg1: i32) -> (i32, i32) {
    %c0_i32 = arith.constant 0 : i32
    return %arg0, %arg1 : i32, i32
  }
  func.func @transform_1(%arg0: i32, %arg1: i32) -> (i32, i32) {
    %c0_i32 = arith.constant 0 : i32
    %c0_i32_0 = arith.constant 0 : i32
    return %arg1, %c0_i32 : i32, i32
  }
  func.func @transform_2(%arg0: i32, %arg1: i32) -> (i32, i32) {
    %c0_i32 = arith.constant 0 : i32
    %c0_i32_0 = arith.constant 0 : i32
    return %arg0, %c0_i32 : i32, i32
  }
  func.func @transform_3(%arg0: i32, %arg1: i32) -> (i32, i32) {
    %c0_i32 = arith.constant 0 : i32
    %c0_i32_0 = arith.constant 0 : i32
    return %arg0, %c0_i32 : i32, i32
  }
}

</mosaic_0001>

<bundles_post_ra>
// kernel: adagcl_forward.11
= control target key start
LH: loop header
LB: loop body
LE: loop exit
PB: predicated region body
PF: predicated region fallthrough
CT: control target
= control target key end

     0   :  { %s664_s2 = inlined_call_operand.vmem [shape: f32[128,128], index: 2, kind: input, shape index: {}]   ;;  %s665_s1 = inlined_call_operand.vmem [shape: f32[128,128], index: 1, kind: input, shape index: {}]   ;;  %s666_s0 = inlined_call_operand.vmem [shape: f32[128,128], index: 0, kind: input, shape index: {}, may-alias: {0,3}]   ;;  %s667_s3 = inlined_call_operand.vmem [shape: f32[128,128], index: 3, kind: output, shape index: {}, may-alias: {0,3}]  }
   0x1   :  { %v53_v0 = vld [vmem:[%s664_s2 + $0x70] sm:$0xff]  ;;  %v54_v1 = vld [vmem:[%s664_s2 + $0x78] sm:$0xff]  ;;  %v51_v2 = vld [vmem:[%s664_s2 + $0x60] sm:$0xff] }
   0x2   :  { %v62_v3 = vpack.c.bf16 %v54_v1, %v53_v0  ;;  %v52_v4 = vld [vmem:[%s664_s2 + $0x68] sm:$0xff]  ;;  %v49_v6 = vld [vmem:[%s664_s2 + $0x50] sm:$0xff]  ;;  %v15_v7 = vld [vmem:[%s665_s1] sm:$0xff] }
   0x3   :  { %v61_v5 = vpack.c.bf16 %v52_v4, %v51_v2  ;;  %v16_v8 = vld [vmem:[%s665_s1 + $0x8] sm:$0xff]  ;;  %v50_v9 = vld [vmem:[%s664_s2 + $0x58] sm:$0xff]  ;;  %v23_v11 = vld [vmem:[%s665_s1 + $0x40] sm:$0xff] }
   0x4   :  { %340 = vmatprep.subr.bf16.mxu0 %v62_v3  ;;  %372 = vmatprep.subr.bf16.mxu1 %v62_v3  ;;  %v31_v10 = vpack.c.bf16 %v16_v8, %v15_v7  ;;  %v24_v12 = vld [vmem:[%s665_s1 + $0x48] sm:$0xff]  ;;  %v60_v14 = vpack.c.bf16 %v50_v9, %v49_v6  ;;  %v47_v15 = vld [vmem:[%s664_s2 + $0x40] sm:$0xff]  ;;  %v45_v18 = vld [vmem:[%s664_s2 + $0x30] sm:$0xff] }
   0x5   :  { %341 = vmatpush3.bf16.xpose.msra.mxu0 %v62_v3  ;;  %380 = vmatpush3.bf16.xpose.msra.mxu1 %v62_v3  ;;  %v35_v13 = vpack.c.bf16 %v24_v12, %v23_v11  ;;  %v48_v16 = vld [vmem:[%s664_s2 + $0x48] sm:$0xff]  ;;  %v46_v19 = vld [vmem:[%s664_s2 + $0x38] sm:$0xff]  ;;  %v43_v21 = vld [vmem:[%s664_s2 + $0x20] sm:$0xff] }
   0x6   :  { %342 = vmatprep.subr.bf16.mxu0 %v61_v5  ;;  %373 = vmatprep.subr.bf16.mxu1 %v61_v5  ;;  %v59_v17 = vpack.c.bf16 %v48_v16, %v47_v15  ;;  %v58_v20 = vpack.c.bf16 %v46_v19, %v45_v18  ;;  %v44_v22 = vld [vmem:[%s664_s2 + $0x28] sm:$0xff]  ;;  %v41_v24 = vld [vmem:[%s664_s2 + $0x10] sm:$0xff]  ;;  %v42_v25 = vld [vmem:[%s664_s2 + $0x18] sm:$0xff] }
   0x7   :  { %356 = vmatprep.mubr.bf16.mxu0 %v31_v10  ;;  %364 = vmatprep.mubr.bf16.mxu1 %v35_v13  ;;  %v57_v23 = vpack.c.bf16 %v44_v22, %v43_v21  ;;  %v56_v26 = vpack.c.bf16 %v42_v25, %v41_v24  ;;  %v39_v27 = vld [vmem:[%s664_s2] sm:$0xff]  ;;  %v40_v28 = vld [vmem:[%s664_s2 + $0x8] sm:$0xff]  ;;  %v17_v30 = vld [vmem:[%s665_s1 + $0x10] sm:$0xff] }
   0x8   :  { %v55_v29 = vpack.c.bf16 %v40_v28, %v39_v27  ;;  %v18_v31 = vld [vmem:[%s665_s1 + $0x18] sm:$0xff]  ;;  %v25_v32 = vld [vmem:[%s665_s1 + $0x50] sm:$0xff]  ;;  %v19_v34 = vld [vmem:[%s665_s1 + $0x20] sm:$0xff] }
   0x9   :  { %v26_v33 = vld [vmem:[%s665_s1 + $0x58] sm:$0xff]  ;;  %v20_v35 = vld [vmem:[%s665_s1 + $0x28] sm:$0xff]  ;;  %v27_v36 = vld [vmem:[%s665_s1 + $0x60] sm:$0xff]  ;;  %v32_v38 = vpack.c.bf16 %v18_v31, %v17_v30 }
   0xa   :  { %v28_v37 = vld [vmem:[%s665_s1 + $0x68] sm:$0xff]  ;;  %v36_v39 = vpack.c.bf16 %v26_v33, %v25_v32  ;;  %v33_v40 = vpack.c.bf16 %v20_v35, %v19_v34  ;;  %v21_v42 = vld [vmem:[%s665_s1 + $0x30] sm:$0xff]  ;;  %v22_v43 = vld [vmem:[%s665_s1 + $0x38] sm:$0xff] }
   0xb   :  { %v37_v41 = vpack.c.bf16 %v28_v37, %v27_v36  ;;  %v29_v44 = vld [vmem:[%s665_s1 + $0x70] sm:$0xff]  ;;  %v30_v45 = vld [vmem:[%s665_s1 + $0x78] sm:$0xff]  ;;  %v34_v46 = vpack.c.bf16 %v22_v43, %v21_v42 }
   0xc   :  { %v38_v47 = vpack.c.bf16 %v30_v45, %v29_v44  ;;  %v162_v44 = vld [vmem:[%s666_s0 + $0x10] sm:$0xff] }
   0xd   :  { %343 = vmatpush3.bf16.xpose.msra.mxu0 %v61_v5  ;;  %381 = vmatpush3.bf16.xpose.msra.mxu1 %v61_v5 }
   0xe   :  { %344 = vmatprep.subr.bf16.mxu0 %v60_v14  ;;  %374 = vmatprep.subr.bf16.mxu1 %v60_v14 }
  0x15   :  { %345 = vmatpush3.bf16.xpose.msra.mxu0 %v60_v14  ;;  %382 = vmatpush3.bf16.xpose.msra.mxu1 %v60_v14 }
  0x16   :  { %346 = vmatprep.subr.bf16.mxu0 %v59_v17  ;;  %375 = vmatprep.subr.bf16.mxu1 %v59_v17 }
  0x1d   :  { %347 = vmatpush3.bf16.xpose.msra.mxu0 %v59_v17  ;;  %383 = vmatpush3.bf16.xpose.msra.mxu1 %v59_v17 }
  0x1e   :  { %348 = vmatprep.subr.bf16.mxu0 %v58_v20  ;;  %376 = vmatprep.subr.bf16.mxu1 %v58_v20 }
  0x25   :  { %349 = vmatpush3.bf16.xpose.msra.mxu0 %v58_v20  ;;  %384 = vmatpush3.bf16.xpose.msra.mxu1 %v58_v20 }
  0x26   :  { %350 = vmatprep.subr.bf16.mxu0 %v57_v23  ;;  %377 = vmatprep.subr.bf16.mxu1 %v57_v23 }
  0x2d   :  { %351 = vmatpush3.bf16.xpose.msra.mxu0 %v57_v23  ;;  %385 = vmatpush3.bf16.xpose.msra.mxu1 %v57_v23 }
  0x2e   :  { %352 = vmatprep.subr.bf16.mxu0 %v56_v26  ;;  %378 = vmatprep.subr.bf16.mxu1 %v56_v26 }
  0x35   :  { %353 = vmatpush3.bf16.xpose.msra.mxu0 %v56_v26  ;;  %386 = vmatpush3.bf16.xpose.msra.mxu1 %v56_v26 }
  0x36   :  { %354 = vmatprep.subr.bf16.mxu0 %v55_v29  ;;  %379 = vmatprep.subr.bf16.mxu1 %v55_v29 }
  0x3d   :  { %355 = vmatpush3.bf16.xpose.msra.mxu0 %v55_v29  ;;  %387 = vmatpush3.bf16.xpose.msra.mxu1 %v55_v29 }
  0x44   :  { %357 = vmatmul.mubr.bf16.vlgmr.msra.gmra.mxu0 %v32_v38  ;;  %365 = vmatmul.mubr.bf16.vlgmr.msra.gmra.mxu1 %v36_v39 }
  0x45   :  { %360 = vmatprep.mubr.bf16.mxu0 %v33_v40  ;;  %368 = vmatprep.mubr.bf16.mxu1 %v37_v41 }
  0x4c   :  { %361 = vmatmul.mubr.bf16.gmra.mxu0 %v34_v46  ;;  %369 = vmatmul.mubr.bf16.gmra.mxu1 %v38_v47  ;;  %v170_v47 = vld [vmem:[%s666_s0 + $0x50] sm:$0xff] }
 0x104   :  { %v358_v48 = vpop.f32.mrf.mxu0  ;;  %v366_v49 = vpop.f32.mrf.mxu1 }
 0x105   :  { %v310_v50 = vmul.f32 -1.442695, %v358_v48  ;;  %v318_v51 = vmul.f32 -1.442695, %v366_v49 }
 0x106   :  { %v97_v52 = vpop.f32.mrf.mxu0  ;;  %v129_v53 = vpop.f32.mrf.mxu1 }
 0x107   :  { %388 = vpow2.f32 %v310_v50  ;;  %v308_v54 = vmul.f32 -1.442695, %v97_v52  ;;  %v316_v55 = vmul.f32 -1.442695, %v129_v53  ;;  %v160_v50 = vld [vmem:[%s666_s0] sm:$0xff] }
 0x108   :  { %390 = vpow2.f32 %v318_v51  ;;  %v359_v56 = vpop.f32.mrf.mxu0  ;;  %v367_v57 = vpop.f32.mrf.mxu1 }
 0x109   :  { %392 = vpow2.f32 %v308_v54  ;;  %v311_v58 = vmul.f32 -1.442695, %v359_v56  ;;  %v319_v59 = vmul.f32 -1.442695, %v367_v57  ;;  %v168_v54 = vld [vmem:[%s666_s0 + $0x40] sm:$0xff]  ;;  %v163_v57 = vld [vmem:[%s666_s0 + $0x18] sm:$0xff] }
 0x10a   :  { %394 = vpow2.f32 %v316_v55  ;;  %v100_v60 = vpop.f32.mrf.mxu0  ;;  %v132_v61 = vpop.f32.mrf.mxu1 }
 0x10b   :  { %396 = vpow2.f32 %v311_v58  ;;  %v309_v62 = vmul.f32 -1.442695, %v100_v60  ;;  %v317_v63 = vmul.f32 -1.442695, %v132_v61 }
 0x10c   :  { %398 = vpow2.f32 %v319_v59  ;;  %v362_v0 = vpop.f32.mrf.mxu0  ;;  %v370_v1 = vpop.f32.mrf.mxu1 }
 0x10d   :  { %400 = vpow2.f32 %v309_v62  ;;  %v314_v2 = vmul.f32 -1.442695, %v362_v0  ;;  %v322_v3 = vmul.f32 -1.442695, %v370_v1 }
 0x10e   :  { %402 = vpow2.f32 %v317_v63  ;;  %v113_v4 = vpop.f32.mrf.mxu0  ;;  %v145_v5 = vpop.f32.mrf.mxu1 }
 0x10f   :  { %404 = vpow2.f32 %v314_v2  ;;  %v312_v6 = vmul.f32 -1.442695, %v113_v4  ;;  %v320_v7 = vmul.f32 -1.442695, %v145_v5 }
 0x110   :  { %406 = vpow2.f32 %v322_v3  ;;  %v363_v8 = vpop.f32.mrf.mxu0  ;;  %v371_v9 = vpop.f32.mrf.mxu1 }
 0x111   :  { %408 = vpow2.f32 %v312_v6  ;;  %v315_v10 = vmul.f32 -1.442695, %v363_v8  ;;  %v323_v11 = vmul.f32 -1.442695, %v371_v9 }
 0x112   :  { %410 = vpow2.f32 %v320_v7  ;;  %v116_v12 = vpop.f32.mrf.mxu0  ;;  %v148_v13 = vpop.f32.mrf.mxu1 }
 0x113   :  { %412 = vpow2.f32 %v315_v10  ;;  %v313_v14 = vmul.f32 -1.442695, %v116_v12  ;;  %v321_v15 = vmul.f32 -1.442695, %v148_v13 }
 0x114   :  { %v389_v16 = vpop.eup %388  ;;  %414 = vpow2.f32 %v323_v11 }
 0x115   :  { %v391_v17 = vpop.eup %390  ;;  %v226_v18 = vadd.f32 1.0, %v389_v16  ;;  %416 = vpow2.f32 %v313_v14 }
 0x116   :  { %v393_v19 = vpop.eup %392  ;;  %v234_v20 = vadd.f32 1.0, %v391_v17  ;;  %418 = vpow2.f32 %v321_v15 }
 0x117   :  { %v395_v21 = vpop.eup %394  ;;  %420 = vrcp.f32 %v226_v18  ;;  %v224_v22 = vadd.f32 1.0, %v393_v19 }
 0x118   :  { %v397_v23 = vpop.eup %396  ;;  %422 = vrcp.f32 %v234_v20  ;;  %v232_v24 = vadd.f32 1.0, %v395_v21 }
 0x119   :  { %v399_v25 = vpop.eup %398  ;;  %424 = vrcp.f32 %v224_v22  ;;  %v227_v26 = vadd.f32 1.0, %v397_v23 }
 0x11a   :  { %v401_v27 = vpop.eup %400  ;;  %426 = vrcp.f32 %v232_v24  ;;  %v235_v28 = vadd.f32 1.0, %v399_v25 }
 0x11b   :  { %v403_v29 = vpop.eup %402  ;;  %428 = vrcp.f32 %v227_v26  ;;  %v225_v30 = vadd.f32 1.0, %v401_v27 }
 0x11c   :  { %v405_v31 = vpop.eup %404  ;;  %430 = vrcp.f32 %v235_v28  ;;  %v233_v32 = vadd.f32 1.0, %v403_v29 }
 0x11d   :  { %v407_v33 = vpop.eup %406  ;;  %432 = vrcp.f32 %v225_v30  ;;  %v230_v34 = vadd.f32 1.0, %v405_v31 }
 0x11e   :  { %v409_v35 = vpop.eup %408  ;;  %434 = vrcp.f32 %v233_v32  ;;  %v238_v36 = vadd.f32 1.0, %v407_v33 }
 0x11f   :  { %v411_v37 = vpop.eup %410  ;;  %436 = vrcp.f32 %v230_v34  ;;  %v228_v38 = vadd.f32 1.0, %v409_v35 }
 0x120   :  { %v413_v39 = vpop.eup %412  ;;  %438 = vrcp.f32 %v238_v36  ;;  %v236_v40 = vadd.f32 1.0, %v411_v37 }
 0x121   :  { %v415_v41 = vpop.eup %414  ;;  %440 = vrcp.f32 %v228_v38  ;;  %v231_v42 = vadd.f32 1.0, %v413_v39 }
 0x122   :  { %v417_v43 = vpop.eup %416  ;;  %442 = vrcp.f32 %v236_v40  ;;  %v239_v45 = vadd.f32 1.0, %v415_v41 }
 0x123   :  { %v419_v46 = vpop.eup %418  ;;  %444 = vrcp.f32 %v231_v42  ;;  %v229_v48 = vadd.f32 1.0, %v417_v43 }
 0x124   :  { %v421_v49 = vpop.eup %420  ;;  %446 = vrcp.f32 %v239_v45  ;;  %v237_v51 = vadd.f32 1.0, %v419_v46 }
 0x125   :  { %v423_v52 = vpop.eup %422  ;;  %v274_v53 = vadd.f32 %v421_v49, %v162_v44  ;;  %448 = vrcp.f32 %v229_v48 }
 0x126   :  { %v425_v55 = vpop.eup %424  ;;  %v282_v56 = vadd.f32 %v423_v52, %v170_v47  ;;  %450 = vrcp.f32 %v237_v51 }
 0x127   :  { %v427_v58 = vpop.eup %426  ;;  %290 = vst [vmem:[%s667_s3 + $0x10] sm:$0xff] %v274_v53  ;;  %v272_v59 = vadd.f32 %v425_v55, %v160_v50 }
 0x128   :  { %v429_v61 = vpop.eup %428  ;;  %v280_v62 = vadd.f32 %v427_v58, %v168_v54 }
 0x129   :  { %v431_v0 = vpop.eup %430  ;;  %v275_v1 = vadd.f32 %v429_v61, %v163_v57 }
 0x12a   :  { %v433_v3 = vpop.eup %432 }
 0x12b   :  { %v435_v6 = vpop.eup %434 }
 0x12c   :  { %v437_v9 = vpop.eup %436 }
 0x12d   :  { %v439_v12 = vpop.eup %438 }
 0x12e   :  { %v171_v60 = vld [vmem:[%s666_s0 + $0x58] sm:$0xff]  ;;  %v441_v15 = vpop.eup %440 }
 0x12f   :  { %298 = vst [vmem:[%s667_s3 + $0x50] sm:$0xff] %v282_v56  ;;  %v283_v4 = vadd.f32 %v431_v0, %v171_v60  ;;  %v443_v18 = vpop.eup %442 }
 0x130   :  { %v445_v21 = vpop.eup %444 }
 0x131   :  { %v447_v24 = vpop.eup %446 }
 0x132   :  { %v449_v27 = vpop.eup %448 }
 0x133   :  { %v451_v29 = vpop.eup %450 }
 0x136   :  { %v161_v63 = vld [vmem:[%s666_s0 + $0x8] sm:$0xff] }
 0x137   :  { %288 = vst [vmem:[%s667_s3] sm:$0xff] %v272_v59  ;;  %v273_v7 = vadd.f32 %v433_v3, %v161_v63 }
 0x13e   :  { %v169_v2 = vld [vmem:[%s666_s0 + $0x48] sm:$0xff] }
 0x13f   :  { %296 = vst [vmem:[%s667_s3 + $0x40] sm:$0xff] %v280_v62  ;;  %v281_v10 = vadd.f32 %v435_v6, %v169_v2 }
 0x146   :  { %v166_v5 = vld [vmem:[%s666_s0 + $0x30] sm:$0xff] }
 0x147   :  { %291 = vst [vmem:[%s667_s3 + $0x18] sm:$0xff] %v275_v1  ;;  %v278_v13 = vadd.f32 %v437_v9, %v166_v5 }
 0x14e   :  { %v174_v8 = vld [vmem:[%s666_s0 + $0x70] sm:$0xff] }
 0x14f   :  { %299 = vst [vmem:[%s667_s3 + $0x58] sm:$0xff] %v283_v4  ;;  %v286_v16 = vadd.f32 %v439_v12, %v174_v8 }
 0x156   :  { %v164_v11 = vld [vmem:[%s666_s0 + $0x20] sm:$0xff] }
 0x157   :  { %289 = vst [vmem:[%s667_s3 + $0x8] sm:$0xff] %v273_v7  ;;  %v276_v19 = vadd.f32 %v441_v15, %v164_v11 }
 0x15e   :  { %v172_v14 = vld [vmem:[%s666_s0 + $0x60] sm:$0xff] }
 0x15f   :  { %297 = vst [vmem:[%s667_s3 + $0x48] sm:$0xff] %v281_v10  ;;  %v284_v22 = vadd.f32 %v443_v18, %v172_v14 }
 0x166   :  { %v167_v17 = vld [vmem:[%s666_s0 + $0x38] sm:$0xff] }
 0x167   :  { %294 = vst [vmem:[%s667_s3 + $0x30] sm:$0xff] %v278_v13  ;;  %v279_v25 = vadd.f32 %v445_v21, %v167_v17 }
 0x16e   :  { %v175_v20 = vld [vmem:[%s666_s0 + $0x78] sm:$0xff] }
 0x16f   :  { %302 = vst [vmem:[%s667_s3 + $0x70] sm:$0xff] %v286_v16  ;;  %v287_v28 = vadd.f32 %v447_v24, %v175_v20 }
 0x176   :  { %v165_v23 = vld [vmem:[%s666_s0 + $0x28] sm:$0xff] }
 0x177   :  { %292 = vst [vmem:[%s667_s3 + $0x20] sm:$0xff] %v276_v19  ;;  %v277_v30 = vadd.f32 %v449_v27, %v165_v23 }
 0x17e   :  { %v173_v26 = vld [vmem:[%s666_s0 + $0x68] sm:$0xff] }
 0x17f   :  { %300 = vst [vmem:[%s667_s3 + $0x60] sm:$0xff] %v284_v22  ;;  %295 = vst [vmem:[%s667_s3 + $0x38] sm:$0xff] %v279_v25  ;;  %v285_v31 = vadd.f32 %v451_v29, %v173_v26 }
 0x180   :  { %303 = vst [vmem:[%s667_s3 + $0x78] sm:$0xff] %v287_v28  ;;  %293 = vst [vmem:[%s667_s3 + $0x28] sm:$0xff] %v277_v30 }
 0x181   :  { %301 = vst [vmem:[%s667_s3 + $0x68] sm:$0xff] %v285_v31 }

// kernel: adagcl_forward.12
= control target key start
LH: loop header
LB: loop body
LE: loop exit
PB: predicated region body
PF: predicated region fallthrough
CT: control target
= control target key end

     0   :  { %s2492_s0 = inlined_call_operand.vmem [shape: bf16[256,256], index: 0, kind: input, shape index: {}]   ;;  %s2493_s1 = inlined_call_operand.vmem [shape: bf16[256,256], index: 1, kind: input, shape index: {}]   ;;  %s2494_s2 = inlined_call_operand.vmem [shape: f32[1,128], index: 2, kind: input, shape index: {}]   ;;  %s2495_s3 = inlined_call_operand.vmem [shape: f32[256,128], index: 3, kind: output, shape index: {0}]   ;;  %s2496_s4 = inlined_call_operand.vmem [shape: f32[256,128], index: 4, kind: output, shape index: {1}]   ;;  %s2497_s5 = inlined_call_operand.hbm [shape: bf16[256,256], index: 5, kind: output, shape index: {2}]  }
   0x1   :  { %v1661_v0 = vld [vmem:[%s2493_s1 + $0x74] ss:$8 sps:$4 sm:$0xff]   ;;  %v1663_v1 = vld [vmem:[%s2493_s1 + $0x70] ss:$8 sps:$4 sm:$0xff]   ;;  %v1664_v2 = vld [vmem:[%s2493_s1 + $0x64] ss:$8 sps:$4 sm:$0xff]  }
   0x2   :  { %534 = vmatprep.subr.bf16.mxu0 %v1661_v0  ;;  %1626 = vmatprep.subr.bf16.mxu1 %v1661_v0  ;;  %v1666_v3 = vld [vmem:[%s2493_s1 + $0x60] ss:$8 sps:$4 sm:$0xff]   ;;  %v1667_v4 = vld [vmem:[%s2493_s1 + $0x54] ss:$8 sps:$4 sm:$0xff]   ;;  %v1669_v5 = vld [vmem:[%s2493_s1 + $0x50] ss:$8 sps:$4 sm:$0xff]  }
   0x3   :  { %535 = vmatpush1.bf16.msra.mxu0 %v1663_v1  ;;  %1642 = vmatpush1.bf16.msra.mxu1 %v1663_v1  ;;  %v1670_v6 = vld [vmem:[%s2493_s1 + $0x44] ss:$8 sps:$4 sm:$0xff]   ;;  %v1672_v7 = vld [vmem:[%s2493_s1 + $0x40] ss:$8 sps:$4 sm:$0xff]   ;;  %v1673_v8 = vld [vmem:[%s2493_s1 + $0x34] ss:$8 sps:$4 sm:$0xff]  }
   0x4   :  { %536 = vmatprep.subr.bf16.mxu0 %v1664_v2  ;;  %1627 = vmatprep.subr.bf16.mxu1 %v1664_v2  ;;  %v1675_v9 = vld [vmem:[%s2493_s1 + $0x30] ss:$8 sps:$4 sm:$0xff]   ;;  %v1676_v10 = vld [vmem:[%s2493_s1 + $0x24] ss:$8 sps:$4 sm:$0xff]   ;;  %v1678_v11 = vld [vmem:[%s2493_s1 + $0x20] ss:$8 sps:$4 sm:$0xff]  }
   0x5   :  { %v1679_v12 = vld [vmem:[%s2493_s1 + $0x14] ss:$8 sps:$4 sm:$0xff]   ;;  %v1711_v13 = vld [vmem:[%s2492_s0 + $0x4] ss:$8 sps:$4 sm:$0xff]   ;;  %v1681_v14 = vld [vmem:[%s2493_s1 + $0x10] ss:$8 sps:$4 sm:$0xff]  }
   0x6   :  { %v1714_v15 = vld [vmem:[%s2492_s0 + $0x84] ss:$8 sps:$4 sm:$0xff]   ;;  %566 = vmatprep.mubr.bf16.mxu0 %v1711_v13  ;;  %v1684_v17 = vld [vmem:[%s2493_s1] ss:$8 sps:$4 sm:$0xff]   ;;  %v1685_v18 = vld [vmem:[%s2493_s1 + $0xf4] ss:$8 sps:$4 sm:$0xff]  }
   0x7   :  { %537 = vmatpush1.bf16.msra.mxu0 %v1666_v3  ;;  %1643 = vmatpush1.bf16.msra.mxu1 %v1666_v3  ;;  %v1682_v16 = vld [vmem:[%s2493_s1 + $0x4] ss:$8 sps:$4 sm:$0xff]   ;;  %v1687_v19 = vld [vmem:[%s2493_s1 + $0xf0] ss:$8 sps:$4 sm:$0xff]   ;;  %v1690_v21 = vld [vmem:[%s2493_s1 + $0xe0] ss:$8 sps:$4 sm:$0xff]  }
   0x8   :  { %538 = vmatprep.subr.bf16.mxu0 %v1667_v4  ;;  %1628 = vmatprep.subr.bf16.mxu1 %v1667_v4  ;;  %v1688_v20 = vld [vmem:[%s2493_s1 + $0xe4] ss:$8 sps:$4 sm:$0xff]   ;;  %v1691_v22 = vld [vmem:[%s2493_s1 + $0xd4] ss:$8 sps:$4 sm:$0xff]   ;;  %v1693_v23 = vld [vmem:[%s2493_s1 + $0xd0] ss:$8 sps:$4 sm:$0xff]  }
   0x9   :  { %646 = vmatprep.mubr.bf16.mxu1 %v1714_v15  ;;  %v1694_v24 = vld [vmem:[%s2493_s1 + $0xc4] ss:$8 sps:$4 sm:$0xff]  }
   0xb   :  { %539 = vmatpush1.bf16.msra.mxu0 %v1669_v5  ;;  %1644 = vmatpush1.bf16.msra.mxu1 %v1669_v5 }
   0xc   :  { %540 = vmatprep.subr.bf16.mxu0 %v1670_v6  ;;  %1629 = vmatprep.subr.bf16.mxu1 %v1670_v6 }
   0xf   :  { %541 = vmatpush1.bf16.msra.mxu0 %v1672_v7  ;;  %1645 = vmatpush1.bf16.msra.mxu1 %v1672_v7 }
  0x10   :  { %542 = vmatprep.subr.bf16.mxu0 %v1673_v8  ;;  %1630 = vmatprep.subr.bf16.mxu1 %v1673_v8 }
  0x13   :  { %543 = vmatpush1.bf16.msra.mxu0 %v1675_v9  ;;  %1646 = vmatpush1.bf16.msra.mxu1 %v1675_v9 }
  0x14   :  { %544 = vmatprep.subr.bf16.mxu0 %v1676_v10  ;;  %1631 = vmatprep.subr.bf16.mxu1 %v1676_v10 }
  0x17   :  { %545 = vmatpush1.bf16.msra.mxu0 %v1678_v11  ;;  %1647 = vmatpush1.bf16.msra.mxu1 %v1678_v11 }
  0x18   :  { %546 = vmatprep.subr.bf16.mxu0 %v1679_v12  ;;  %1632 = vmatprep.subr.bf16.mxu1 %v1679_v12 }
  0x1b   :  { %547 = vmatpush1.bf16.msra.mxu0 %v1681_v14  ;;  %1648 = vmatpush1.bf16.msra.mxu1 %v1681_v14 }
  0x1c   :  { %548 = vmatprep.subr.bf16.mxu0 %v1682_v16  ;;  %1633 = vmatprep.subr.bf16.mxu1 %v1682_v16 }
  0x1f   :  { %549 = vmatpush1.bf16.msra.mxu0 %v1684_v17  ;;  %1649 = vmatpush1.bf16.msra.mxu1 %v1684_v17 }
  0x20   :  { %550 = vmatprep.subr.bf16.mxu0 %v1685_v18  ;;  %1634 = vmatprep.subr.bf16.mxu1 %v1685_v18 }
  0x23   :  { %551 = vmatpush2.bf16.msra.mxu0 %v1687_v19  ;;  %1650 = vmatpush2.bf16.msra.mxu1 %v1687_v19 }
  0x24   :  { %552 = vmatprep.subr.bf16.mxu0 %v1688_v20  ;;  %1635 = vmatprep.subr.bf16.mxu1 %v1688_v20 }
  0x27   :  { %553 = vmatpush2.bf16.msra.mxu0 %v1690_v21  ;;  %1651 = vmatpush2.bf16.msra.mxu1 %v1690_v21 }
  0x28   :  { %554 = vmatprep.subr.bf16.mxu0 %v1691_v22  ;;  %1636 = vmatprep.subr.bf16.mxu1 %v1691_v22 }
  0x29   :  { %11 = vsyncpa [#allocation4], 0  ;;  %v1696_v25 = vld [vmem:[%s2493_s1 + $0xc0] ss:$8 sps:$4 sm:$0xff]   ;;  %v1697_v26 = vld [vmem:[%s2493_s1 + $0xb4] ss:$8 sps:$4 sm:$0xff]  }
  0x2a   :  { %v1699_v27 = vld [vmem:[%s2493_s1 + $0xb0] ss:$8 sps:$4 sm:$0xff]   ;;  %v1700_v28 = vld [vmem:[%s2493_s1 + $0xa4] ss:$8 sps:$4 sm:$0xff]   ;;  %v1702_v29 = vld [vmem:[%s2493_s1 + $0xa0] ss:$8 sps:$4 sm:$0xff]  }
  0x2b   :  { %555 = vmatpush2.bf16.msra.mxu0 %v1693_v23  ;;  %1652 = vmatpush2.bf16.msra.mxu1 %v1693_v23  ;;  %v1703_v30 = vld [vmem:[%s2493_s1 + $0x94] ss:$8 sps:$4 sm:$0xff]   ;;  %v1705_v31 = vld [vmem:[%s2493_s1 + $0x90] ss:$8 sps:$4 sm:$0xff]   ;;  %v1706_v32 = vld [vmem:[%s2493_s1 + $0x84] ss:$8 sps:$4 sm:$0xff]  }
  0x2c   :  { %556 = vmatprep.subr.bf16.mxu0 %v1694_v24  ;;  %1637 = vmatprep.subr.bf16.mxu1 %v1694_v24  ;;  %v1708_v33 = vld [vmem:[%s2493_s1 + $0x80] ss:$8 sps:$4 sm:$0xff]   ;;  %v1715_v36 = vld [vmem:[%s2492_s0 + $0x14] ss:$8 sps:$4 sm:$0xff]   ;;  %v1719_v38 = vld [vmem:[%s2492_s0 + $0x10] ss:$8 sps:$4 sm:$0xff]  }
  0x2d   :  { %v1709_v34 = vld [vmem:[%s2492_s0] ss:$8 sps:$4 sm:$0xff]   ;;  %v1717_v37 = vld [vmem:[%s2492_s0 + $0x94] ss:$8 sps:$4 sm:$0xff]   ;;  %v1720_v39 = vld [vmem:[%s2492_s0 + $0x90] ss:$8 sps:$4 sm:$0xff]  }
  0x2e   :  { %v1712_v35 = vld [vmem:[%s2492_s0 + $0x80] ss:$8 sps:$4 sm:$0xff]   ;;  %v1721_v40 = vld [vmem:[%s2492_s0 + $0x24] ss:$8 sps:$4 sm:$0xff]   ;;  %v1727_v44 = vld [vmem:[%s2492_s0 + $0x34] ss:$8 sps:$4 sm:$0xff]  }
  0x2f   :  { %557 = vmatpush2.bf16.msra.mxu0 %v1696_v25  ;;  %1653 = vmatpush2.bf16.msra.mxu1 %v1696_v25  ;;  %v1723_v41 = vld [vmem:[%s2492_s0 + $0xa4] ss:$8 sps:$4 sm:$0xff]   ;;  %v1725_v42 = vld [vmem:[%s2492_s0 + $0x20] ss:$8 sps:$4 sm:$0xff]   ;;  %v1729_v45 = vld [vmem:[%s2492_s0 + $0xb4] ss:$8 sps:$4 sm:$0xff]  }
  0x30   :  { %558 = vmatprep.subr.bf16.mxu0 %v1697_v26  ;;  %1638 = vmatprep.subr.bf16.mxu1 %v1697_v26  ;;  %v1726_v43 = vld [vmem:[%s2492_s0 + $0xa0] ss:$8 sps:$4 sm:$0xff]   ;;  %v1731_v46 = vld [vmem:[%s2492_s0 + $0x30] ss:$8 sps:$4 sm:$0xff]   ;;  %v1733_v48 = vld [vmem:[%s2492_s0 + $0x44] ss:$8 sps:$4 sm:$0xff]  }
  0x31   :  { %v1732_v47 = vld [vmem:[%s2492_s0 + $0xb0] ss:$8 sps:$4 sm:$0xff]   ;;  %v1735_v49 = vld [vmem:[%s2492_s0 + $0xc4] ss:$8 sps:$4 sm:$0xff]   ;;  %v1737_v50 = vld [vmem:[%s2492_s0 + $0x40] ss:$8 sps:$4 sm:$0xff]  }
  0x32   :  { %v1738_v51 = vld [vmem:[%s2492_s0 + $0xc0] ss:$8 sps:$4 sm:$0xff]   ;;  %v1739_v52 = vld [vmem:[%s2492_s0 + $0x54] ss:$8 sps:$4 sm:$0xff]   ;;  %v1743_v54 = vld [vmem:[%s2492_s0 + $0x50] ss:$8 sps:$4 sm:$0xff]  }
  0x33   :  { %559 = vmatpush2.bf16.msra.mxu0 %v1699_v27  ;;  %1654 = vmatpush2.bf16.msra.mxu1 %v1699_v27  ;;  %v1741_v53 = vld [vmem:[%s2492_s0 + $0xd4] ss:$8 sps:$4 sm:$0xff]   ;;  %v1744_v55 = vld [vmem:[%s2492_s0 + $0xd0] ss:$8 sps:$4 sm:$0xff]   ;;  %v1745_v56 = vld [vmem:[%s2492_s0 + $0x64] ss:$8 sps:$4 sm:$0xff]  }
  0x34   :  { %560 = vmatprep.subr.bf16.mxu0 %v1700_v28  ;;  %1639 = vmatprep.subr.bf16.mxu1 %v1700_v28  ;;  %v1747_v57 = vld [vmem:[%s2492_s0 + $0xe4] ss:$8 sps:$4 sm:$0xff]   ;;  %v1749_v58 = vld [vmem:[%s2492_s0 + $0x60] ss:$8 sps:$4 sm:$0xff]   ;;  %v1751_v60 = vld [vmem:[%s2492_s0 + $0x74] ss:$8 sps:$4 sm:$0xff]  }
  0x35   :  { %v1750_v59 = vld [vmem:[%s2492_s0 + $0xe0] ss:$8 sps:$4 sm:$0xff]   ;;  %v1753_v61 = vld [vmem:[%s2492_s0 + $0xf4] ss:$8 sps:$4 sm:$0xff]   ;;  %v1755_v62 = vld [vmem:[%s2492_s0 + $0x70] ss:$8 sps:$4 sm:$0xff]  }
  0x36   :  { %v1756_v63 = vld [vmem:[%s2492_s0 + $0xf0] ss:$8 sps:$4 sm:$0xff]   ;;  %v2139_v2 = vld [vmem:[%s2494_s2] ss:$0 sm:$0xff] }
  0x37   :  { %561 = vmatpush2.bf16.msra.mxu0 %v1702_v29  ;;  %1655 = vmatpush2.bf16.msra.mxu1 %v1702_v29 }
  0x38   :  { %562 = vmatprep.subr.bf16.mxu0 %v1703_v30  ;;  %1640 = vmatprep.subr.bf16.mxu1 %v1703_v30 }
  0x3b   :  { %563 = vmatpush2.bf16.msra.mxu0 %v1705_v31  ;;  %1656 = vmatpush2.bf16.msra.mxu1 %v1705_v31 }
  0x3c   :  { %564 = vmatprep.subr.bf16.mxu0 %v1706_v32  ;;  %1641 = vmatprep.subr.bf16.mxu1 %v1706_v32 }
  0x3f   :  { %565 = vmatpush2.bf16.msra.mxu0 %v1708_v33  ;;  %1657 = vmatpush2.bf16.msra.mxu1 %v1708_v33 }
  0x42   :  { %567 = vmatmul.mubr.bf16.vlgmr.msra.gmra.mxu0 %v1709_v34  ;;  %647 = vmatmul.mubr.bf16.vlgmr.msra.gmra.mxu1 %v1712_v35 }
  0x43   :  { %576 = vmatprep.mubr.bf16.mxu0 %v1715_v36  ;;  %656 = vmatprep.mubr.bf16.mxu1 %v1717_v37 }
  0x4a   :  { %577 = vmatmul.mubr.bf16.gmra.mxu0 %v1719_v38  ;;  %657 = vmatmul.mubr.bf16.gmra.mxu1 %v1720_v39 }
  0x4b   :  { %586 = vmatprep.mubr.bf16.mxu0 %v1721_v40  ;;  %666 = vmatprep.mubr.bf16.mxu1 %v1723_v41 }
  0x52   :  { %587 = vmatmul.mubr.bf16.gmra.mxu0 %v1725_v42  ;;  %667 = vmatmul.mubr.bf16.gmra.mxu1 %v1726_v43 }
  0x53   :  { %596 = vmatprep.mubr.bf16.mxu0 %v1727_v44  ;;  %676 = vmatprep.mubr.bf16.mxu1 %v1729_v45 }
  0x5a   :  { %597 = vmatmul.mubr.bf16.gmra.mxu0 %v1731_v46  ;;  %677 = vmatmul.mubr.bf16.gmra.mxu1 %v1732_v47 }
  0x5b   :  { %606 = vmatprep.mubr.bf16.mxu0 %v1733_v48  ;;  %686 = vmatprep.mubr.bf16.mxu1 %v1735_v49 }
  0x62   :  { %607 = vmatmul.mubr.bf16.gmra.mxu0 %v1737_v50  ;;  %687 = vmatmul.mubr.bf16.gmra.mxu1 %v1738_v51 }
  0x63   :  { %616 = vmatprep.mubr.bf16.mxu0 %v1739_v52  ;;  %696 = vmatprep.mubr.bf16.mxu1 %v1741_v53 }
  0x6a   :  { %617 = vmatmul.mubr.bf16.gmra.mxu0 %v1743_v54  ;;  %697 = vmatmul.mubr.bf16.gmra.mxu1 %v1744_v55 }
  0x6b   :  { %626 = vmatprep.mubr.bf16.mxu0 %v1745_v56  ;;  %706 = vmatprep.mubr.bf16.mxu1 %v1747_v57 }
  0x72   :  { %627 = vmatmul.mubr.bf16.gmra.mxu0 %v1749_v58  ;;  %707 = vmatmul.mubr.bf16.gmra.mxu1 %v1750_v59 }
  0x73   :  { %636 = vmatprep.mubr.bf16.mxu0 %v1751_v60  ;;  %716 = vmatprep.mubr.bf16.mxu1 %v1753_v61 }
  0x7a   :  { %637 = vmatmul.mubr.bf16.gmra.mxu0 %v1755_v62  ;;  %717 = vmatmul.mubr.bf16.gmra.mxu1 %v1756_v63 }
 0x102   :  { %v2132_v0 = vpop.f32.mrf.mxu0  ;;  %v2134_v1 = vpop.f32.mrf.mxu1 }
 0x103   :  { %922 = vst [vmem:[%s2495_s3] sm:$0xff] %v2132_v0  ;;  %938 = vst [vmem:[%s2495_s3 + $0x80] sm:$0xff] %v2134_v1 }
 0x104   :  { %v570_v3 = vpop.f32.mrf.mxu0  ;;  %v650_v4 = vpop.f32.mrf.mxu1 }
 0x105   :  { %954 = vst [vmem:[%s2496_s4] sm:$0xff] %v570_v3  ;;  %v993_v5 = vmul.f32 %v2139_v2, %v570_v3  ;;  %970 = vst [vmem:[%s2496_s4 + $0x80] sm:$0xff] %v650_v4  ;;  %v1009_v6 = vmul.f32 %v2139_v2, %v650_v4 }
 0x106   :  { %v2157_v7 = vpop.f32.mrf.mxu0  ;;  %v2159_v8 = vpop.f32.mrf.mxu1 }
 0x107   :  { %v1530_v9 = vmul.f32 -1.442695, %v993_v5  ;;  %v1546_v10 = vmul.f32 -1.442695, %v1009_v6  ;;  %923 = vst [vmem:[%s2495_s3 + $0x8] sm:$0xff] %v2157_v7  ;;  %939 = vst [vmem:[%s2495_s3 + $0x88] sm:$0xff] %v2159_v8 }
 0x108   :  { %v574_v11 = vpop.f32.mrf.mxu0  ;;  %v654_v12 = vpop.f32.mrf.mxu1 }
 0x109   :  { %1757 = vpow2.f32 %v1530_v9  ;;  %955 = vst [vmem:[%s2496_s4 + $0x8] sm:$0xff] %v574_v11  ;;  %v994_v13 = vmul.f32 %v2139_v2, %v574_v11  ;;  %971 = vst [vmem:[%s2496_s4 + $0x88] sm:$0xff] %v654_v12  ;;  %v1010_v14 = vmul.f32 %v2139_v2, %v654_v12 }
 0x10a   :  { %1759 = vpow2.f32 %v1546_v10  ;;  %v2177_v15 = vpop.f32.mrf.mxu0  ;;  %v2179_v16 = vpop.f32.mrf.mxu1 }
 0x10b   :  { %v1531_v17 = vmul.f32 -1.442695, %v994_v13  ;;  %v1547_v18 = vmul.f32 -1.442695, %v1010_v14  ;;  %924 = vst [vmem:[%s2495_s3 + $0x10] sm:$0xff] %v2177_v15  ;;  %940 = vst [vmem:[%s2495_s3 + $0x90] sm:$0xff] %v2179_v16 }
 0x10c   :  { %v580_v19 = vpop.f32.mrf.mxu0  ;;  %v660_v20 = vpop.f32.mrf.mxu1 }
 0x10d   :  { %1761 = vpow2.f32 %v1531_v17  ;;  %956 = vst [vmem:[%s2496_s4 + $0x10] sm:$0xff] %v580_v19  ;;  %v995_v21 = vmul.f32 %v2139_v2, %v580_v19  ;;  %972 = vst [vmem:[%s2496_s4 + $0x90] sm:$0xff] %v660_v20  ;;  %v1011_v22 = vmul.f32 %v2139_v2, %v660_v20 }
 0x10e   :  { %1763 = vpow2.f32 %v1547_v18  ;;  %v2197_v23 = vpop.f32.mrf.mxu0  ;;  %v2199_v24 = vpop.f32.mrf.mxu1 }
 0x10f   :  { %v1532_v25 = vmul.f32 -1.442695, %v995_v21  ;;  %v1548_v26 = vmul.f32 -1.442695, %v1011_v22  ;;  %925 = vst [vmem:[%s2495_s3 + $0x18] sm:$0xff] %v2197_v23  ;;  %941 = vst [vmem:[%s2495_s3 + $0x98] sm:$0xff] %v2199_v24 }
 0x110   :  { %v584_v27 = vpop.f32.mrf.mxu0  ;;  %v664_v28 = vpop.f32.mrf.mxu1 }
 0x111   :  { %1765 = vpow2.f32 %v1532_v25  ;;  %957 = vst [vmem:[%s2496_s4 + $0x18] sm:$0xff] %v584_v27  ;;  %v996_v29 = vmul.f32 %v2139_v2, %v584_v27  ;;  %973 = vst [vmem:[%s2496_s4 + $0x98] sm:$0xff] %v664_v28  ;;  %v1012_v30 = vmul.f32 %v2139_v2, %v664_v28 }
 0x112   :  { %1767 = vpow2.f32 %v1548_v26  ;;  %v2217_v31 = vpop.f32.mrf.mxu0  ;;  %v2219_v32 = vpop.f32.mrf.mxu1 }
 0x113   :  { %v1533_v33 = vmul.f32 -1.442695, %v996_v29  ;;  %v1549_v34 = vmul.f32 -1.442695, %v1012_v30  ;;  %926 = vst [vmem:[%s2495_s3 + $0x20] sm:$0xff] %v2217_v31  ;;  %942 = vst [vmem:[%s2495_s3 + $0xa0] sm:$0xff] %v2219_v32 }
 0x114   :  { %v590_v35 = vpop.f32.mrf.mxu0  ;;  %v670_v36 = vpop.f32.mrf.mxu1 }
 0x115   :  { %1769 = vpow2.f32 %v1533_v33  ;;  %958 = vst [vmem:[%s2496_s4 + $0x20] sm:$0xff] %v590_v35  ;;  %v997_v37 = vmul.f32 %v2139_v2, %v590_v35  ;;  %974 = vst [vmem:[%s2496_s4 + $0xa0] sm:$0xff] %v670_v36  ;;  %v1013_v38 = vmul.f32 %v2139_v2, %v670_v36 }
 0x116   :  { %v1758_v39 = vpop.eup %1757  ;;  %1771 = vpow2.f32 %v1549_v34  ;;  %v2237_v40 = vpop.f32.mrf.mxu0 }
 0x117   :  { %v2239_v41 = vpop.f32.mrf.mxu1  ;;  %v1760_v42 = vpop.eup %1759  ;;  %v1121_v43 = vadd.f32 1.0, %v1758_v39  ;;  %v1534_v44 = vmul.f32 -1.442695, %v997_v37  ;;  %927 = vst [vmem:[%s2495_s3 + $0x28] sm:$0xff] %v2237_v40  ;;  %v1550_v46 = vmul.f32 -1.442695, %v1013_v38 }
 0x118   :  { %943 = vst [vmem:[%s2495_s3 + $0xa8] sm:$0xff] %v2239_v41  ;;  %v1137_v45 = vadd.f32 1.0, %v1760_v42  ;;  %v594_v47 = vpop.f32.mrf.mxu0 }
 0x119   :  { %v674_v48 = vpop.f32.mrf.mxu1  ;;  %1773 = vrcp.f32 %v1121_v43  ;;  %959 = vst [vmem:[%s2496_s4 + $0x28] sm:$0xff] %v594_v47  ;;  %v998_v49 = vmul.f32 %v2139_v2, %v594_v47 }
 0x11a   :  { %975 = vst [vmem:[%s2496_s4 + $0xa8] sm:$0xff] %v674_v48  ;;  %v1014_v50 = vmul.f32 %v2139_v2, %v674_v48  ;;  %v1762_v51 = vpop.eup %1761  ;;  %1775 = vrcp.f32 %v1137_v45  ;;  %v2257_v52 = vpop.f32.mrf.mxu0 }
 0x11b   :  { %v2259_v53 = vpop.f32.mrf.mxu1  ;;  %v1764_v54 = vpop.eup %1763  ;;  %v1122_v55 = vadd.f32 1.0, %v1762_v51  ;;  %1777 = vpow2.f32 %v1534_v44  ;;  %v1535_v56 = vmul.f32 -1.442695, %v998_v49  ;;  %928 = vst [vmem:[%s2495_s3 + $0x30] sm:$0xff] %v2257_v52 }
 0x11c   :  { %944 = vst [vmem:[%s2495_s3 + $0xb0] sm:$0xff] %v2259_v53  ;;  %v1138_v57 = vadd.f32 1.0, %v1764_v54  ;;  %1779 = vpow2.f32 %v1550_v46  ;;  %v1551_v58 = vmul.f32 -1.442695, %v1014_v50  ;;  %v600_v59 = vpop.f32.mrf.mxu0 }
 0x11d   :  { %v680_v60 = vpop.f32.mrf.mxu1  ;;  %1781 = vrcp.f32 %v1122_v55  ;;  %960 = vst [vmem:[%s2496_s4 + $0x30] sm:$0xff] %v600_v59  ;;  %v999_v61 = vmul.f32 %v2139_v2, %v600_v59 }
 0x11e   :  { %976 = vst [vmem:[%s2496_s4 + $0xb0] sm:$0xff] %v680_v60  ;;  %v1015_v62 = vmul.f32 %v2139_v2, %v680_v60  ;;  %v1766_v63 = vpop.eup %1765  ;;  %1783 = vrcp.f32 %v1138_v57  ;;  %v2277_v3 = vpop.f32.mrf.mxu0 }
 0x11f   :  { %v2279_v4 = vpop.f32.mrf.mxu1  ;;  %v1768_v5 = vpop.eup %1767  ;;  %v1123_v6 = vadd.f32 1.0, %v1766_v63  ;;  %1785 = vpow2.f32 %v1535_v56  ;;  %v1536_v9 = vmul.f32 -1.442695, %v999_v61  ;;  %929 = vst [vmem:[%s2495_s3 + $0x38] sm:$0xff] %v2277_v3 }
 0x120   :  { %945 = vst [vmem:[%s2495_s3 + $0xb8] sm:$0xff] %v2279_v4  ;;  %v1139_v10 = vadd.f32 1.0, %v1768_v5  ;;  %1787 = vpow2.f32 %v1551_v58  ;;  %v1552_v11 = vmul.f32 -1.442695, %v1015_v62  ;;  %v604_v12 = vpop.f32.mrf.mxu0 }
 0x121   :  { %v684_v13 = vpop.f32.mrf.mxu1  ;;  %1789 = vrcp.f32 %v1123_v6  ;;  %961 = vst [vmem:[%s2496_s4 + $0x38] sm:$0xff] %v604_v12  ;;  %v1000_v14 = vmul.f32 %v2139_v2, %v604_v12 }
 0x122   :  { %977 = vst [vmem:[%s2496_s4 + $0xb8] sm:$0xff] %v684_v13  ;;  %v1016_v17 = vmul.f32 %v2139_v2, %v684_v13  ;;  %v1770_v18 = vpop.eup %1769  ;;  %1791 = vrcp.f32 %v1139_v10  ;;  %v2297_v19 = vpop.f32.mrf.mxu0 }
 0x123   :  { %v2299_v20 = vpop.f32.mrf.mxu1  ;;  %v1772_v21 = vpop.eup %1771  ;;  %v1124_v22 = vadd.f32 1.0, %v1770_v18  ;;  %1793 = vpow2.f32 %v1536_v9  ;;  %v1537_v25 = vmul.f32 -1.442695, %v1000_v14  ;;  %930 = vst [vmem:[%s2495_s3 + $0x40] sm:$0xff] %v2297_v19 }
 0x124   :  { %946 = vst [vmem:[%s2495_s3 + $0xc0] sm:$0xff] %v2299_v20  ;;  %v1140_v26 = vadd.f32 1.0, %v1772_v21  ;;  %1795 = vpow2.f32 %v1552_v11  ;;  %v1553_v27 = vmul.f32 -1.442695, %v1016_v17  ;;  %v610_v28 = vpop.f32.mrf.mxu0 }
 0x125   :  { %v690_v29 = vpop.f32.mrf.mxu1  ;;  %1797 = vrcp.f32 %v1124_v22  ;;  %962 = vst [vmem:[%s2496_s4 + $0x40] sm:$0xff] %v610_v28  ;;  %v1001_v30 = vmul.f32 %v2139_v2, %v610_v28 }
 0x126   :  { %978 = vst [vmem:[%s2496_s4 + $0xc0] sm:$0xff] %v690_v29  ;;  %v1017_v33 = vmul.f32 %v2139_v2, %v690_v29  ;;  %v1774_v34 = vpop.eup %1773  ;;  %1799 = vrcp.f32 %v1140_v26  ;;  %v2317_v35 = vpop.f32.mrf.mxu0 }
 0x127   :  { %v2319_v36 = vpop.f32.mrf.mxu1  ;;  %v1776_v37 = vpop.eup %1775  ;;  %v1594_v38 = vpack.c.bf16 %v1774_v34, %v2132_v0  ;;  %1801 = vpow2.f32 %v1537_v25  ;;  %v1538_v39 = vmul.f32 -1.442695, %v1001_v30  ;;  %931 = vst [vmem:[%s2495_s3 + $0x48] sm:$0xff] %v2317_v35 }
 0x128   :  { %v1554_v42 = vmul.f32 -1.442695, %v1017_v33  ;;  %947 = vst [vmem:[%s2495_s3 + $0xc8] sm:$0xff] %v2319_v36  ;;  %v1778_v43 = vpop.eup %1777  ;;  %v1610_v44 = vpack.c.bf16 %v1776_v37, %v2134_v1  ;;  %1803 = vpow2.f32 %v1553_v27  ;;  %v614_v45 = vpop.f32.mrf.mxu0 }
 0x129   :  { %v694_v46 = vpop.f32.mrf.mxu1  ;;  %v1780_v0 = vpop.eup %1779  ;;  %1409 = vst [vmem:[#allocation3] sm:$0xff] %v1594_v38  ;;  %v1125_v47 = vadd.f32 1.0, %v1778_v43  ;;  %1805 = vpow2.f32 %v1538_v39  ;;  %963 = vst [vmem:[%s2496_s4 + $0x48] sm:$0xff] %v614_v45  ;;  %v1002_v48 = vmul.f32 %v2139_v2, %v614_v45 }
 0x12a   :  { %979 = vst [vmem:[%s2496_s4 + $0xc8] sm:$0xff] %v694_v46  ;;  %v1018_v49 = vmul.f32 %v2139_v2, %v694_v46  ;;  %v1782_v1 = vpop.eup %1781  ;;  %1425 = vst [vmem:[#allocation3 + $0x80] sm:$0xff] %v1610_v44  ;;  %v1141_v50 = vadd.f32 1.0, %v1780_v0  ;;  %1807 = vpow2.f32 %v1554_v42  ;;  %v2339_v51 = vpop.f32.mrf.mxu0 }
 0x12b   :  { %v2341_v54 = vpop.f32.mrf.mxu1  ;;  %v1784_v55 = vpop.eup %1783  ;;  %v1595_v56 = vpack.c.bf16 %v1782_v1, %v2157_v7  ;;  %1809 = vrcp.f32 %v1125_v47  ;;  %v1539_v57 = vmul.f32 -1.442695, %v1002_v48  ;;  %932 = vst [vmem:[%s2495_s3 + $0x50] sm:$0xff] %v2339_v51 }
 0x12c   :  { %v1555_v58 = vmul.f32 -1.442695, %v1018_v49  ;;  %948 = vst [vmem:[%s2495_s3 + $0xd0] sm:$0xff] %v2341_v54  ;;  %v1786_v59 = vpop.eup %1785  ;;  %v1611_v60 = vpack.c.bf16 %v1784_v55, %v2159_v8  ;;  %1811 = vrcp.f32 %v1141_v50  ;;  %v620_v61 = vpop.f32.mrf.mxu0 }
 0x12d   :  { %v700_v62 = vpop.f32.mrf.mxu1  ;;  %v1788_v7 = vpop.eup %1787  ;;  %1410 = vst [vmem:[#allocation3 + $0x8] sm:$0xff] %v1595_v56  ;;  %v1126_v63 = vadd.f32 1.0, %v1786_v59  ;;  %1813 = vpow2.f32 %v1539_v57  ;;  %964 = vst [vmem:[%s2496_s4 + $0x50] sm:$0xff] %v620_v61  ;;  %v1003_v5 = vmul.f32 %v2139_v2, %v620_v61 }
 0x12e   :  { %980 = vst [vmem:[%s2496_s4 + $0xd0] sm:$0xff] %v700_v62  ;;  %v1019_v6 = vmul.f32 %v2139_v2, %v700_v62  ;;  %v1790_v8 = vpop.eup %1789  ;;  %1426 = vst [vmem:[#allocation3 + $0x88] sm:$0xff] %v1611_v60  ;;  %v1142_v9 = vadd.f32 1.0, %v1788_v7  ;;  %1815 = vpow2.f32 %v1555_v58  ;;  %v2361_v10 = vpop.f32.mrf.mxu0 }
 0x12f   :  { %v2363_v11 = vpop.f32.mrf.mxu1  ;;  %v1792_v12 = vpop.eup %1791  ;;  %v1596_v13 = vpack.c.bf16 %v1790_v8, %v2177_v15  ;;  %1817 = vrcp.f32 %v1126_v63  ;;  %v1540_v14 = vmul.f32 -1.442695, %v1003_v5  ;;  %933 = vst [vmem:[%s2495_s3 + $0x58] sm:$0xff] %v2361_v10 }
 0x130   :  { %v1556_v17 = vmul.f32 -1.442695, %v1019_v6  ;;  %949 = vst [vmem:[%s2495_s3 + $0xd8] sm:$0xff] %v2363_v11  ;;  %v1794_v18 = vpop.eup %1793  ;;  %v1612_v21 = vpack.c.bf16 %v1792_v12, %v2179_v16  ;;  %1819 = vrcp.f32 %v1142_v9  ;;  %v624_v22 = vpop.f32.mrf.mxu0 }
 0x131   :  { %v704_v25 = vpop.f32.mrf.mxu1  ;;  %v1796_v15 = vpop.eup %1795  ;;  %1411 = vst [vmem:[#allocation3 + $0x10] sm:$0xff] %v1596_v13  ;;  %v1127_v26 = vadd.f32 1.0, %v1794_v18  ;;  %1821 = vpow2.f32 %v1540_v14  ;;  %965 = vst [vmem:[%s2496_s4 + $0x58] sm:$0xff] %v624_v22  ;;  %v1004_v27 = vmul.f32 %v2139_v2, %v624_v22 }
 0x132   :  { %981 = vst [vmem:[%s2496_s4 + $0xd8] sm:$0xff] %v704_v25  ;;  %v1020_v28 = vmul.f32 %v2139_v2, %v704_v25  ;;  %v1798_v16 = vpop.eup %1797  ;;  %1427 = vst [vmem:[#allocation3 + $0x90] sm:$0xff] %v1612_v21  ;;  %v1143_v29 = vadd.f32 1.0, %v1796_v15  ;;  %1823 = vpow2.f32 %v1556_v17  ;;  %v2383_v30 = vpop.f32.mrf.mxu0 }
 0x133   :  { %v2385_v33 = vpop.f32.mrf.mxu1  ;;  %v1800_v34 = vpop.eup %1799  ;;  %v1597_v37 = vpack.c.bf16 %v1798_v16, %v2197_v23  ;;  %1825 = vrcp.f32 %v1127_v26  ;;  %v1541_v38 = vmul.f32 -1.442695, %v1004_v27  ;;  %934 = vst [vmem:[%s2495_s3 + $0x60] sm:$0xff] %v2383_v30 }
 0x134   :  { %v1557_v39 = vmul.f32 -1.442695, %v1020_v28  ;;  %950 = vst [vmem:[%s2495_s3 + $0xe0] sm:$0xff] %v2385_v33  ;;  %v1802_v42 = vpop.eup %1801  ;;  %v1613_v43 = vpack.c.bf16 %v1800_v34, %v2199_v24  ;;  %1827 = vrcp.f32 %v1143_v29  ;;  %v630_v44 = vpop.f32.mrf.mxu0 }
 0x135   :  { %v710_v45 = vpop.f32.mrf.mxu1  ;;  %v1804_v23 = vpop.eup %1803  ;;  %1412 = vst [vmem:[#allocation3 + $0x18] sm:$0xff] %v1597_v37  ;;  %v1128_v46 = vadd.f32 1.0, %v1802_v42  ;;  %1829 = vpow2.f32 %v1541_v38  ;;  %966 = vst [vmem:[%s2496_s4 + $0x60] sm:$0xff] %v630_v44  ;;  %v1005_v0 = vmul.f32 %v2139_v2, %v630_v44 }
 0x136   :  { %982 = vst [vmem:[%s2496_s4 + $0xe0] sm:$0xff] %v710_v45  ;;  %v1021_v47 = vmul.f32 %v2139_v2, %v710_v45  ;;  %v1806_v24 = vpop.eup %1805  ;;  %1428 = vst [vmem:[#allocation3 + $0x98] sm:$0xff] %v1613_v43  ;;  %v1144_v48 = vadd.f32 1.0, %v1804_v23  ;;  %1831 = vpow2.f32 %v1557_v39  ;;  %v2405_v49 = vpop.f32.mrf.mxu0 }
 0x137   :  { %v2407_v1 = vpop.f32.mrf.mxu1  ;;  %v1808_v50 = vpop.eup %1807  ;;  %1833 = vrcp.f32 %v1128_v46  ;;  %v1129_v55 = vadd.f32 1.0, %v1806_v24  ;;  %v1542_v56 = vmul.f32 -1.442695, %v1005_v0  ;;  %935 = vst [vmem:[%s2495_s3 + $0x68] sm:$0xff] %v2405_v49 }
 0x138   :  { %951 = vst [vmem:[%s2495_s3 + $0xe8] sm:$0xff] %v2407_v1  ;;  %v1810_v57 = vpop.eup %1809  ;;  %1835 = vrcp.f32 %v1144_v48  ;;  %v1145_v58 = vadd.f32 1.0, %v1808_v50  ;;  %v1558_v59 = vmul.f32 -1.442695, %v1021_v47  ;;  %v634_v60 = vpop.f32.mrf.mxu0 }
 0x139   :  { %v714_v61 = vpop.f32.mrf.mxu1  ;;  %v1812_v62 = vpop.eup %1811  ;;  %v1598_v7 = vpack.c.bf16 %v1810_v57, %v2217_v31  ;;  %1837 = vrcp.f32 %v1129_v55  ;;  %967 = vst [vmem:[%s2496_s4 + $0x68] sm:$0xff] %v634_v60  ;;  %v1006_v63 = vmul.f32 %v2139_v2, %v634_v60 }
 0x13a   :  { %983 = vst [vmem:[%s2496_s4 + $0xe8] sm:$0xff] %v714_v61  ;;  %v1022_v5 = vmul.f32 %v2139_v2, %v714_v61  ;;  %v1814_v6 = vpop.eup %1813  ;;  %v1614_v8 = vpack.c.bf16 %v1812_v62, %v2219_v32  ;;  %1839 = vrcp.f32 %v1145_v58  ;;  %v2427_v9 = vpop.f32.mrf.mxu0 }
 0x13b   :  { %v2429_v31 = vpop.f32.mrf.mxu1  ;;  %v1816_v12 = vpop.eup %1815  ;;  %1413 = vst [vmem:[#allocation3 + $0x20] sm:$0xff] %v1598_v7  ;;  %v1130_v13 = vadd.f32 1.0, %v1814_v6  ;;  %1841 = vpow2.f32 %v1542_v56  ;;  %v1543_v14 = vmul.f32 -1.442695, %v1006_v63  ;;  %936 = vst [vmem:[%s2495_s3 + $0x70] sm:$0xff] %v2427_v9 }
 0x13c   :  { %952 = vst [vmem:[%s2495_s3 + $0xf0] sm:$0xff] %v2429_v31  ;;  %v1818_v32 = vpop.eup %1817  ;;  %1429 = vst [vmem:[#allocation3 + $0xa0] sm:$0xff] %v1614_v8  ;;  %v1146_v17 = vadd.f32 1.0, %v1816_v12  ;;  %1843 = vpow2.f32 %v1558_v59  ;;  %v1559_v18 = vmul.f32 -1.442695, %v1022_v5  ;;  %v640_v21 = vpop.f32.mrf.mxu0 }
 0x13d   :  { %v720_v22 = vpop.f32.mrf.mxu1  ;;  %v1820_v25 = vpop.eup %1819  ;;  %v1599_v15 = vpack.c.bf16 %v1818_v32, %v2237_v40  ;;  %1845 = vrcp.f32 %v1130_v13  ;;  %968 = vst [vmem:[%s2496_s4 + $0x70] sm:$0xff] %v640_v21  ;;  %v1007_v26 = vmul.f32 %v2139_v2, %v640_v21 }
 0x13e   :  { %984 = vst [vmem:[%s2496_s4 + $0xf0] sm:$0xff] %v720_v22  ;;  %v1023_v27 = vmul.f32 %v2139_v2, %v720_v22  ;;  %v1822_v28 = vpop.eup %1821  ;;  %v1615_v16 = vpack.c.bf16 %v1820_v25, %v2239_v41  ;;  %1847 = vrcp.f32 %v1146_v17  ;;  %v2449_v29 = vpop.f32.mrf.mxu0 }
 0x13f   :  { %v2451_v40 = vpop.f32.mrf.mxu1  ;;  %v1824_v34 = vpop.eup %1823  ;;  %1414 = vst [vmem:[#allocation3 + $0x28] sm:$0xff] %v1599_v15  ;;  %v1131_v37 = vadd.f32 1.0, %v1822_v28  ;;  %1849 = vpow2.f32 %v1543_v14  ;;  %v1544_v38 = vmul.f32 -1.442695, %v1007_v26  ;;  %937 = vst [vmem:[%s2495_s3 + $0x78] sm:$0xff] %v2449_v29 }
 0x140   :  { %953 = vst [vmem:[%s2495_s3 + $0xf8] sm:$0xff] %v2451_v40  ;;  %v1826_v41 = vpop.eup %1825  ;;  %1430 = vst [vmem:[#allocation3 + $0xa8] sm:$0xff] %v1615_v16  ;;  %v1147_v39 = vadd.f32 1.0, %v1824_v34  ;;  %1851 = vpow2.f32 %v1559_v18  ;;  %v1560_v42 = vmul.f32 -1.442695, %v1023_v27  ;;  %v644_v43 = vpop.f32.mrf.mxu0  ;;  %s1907_s3 = smov [#allocation3]  }
 0x141   :  { %v724_v44 = vpop.f32.mrf.mxu1  ;;  %v1828_v45 = vpop.eup %1827  ;;  %v1600_v23 = vpack.c.bf16 %v1826_v41, %v2257_v52  ;;  %1853 = vrcp.f32 %v1131_v37  ;;  %969 = vst [vmem:[%s2496_s4 + $0x78] sm:$0xff] %v644_v43  ;;  %v1008_v46 = vmul.f32 %v2139_v2, %v644_v43 }
 0x142   :  { %985 = vst [vmem:[%s2496_s4 + $0xf8] sm:$0xff] %v724_v44  ;;  %v1024_v0 = vmul.f32 %v2139_v2, %v724_v44  ;;  %v1830_v47 = vpop.eup %1829  ;;  %v1616_v24 = vpack.c.bf16 %v1828_v45, %v2259_v53  ;;  %1855 = vrcp.f32 %v1147_v39  ;;  %s1450_s4 = sshll.u32 %s1907_s3, 4  ;;  %s1451_s4 = int_to_ptr.vmem [resolvable:$true] %s1450_s4 }
 0x143   :  { %v1832_v48 = vpop.eup %1831  ;;  %1415 = vst [vmem:[#allocation3 + $0x30] sm:$0xff] %v1600_v23  ;;  %v1132_v52 = vadd.f32 1.0, %v1830_v47  ;;  %1857 = vpow2.f32 %v1544_v38  ;;  %v1545_v50 = vmul.f32 -1.442695, %v1008_v46  ;;  %s1885_s9 = scalar_lea.vmem %s1451_s4, 4096  ;;  %p1890_p1 = scmp.lt.s32.totalorder %s1451_s4, %s1451_s4 }
 0x144   :  { %v1834_v55 = vpop.eup %1833  ;;  %1431 = vst [vmem:[#allocation3 + $0xb0] sm:$0xff] %v1616_v24  ;;  %v1148_v56 = vadd.f32 1.0, %v1832_v48  ;;  %1859 = vpow2.f32 %v1560_v42  ;;  %v1561_v57 = vmul.f32 -1.442695, %v1024_v0  ;;  %p1886_p0 = scmp.ne.s32.totalorder %s1451_s4, %s1885_s9  ;;  %p1891_p2 = scmp.lt.s32.totalorder %s1885_s9, %s1885_s9 }
 0x145   :  { %v1836_v58 = vpop.eup %1835  ;;  %v1601_v59 = vpack.c.bf16 %v1834_v55, %v2277_v3  ;;  %1861 = vrcp.f32 %v1132_v52 }
 0x146   :  { %v1838_v60 = vpop.eup %1837  ;;  %v1617_v2 = vpack.c.bf16 %v1836_v58, %v2279_v4  ;;  %1863 = vrcp.f32 %v1148_v56  ;;  %p1892_p3 = por %p1891_p2, %p1890_p1 }
 0x147   :  { %v1840_v53 = vpop.eup %1839  ;;  %1416 = vst [vmem:[#allocation3 + $0x38] sm:$0xff] %v1601_v59  ;;  %v1602_v61 = vpack.c.bf16 %v1838_v60, %v2297_v19  ;;  %1865 = vpow2.f32 %v1545_v50 }
 0x148   :  { %v1842_v62 = vpop.eup %1841  ;;  %1432 = vst [vmem:[#allocation3 + $0xb8] sm:$0xff] %v1617_v2  ;;  %v1618_v7 = vpack.c.bf16 %v1840_v53, %v2299_v20  ;;  %1867 = vpow2.f32 %v1561_v57  ;;  %p1893_p4 = pnand %p1892_p3, %p1886_p0 }
 0x149   :  { %v1844_v63 = vpop.eup %1843  ;;  %1417 = vst [vmem:[#allocation3 + $0x40] sm:$0xff] %v1602_v61  ;;  %v1133_v5 = vadd.f32 1.0, %v1842_v62 }
 0x14a   :  { %v1846_v6 = vpop.eup %1845  ;;  %1433 = vst [vmem:[#allocation3 + $0xc0] sm:$0xff] %v1618_v7  ;;  %v1149_v3 = vadd.f32 1.0, %v1844_v63 }
 0x14b   :  { %v1848_v8 = vpop.eup %1847  ;;  %v1603_v4 = vpack.c.bf16 %v1846_v6, %v2317_v35  ;;  %1869 = vrcp.f32 %v1133_v5 }
 0x14c   :  { %v1850_v12 = vpop.eup %1849  ;;  %v1619_v13 = vpack.c.bf16 %v1848_v8, %v2319_v36  ;;  %1871 = vrcp.f32 %v1149_v3 }
 0x14d   :  { %v1852_v19 = vpop.eup %1851  ;;  %1418 = vst [vmem:[#allocation3 + $0x48] sm:$0xff] %v1603_v4  ;;  %v1134_v14 = vadd.f32 1.0, %v1850_v12 }
 0x14e   :  { %v1854_v32 = vpop.eup %1853  ;;  %1434 = vst [vmem:[#allocation3 + $0xc8] sm:$0xff] %v1619_v13  ;;  %v1150_v20 = vadd.f32 1.0, %v1852_v19 }
 0x14f   :  { %v1856_v17 = vpop.eup %1855  ;;  %v1604_v18 = vpack.c.bf16 %v1854_v32, %v2339_v51  ;;  %1873 = vrcp.f32 %v1134_v14 }
 0x150   :  { %v1858_v21 = vpop.eup %1857  ;;  %v1620_v22 = vpack.c.bf16 %v1856_v17, %v2341_v54  ;;  %1875 = vrcp.f32 %v1150_v20 }
 0x151   :  { %v1860_v35 = vpop.eup %1859  ;;  %1419 = vst [vmem:[#allocation3 + $0x50] sm:$0xff] %v1604_v18  ;;  %v1135_v25 = vadd.f32 1.0, %v1858_v21 }
 0x152   :  { %v1862_v15 = vpop.eup %1861  ;;  %1435 = vst [vmem:[#allocation3 + $0xd0] sm:$0xff] %v1620_v22  ;;  %v1151_v36 = vadd.f32 1.0, %v1860_v35 }
 0x153   :  { %v1864_v26 = vpop.eup %1863  ;;  %v1605_v27 = vpack.c.bf16 %v1862_v15, %v2361_v10  ;;  %1877 = vrcp.f32 %v1135_v25 }
 0x154   :  { %v1866_v28 = vpop.eup %1865  ;;  %v1621_v16 = vpack.c.bf16 %v1864_v26, %v2363_v11  ;;  %1879 = vrcp.f32 %v1151_v36 }
 0x155   :  { %v1868_v51 = vpop.eup %1867  ;;  %1420 = vst [vmem:[#allocation3 + $0x58] sm:$0xff] %v1605_v27  ;;  %v1136_v34 = vadd.f32 1.0, %v1866_v28 }
 0x156   :  { %1436 = vst [vmem:[#allocation3 + $0xd8] sm:$0xff] %v1621_v16  ;;  %v1152_v54 = vadd.f32 1.0, %v1868_v51 }
 0x157   :  { %1881 = vrcp.f32 %v1136_v34 }
 0x158   :  { %v1870_v37 = vpop.eup %1869  ;;  %1883 = vrcp.f32 %v1152_v54 }
 0x159   :  { %v1872_v38 = vpop.eup %1871  ;;  %v1606_v41 = vpack.c.bf16 %v1870_v37, %v2383_v30 }
 0x15a   :  { %v1622_v39 = vpack.c.bf16 %v1872_v38, %v2385_v33 }
 0x15b   :  { %1421 = vst [vmem:[#allocation3 + $0x60] sm:$0xff] %v1606_v41 }
 0x15c   :  { %v1874_v10 = vpop.eup %1873  ;;  %1437 = vst [vmem:[#allocation3 + $0xe0] sm:$0xff] %v1622_v39 }
 0x15d   :  { %v1876_v42 = vpop.eup %1875  ;;  %v1607_v11 = vpack.c.bf16 %v1874_v10, %v2405_v49 }
 0x15e   :  { %v1623_v43 = vpack.c.bf16 %v1876_v42, %v2407_v1 }
 0x15f   :  { %1422 = vst [vmem:[#allocation3 + $0x68] sm:$0xff] %v1607_v11 }
 0x160   :  { %v1878_v44 = vpop.eup %1877  ;;  %1438 = vst [vmem:[#allocation3 + $0xe8] sm:$0xff] %v1623_v43 }
 0x161   :  { %v1880_v45 = vpop.eup %1879  ;;  %v1608_v23 = vpack.c.bf16 %v1878_v44, %v2427_v9 }
 0x162   :  { %v1624_v46 = vpack.c.bf16 %v1880_v45, %v2429_v31 }
 0x163   :  { %1423 = vst [vmem:[#allocation3 + $0x70] sm:$0xff] %v1608_v23 }
 0x164   :  { %v1882_v30 = vpop.eup %1881  ;;  %1439 = vst [vmem:[#allocation3 + $0xf0] sm:$0xff] %v1624_v46 }
 0x165   :  { %v1884_v33 = vpop.eup %1883  ;;  %v1609_v0 = vpack.c.bf16 %v1882_v30, %v2449_v29 }
 0x166   :  { %v1625_v49 = vpack.c.bf16 %v1884_v33, %v2451_v40 }
 0x167   :  { %1424 = vst [vmem:[#allocation3 + $0x78] sm:$0xff] %v1609_v0 }
 0x168   :  { %1440 = vst [vmem:[#allocation3 + $0xf8] sm:$0xff] %v1625_v49 }
 0x169   :  { %1896 = shalt.err (!%p1893_p4)
}
 0x16a   :  { %s1908_s10 = smov 128   ;;  %s1909_s11 = smov 8  }
 0x16b   :  { %1456 = dma.vmem_to_hbm [thread:$0]  %s1451_s4, 4096, %s2497_s5, [#allocation4], %s1908_s10, %s1908_s10, %s1909_s11  }
 0x16c   :  { %1905 = dma.done.wait [#allocation4], 4096  }
 0x16d   :  { %1906 = vsyncadd [#allocation4], 4294963200 }
 0x16e   :  { %1464 = vsyncpa [#allocation4], 1 }

// kernel: adagcl_forward.10
= control target key start
LH: loop header
LB: loop body
LE: loop exit
PB: predicated region body
PF: predicated region fallthrough
CT: control target
= control target key end

     0   :  { %s2544_s1 = inlined_call_operand.vmem [shape: bf16[256,256], index: 1, kind: input, shape index: {}]   ;;  %s2545_s0 = inlined_call_operand.vmem [shape: bf16[256,256], index: 0, kind: input, shape index: {}]   ;;  %s2546_s2 = inlined_call_operand.vmem [shape: f32[1,128], index: 2, kind: input, shape index: {}]   ;;  %s2547_s3 = inlined_call_operand.vmem [shape: f32[256,128], index: 3, kind: output, shape index: {0}]   ;;  %s2548_s4 = inlined_call_operand.vmem [shape: f32[256,128], index: 4, kind: output, shape index: {1}]   ;;  %s2549_s5 = inlined_call_operand.vmem [shape: bf16[256,256], index: 5, kind: output, shape index: {2}]  }
   0x1   :  { %v1645_v0 = vld [vmem:[%s2544_s1 + $0x74] ss:$8 sps:$4 sm:$0xff]   ;;  %v1647_v1 = vld [vmem:[%s2544_s1 + $0x70] ss:$8 sps:$4 sm:$0xff]   ;;  %v1648_v2 = vld [vmem:[%s2544_s1 + $0x64] ss:$8 sps:$4 sm:$0xff]  }
   0x2   :  { %533 = vmatprep.subr.bf16.mxu0 %v1645_v0  ;;  %1613 = vmatprep.subr.bf16.mxu1 %v1645_v0  ;;  %v1650_v3 = vld [vmem:[%s2544_s1 + $0x60] ss:$8 sps:$4 sm:$0xff]   ;;  %v1651_v4 = vld [vmem:[%s2544_s1 + $0x54] ss:$8 sps:$4 sm:$0xff]   ;;  %v1653_v5 = vld [vmem:[%s2544_s1 + $0x50] ss:$8 sps:$4 sm:$0xff]  }
   0x3   :  { %534 = vmatpush1.bf16.msra.mxu0 %v1647_v1  ;;  %1629 = vmatpush1.bf16.msra.mxu1 %v1647_v1  ;;  %v1654_v6 = vld [vmem:[%s2544_s1 + $0x44] ss:$8 sps:$4 sm:$0xff]   ;;  %v1656_v7 = vld [vmem:[%s2544_s1 + $0x40] ss:$8 sps:$4 sm:$0xff]   ;;  %v1657_v8 = vld [vmem:[%s2544_s1 + $0x34] ss:$8 sps:$4 sm:$0xff]  }
   0x4   :  { %535 = vmatprep.subr.bf16.mxu0 %v1648_v2  ;;  %1614 = vmatprep.subr.bf16.mxu1 %v1648_v2  ;;  %v1659_v9 = vld [vmem:[%s2544_s1 + $0x30] ss:$8 sps:$4 sm:$0xff]   ;;  %v1660_v10 = vld [vmem:[%s2544_s1 + $0x24] ss:$8 sps:$4 sm:$0xff]   ;;  %v1662_v11 = vld [vmem:[%s2544_s1 + $0x20] ss:$8 sps:$4 sm:$0xff]  }
   0x5   :  { %v1663_v12 = vld [vmem:[%s2544_s1 + $0x14] ss:$8 sps:$4 sm:$0xff]   ;;  %v1695_v13 = vld [vmem:[%s2545_s0 + $0x4] ss:$8 sps:$4 sm:$0xff]   ;;  %v1665_v14 = vld [vmem:[%s2544_s1 + $0x10] ss:$8 sps:$4 sm:$0xff]  }
   0x6   :  { %v1698_v15 = vld [vmem:[%s2545_s0 + $0x84] ss:$8 sps:$4 sm:$0xff]   ;;  %565 = vmatprep.mubr.bf16.mxu0 %v1695_v13  ;;  %v1668_v17 = vld [vmem:[%s2544_s1] ss:$8 sps:$4 sm:$0xff]   ;;  %v1669_v18 = vld [vmem:[%s2544_s1 + $0xf4] ss:$8 sps:$4 sm:$0xff]  }
   0x7   :  { %536 = vmatpush1.bf16.msra.mxu0 %v1650_v3  ;;  %1630 = vmatpush1.bf16.msra.mxu1 %v1650_v3  ;;  %v1666_v16 = vld [vmem:[%s2544_s1 + $0x4] ss:$8 sps:$4 sm:$0xff]   ;;  %v1671_v19 = vld [vmem:[%s2544_s1 + $0xf0] ss:$8 sps:$4 sm:$0xff]   ;;  %v1674_v21 = vld [vmem:[%s2544_s1 + $0xe0] ss:$8 sps:$4 sm:$0xff]  }
   0x8   :  { %537 = vmatprep.subr.bf16.mxu0 %v1651_v4  ;;  %1615 = vmatprep.subr.bf16.mxu1 %v1651_v4  ;;  %v1672_v20 = vld [vmem:[%s2544_s1 + $0xe4] ss:$8 sps:$4 sm:$0xff]   ;;  %v1675_v22 = vld [vmem:[%s2544_s1 + $0xd4] ss:$8 sps:$4 sm:$0xff]   ;;  %v1677_v23 = vld [vmem:[%s2544_s1 + $0xd0] ss:$8 sps:$4 sm:$0xff]  }
   0x9   :  { %645 = vmatprep.mubr.bf16.mxu1 %v1698_v15  ;;  %v1678_v24 = vld [vmem:[%s2544_s1 + $0xc4] ss:$8 sps:$4 sm:$0xff]   ;;  %v1680_v25 = vld [vmem:[%s2544_s1 + $0xc0] ss:$8 sps:$4 sm:$0xff]   ;;  %v1681_v26 = vld [vmem:[%s2544_s1 + $0xb4] ss:$8 sps:$4 sm:$0xff]  }
   0xa   :  { %v1683_v27 = vld [vmem:[%s2544_s1 + $0xb0] ss:$8 sps:$4 sm:$0xff]   ;;  %v1684_v28 = vld [vmem:[%s2544_s1 + $0xa4] ss:$8 sps:$4 sm:$0xff]   ;;  %v1686_v29 = vld [vmem:[%s2544_s1 + $0xa0] ss:$8 sps:$4 sm:$0xff]  }
   0xb   :  { %538 = vmatpush1.bf16.msra.mxu0 %v1653_v5  ;;  %1631 = vmatpush1.bf16.msra.mxu1 %v1653_v5  ;;  %v1687_v30 = vld [vmem:[%s2544_s1 + $0x94] ss:$8 sps:$4 sm:$0xff]   ;;  %v1689_v31 = vld [vmem:[%s2544_s1 + $0x90] ss:$8 sps:$4 sm:$0xff]   ;;  %v1690_v32 = vld [vmem:[%s2544_s1 + $0x84] ss:$8 sps:$4 sm:$0xff]  }
   0xc   :  { %539 = vmatprep.subr.bf16.mxu0 %v1654_v6  ;;  %1616 = vmatprep.subr.bf16.mxu1 %v1654_v6  ;;  %v1692_v33 = vld [vmem:[%s2544_s1 + $0x80] ss:$8 sps:$4 sm:$0xff]   ;;  %v1699_v36 = vld [vmem:[%s2545_s0 + $0x14] ss:$8 sps:$4 sm:$0xff]   ;;  %v1703_v38 = vld [vmem:[%s2545_s0 + $0x10] ss:$8 sps:$4 sm:$0xff]  }
   0xd   :  { %v1693_v34 = vld [vmem:[%s2545_s0] ss:$8 sps:$4 sm:$0xff]   ;;  %v1701_v37 = vld [vmem:[%s2545_s0 + $0x94] ss:$8 sps:$4 sm:$0xff]   ;;  %v1704_v39 = vld [vmem:[%s2545_s0 + $0x90] ss:$8 sps:$4 sm:$0xff]  }
   0xe   :  { %v1696_v35 = vld [vmem:[%s2545_s0 + $0x80] ss:$8 sps:$4 sm:$0xff]   ;;  %v1705_v40 = vld [vmem:[%s2545_s0 + $0x24] ss:$8 sps:$4 sm:$0xff]   ;;  %v1711_v44 = vld [vmem:[%s2545_s0 + $0x34] ss:$8 sps:$4 sm:$0xff]  }
   0xf   :  { %540 = vmatpush1.bf16.msra.mxu0 %v1656_v7  ;;  %1632 = vmatpush1.bf16.msra.mxu1 %v1656_v7  ;;  %v1707_v41 = vld [vmem:[%s2545_s0 + $0xa4] ss:$8 sps:$4 sm:$0xff]   ;;  %v1709_v42 = vld [vmem:[%s2545_s0 + $0x20] ss:$8 sps:$4 sm:$0xff]   ;;  %v1713_v45 = vld [vmem:[%s2545_s0 + $0xb4] ss:$8 sps:$4 sm:$0xff]  }
  0x10   :  { %541 = vmatprep.subr.bf16.mxu0 %v1657_v8  ;;  %1617 = vmatprep.subr.bf16.mxu1 %v1657_v8  ;;  %v1710_v43 = vld [vmem:[%s2545_s0 + $0xa0] ss:$8 sps:$4 sm:$0xff]   ;;  %v1715_v46 = vld [vmem:[%s2545_s0 + $0x30] ss:$8 sps:$4 sm:$0xff]   ;;  %v1717_v48 = vld [vmem:[%s2545_s0 + $0x44] ss:$8 sps:$4 sm:$0xff]  }
  0x11   :  { %v1716_v47 = vld [vmem:[%s2545_s0 + $0xb0] ss:$8 sps:$4 sm:$0xff]   ;;  %v1719_v49 = vld [vmem:[%s2545_s0 + $0xc4] ss:$8 sps:$4 sm:$0xff]   ;;  %v1721_v50 = vld [vmem:[%s2545_s0 + $0x40] ss:$8 sps:$4 sm:$0xff]  }
  0x12   :  { %v1722_v51 = vld [vmem:[%s2545_s0 + $0xc0] ss:$8 sps:$4 sm:$0xff]   ;;  %v1723_v52 = vld [vmem:[%s2545_s0 + $0x54] ss:$8 sps:$4 sm:$0xff]   ;;  %v1727_v54 = vld [vmem:[%s2545_s0 + $0x50] ss:$8 sps:$4 sm:$0xff]  }
  0x13   :  { %542 = vmatpush1.bf16.msra.mxu0 %v1659_v9  ;;  %1633 = vmatpush1.bf16.msra.mxu1 %v1659_v9  ;;  %v1725_v53 = vld [vmem:[%s2545_s0 + $0xd4] ss:$8 sps:$4 sm:$0xff]   ;;  %v1728_v55 = vld [vmem:[%s2545_s0 + $0xd0] ss:$8 sps:$4 sm:$0xff]   ;;  %v1729_v56 = vld [vmem:[%s2545_s0 + $0x64] ss:$8 sps:$4 sm:$0xff]  }
  0x14   :  { %543 = vmatprep.subr.bf16.mxu0 %v1660_v10  ;;  %1618 = vmatprep.subr.bf16.mxu1 %v1660_v10  ;;  %v1731_v57 = vld [vmem:[%s2545_s0 + $0xe4] ss:$8 sps:$4 sm:$0xff]   ;;  %v1733_v58 = vld [vmem:[%s2545_s0 + $0x60] ss:$8 sps:$4 sm:$0xff]   ;;  %v1735_v60 = vld [vmem:[%s2545_s0 + $0x74] ss:$8 sps:$4 sm:$0xff]  }
  0x15   :  { %v1734_v59 = vld [vmem:[%s2545_s0 + $0xe0] ss:$8 sps:$4 sm:$0xff]   ;;  %v1737_v61 = vld [vmem:[%s2545_s0 + $0xf4] ss:$8 sps:$4 sm:$0xff]   ;;  %v1739_v62 = vld [vmem:[%s2545_s0 + $0x70] ss:$8 sps:$4 sm:$0xff]  }
  0x16   :  { %v1740_v63 = vld [vmem:[%s2545_s0 + $0xf0] ss:$8 sps:$4 sm:$0xff]   ;;  %v2098_v2 = vld [vmem:[%s2546_s2] ss:$0 sm:$0xff] }
  0x17   :  { %544 = vmatpush1.bf16.msra.mxu0 %v1662_v11  ;;  %1634 = vmatpush1.bf16.msra.mxu1 %v1662_v11 }
  0x18   :  { %545 = vmatprep.subr.bf16.mxu0 %v1663_v12  ;;  %1619 = vmatprep.subr.bf16.mxu1 %v1663_v12 }
  0x1b   :  { %546 = vmatpush1.bf16.msra.mxu0 %v1665_v14  ;;  %1635 = vmatpush1.bf16.msra.mxu1 %v1665_v14 }
  0x1c   :  { %547 = vmatprep.subr.bf16.mxu0 %v1666_v16  ;;  %1620 = vmatprep.subr.bf16.mxu1 %v1666_v16 }
  0x1f   :  { %548 = vmatpush1.bf16.msra.mxu0 %v1668_v17  ;;  %1636 = vmatpush1.bf16.msra.mxu1 %v1668_v17 }
  0x20   :  { %549 = vmatprep.subr.bf16.mxu0 %v1669_v18  ;;  %1621 = vmatprep.subr.bf16.mxu1 %v1669_v18 }
  0x23   :  { %550 = vmatpush2.bf16.msra.mxu0 %v1671_v19  ;;  %1637 = vmatpush2.bf16.msra.mxu1 %v1671_v19 }
  0x24   :  { %551 = vmatprep.subr.bf16.mxu0 %v1672_v20  ;;  %1622 = vmatprep.subr.bf16.mxu1 %v1672_v20 }
  0x27   :  { %552 = vmatpush2.bf16.msra.mxu0 %v1674_v21  ;;  %1638 = vmatpush2.bf16.msra.mxu1 %v1674_v21 }
  0x28   :  { %553 = vmatprep.subr.bf16.mxu0 %v1675_v22  ;;  %1623 = vmatprep.subr.bf16.mxu1 %v1675_v22 }
  0x2b   :  { %554 = vmatpush2.bf16.msra.mxu0 %v1677_v23  ;;  %1639 = vmatpush2.bf16.msra.mxu1 %v1677_v23 }
  0x2c   :  { %555 = vmatprep.subr.bf16.mxu0 %v1678_v24  ;;  %1624 = vmatprep.subr.bf16.mxu1 %v1678_v24 }
  0x2f   :  { %556 = vmatpush2.bf16.msra.mxu0 %v1680_v25  ;;  %1640 = vmatpush2.bf16.msra.mxu1 %v1680_v25 }
  0x30   :  { %557 = vmatprep.subr.bf16.mxu0 %v1681_v26  ;;  %1625 = vmatprep.subr.bf16.mxu1 %v1681_v26 }
  0x33   :  { %558 = vmatpush2.bf16.msra.mxu0 %v1683_v27  ;;  %1641 = vmatpush2.bf16.msra.mxu1 %v1683_v27 }
  0x34   :  { %559 = vmatprep.subr.bf16.mxu0 %v1684_v28  ;;  %1626 = vmatprep.subr.bf16.mxu1 %v1684_v28 }
  0x37   :  { %560 = vmatpush2.bf16.msra.mxu0 %v1686_v29  ;;  %1642 = vmatpush2.bf16.msra.mxu1 %v1686_v29 }
  0x38   :  { %561 = vmatprep.subr.bf16.mxu0 %v1687_v30  ;;  %1627 = vmatprep.subr.bf16.mxu1 %v1687_v30 }
  0x3b   :  { %562 = vmatpush2.bf16.msra.mxu0 %v1689_v31  ;;  %1643 = vmatpush2.bf16.msra.mxu1 %v1689_v31 }
  0x3c   :  { %563 = vmatprep.subr.bf16.mxu0 %v1690_v32  ;;  %1628 = vmatprep.subr.bf16.mxu1 %v1690_v32 }
  0x3f   :  { %564 = vmatpush2.bf16.msra.mxu0 %v1692_v33  ;;  %1644 = vmatpush2.bf16.msra.mxu1 %v1692_v33 }
  0x42   :  { %566 = vmatmul.mubr.bf16.vlgmr.msra.gmra.mxu0 %v1693_v34  ;;  %646 = vmatmul.mubr.bf16.vlgmr.msra.gmra.mxu1 %v1696_v35 }
  0x43   :  { %575 = vmatprep.mubr.bf16.mxu0 %v1699_v36  ;;  %655 = vmatprep.mubr.bf16.mxu1 %v1701_v37 }
  0x4a   :  { %576 = vmatmul.mubr.bf16.gmra.mxu0 %v1703_v38  ;;  %656 = vmatmul.mubr.bf16.gmra.mxu1 %v1704_v39 }
  0x4b   :  { %585 = vmatprep.mubr.bf16.mxu0 %v1705_v40  ;;  %665 = vmatprep.mubr.bf16.mxu1 %v1707_v41 }
  0x52   :  { %586 = vmatmul.mubr.bf16.gmra.mxu0 %v1709_v42  ;;  %666 = vmatmul.mubr.bf16.gmra.mxu1 %v1710_v43 }
  0x53   :  { %595 = vmatprep.mubr.bf16.mxu0 %v1711_v44  ;;  %675 = vmatprep.mubr.bf16.mxu1 %v1713_v45 }
  0x5a   :  { %596 = vmatmul.mubr.bf16.gmra.mxu0 %v1715_v46  ;;  %676 = vmatmul.mubr.bf16.gmra.mxu1 %v1716_v47 }
  0x5b   :  { %605 = vmatprep.mubr.bf16.mxu0 %v1717_v48  ;;  %685 = vmatprep.mubr.bf16.mxu1 %v1719_v49 }
  0x62   :  { %606 = vmatmul.mubr.bf16.gmra.mxu0 %v1721_v50  ;;  %686 = vmatmul.mubr.bf16.gmra.mxu1 %v1722_v51 }
  0x63   :  { %615 = vmatprep.mubr.bf16.mxu0 %v1723_v52  ;;  %695 = vmatprep.mubr.bf16.mxu1 %v1725_v53 }
  0x6a   :  { %616 = vmatmul.mubr.bf16.gmra.mxu0 %v1727_v54  ;;  %696 = vmatmul.mubr.bf16.gmra.mxu1 %v1728_v55 }
  0x6b   :  { %625 = vmatprep.mubr.bf16.mxu0 %v1729_v56  ;;  %705 = vmatprep.mubr.bf16.mxu1 %v1731_v57 }
  0x72   :  { %626 = vmatmul.mubr.bf16.gmra.mxu0 %v1733_v58  ;;  %706 = vmatmul.mubr.bf16.gmra.mxu1 %v1734_v59 }
  0x73   :  { %635 = vmatprep.mubr.bf16.mxu0 %v1735_v60  ;;  %715 = vmatprep.mubr.bf16.mxu1 %v1737_v61 }
  0x7a   :  { %636 = vmatmul.mubr.bf16.gmra.mxu0 %v1739_v62  ;;  %716 = vmatmul.mubr.bf16.gmra.mxu1 %v1740_v63 }
 0x102   :  { %v2091_v0 = vpop.f32.mrf.mxu0  ;;  %v2093_v1 = vpop.f32.mrf.mxu1 }
 0x103   :  { %921 = vst [vmem:[%s2547_s3] sm:$0xff] %v2091_v0  ;;  %937 = vst [vmem:[%s2547_s3 + $0x80] sm:$0xff] %v2093_v1 }
 0x104   :  { %v569_v3 = vpop.f32.mrf.mxu0  ;;  %v649_v4 = vpop.f32.mrf.mxu1 }
 0x105   :  { %953 = vst [vmem:[%s2548_s4] sm:$0xff] %v569_v3  ;;  %v992_v5 = vmul.f32 %v2098_v2, %v569_v3  ;;  %969 = vst [vmem:[%s2548_s4 + $0x80] sm:$0xff] %v649_v4  ;;  %v1008_v6 = vmul.f32 %v2098_v2, %v649_v4 }
 0x106   :  { %v2116_v7 = vpop.f32.mrf.mxu0  ;;  %v2118_v8 = vpop.f32.mrf.mxu1 }
 0x107   :  { %v1517_v9 = vmul.f32 -1.442695, %v992_v5  ;;  %v1533_v10 = vmul.f32 -1.442695, %v1008_v6  ;;  %922 = vst [vmem:[%s2547_s3 + $0x8] sm:$0xff] %v2116_v7  ;;  %938 = vst [vmem:[%s2547_s3 + $0x88] sm:$0xff] %v2118_v8 }
 0x108   :  { %v573_v11 = vpop.f32.mrf.mxu0  ;;  %v653_v12 = vpop.f32.mrf.mxu1 }
 0x109   :  { %1741 = vpow2.f32 %v1517_v9  ;;  %954 = vst [vmem:[%s2548_s4 + $0x8] sm:$0xff] %v573_v11  ;;  %v993_v13 = vmul.f32 %v2098_v2, %v573_v11  ;;  %970 = vst [vmem:[%s2548_s4 + $0x88] sm:$0xff] %v653_v12  ;;  %v1009_v14 = vmul.f32 %v2098_v2, %v653_v12 }
 0x10a   :  { %1743 = vpow2.f32 %v1533_v10  ;;  %v2136_v15 = vpop.f32.mrf.mxu0  ;;  %v2138_v16 = vpop.f32.mrf.mxu1 }
 0x10b   :  { %v1518_v17 = vmul.f32 -1.442695, %v993_v13  ;;  %v1534_v18 = vmul.f32 -1.442695, %v1009_v14  ;;  %923 = vst [vmem:[%s2547_s3 + $0x10] sm:$0xff] %v2136_v15  ;;  %939 = vst [vmem:[%s2547_s3 + $0x90] sm:$0xff] %v2138_v16 }
 0x10c   :  { %v579_v19 = vpop.f32.mrf.mxu0  ;;  %v659_v20 = vpop.f32.mrf.mxu1 }
 0x10d   :  { %1745 = vpow2.f32 %v1518_v17  ;;  %955 = vst [vmem:[%s2548_s4 + $0x10] sm:$0xff] %v579_v19  ;;  %v994_v21 = vmul.f32 %v2098_v2, %v579_v19  ;;  %971 = vst [vmem:[%s2548_s4 + $0x90] sm:$0xff] %v659_v20  ;;  %v1010_v22 = vmul.f32 %v2098_v2, %v659_v20 }
 0x10e   :  { %1747 = vpow2.f32 %v1534_v18  ;;  %v2156_v23 = vpop.f32.mrf.mxu0  ;;  %v2158_v24 = vpop.f32.mrf.mxu1 }
 0x10f   :  { %v1519_v25 = vmul.f32 -1.442695, %v994_v21  ;;  %v1535_v26 = vmul.f32 -1.442695, %v1010_v22  ;;  %924 = vst [vmem:[%s2547_s3 + $0x18] sm:$0xff] %v2156_v23  ;;  %940 = vst [vmem:[%s2547_s3 + $0x98] sm:$0xff] %v2158_v24 }
 0x110   :  { %v583_v27 = vpop.f32.mrf.mxu0  ;;  %v663_v28 = vpop.f32.mrf.mxu1 }
 0x111   :  { %1749 = vpow2.f32 %v1519_v25  ;;  %956 = vst [vmem:[%s2548_s4 + $0x18] sm:$0xff] %v583_v27  ;;  %v995_v29 = vmul.f32 %v2098_v2, %v583_v27  ;;  %972 = vst [vmem:[%s2548_s4 + $0x98] sm:$0xff] %v663_v28  ;;  %v1011_v30 = vmul.f32 %v2098_v2, %v663_v28 }
 0x112   :  { %1751 = vpow2.f32 %v1535_v26  ;;  %v2176_v31 = vpop.f32.mrf.mxu0  ;;  %v2178_v32 = vpop.f32.mrf.mxu1 }
 0x113   :  { %v1520_v33 = vmul.f32 -1.442695, %v995_v29  ;;  %v1536_v34 = vmul.f32 -1.442695, %v1011_v30  ;;  %925 = vst [vmem:[%s2547_s3 + $0x20] sm:$0xff] %v2176_v31  ;;  %941 = vst [vmem:[%s2547_s3 + $0xa0] sm:$0xff] %v2178_v32 }
 0x114   :  { %v589_v35 = vpop.f32.mrf.mxu0  ;;  %v669_v36 = vpop.f32.mrf.mxu1 }
 0x115   :  { %1753 = vpow2.f32 %v1520_v33  ;;  %957 = vst [vmem:[%s2548_s4 + $0x20] sm:$0xff] %v589_v35  ;;  %v996_v37 = vmul.f32 %v2098_v2, %v589_v35  ;;  %973 = vst [vmem:[%s2548_s4 + $0xa0] sm:$0xff] %v669_v36  ;;  %v1012_v38 = vmul.f32 %v2098_v2, %v669_v36 }
 0x116   :  { %v1742_v39 = vpop.eup %1741  ;;  %1755 = vpow2.f32 %v1536_v34  ;;  %v2196_v40 = vpop.f32.mrf.mxu0 }
 0x117   :  { %v2198_v41 = vpop.f32.mrf.mxu1  ;;  %v1744_v42 = vpop.eup %1743  ;;  %v1120_v43 = vadd.f32 1.0, %v1742_v39  ;;  %v1521_v44 = vmul.f32 -1.442695, %v996_v37  ;;  %926 = vst [vmem:[%s2547_s3 + $0x28] sm:$0xff] %v2196_v40  ;;  %v1537_v46 = vmul.f32 -1.442695, %v1012_v38 }
 0x118   :  { %942 = vst [vmem:[%s2547_s3 + $0xa8] sm:$0xff] %v2198_v41  ;;  %v1136_v45 = vadd.f32 1.0, %v1744_v42  ;;  %v593_v47 = vpop.f32.mrf.mxu0 }
 0x119   :  { %v673_v48 = vpop.f32.mrf.mxu1  ;;  %1757 = vrcp.f32 %v1120_v43  ;;  %958 = vst [vmem:[%s2548_s4 + $0x28] sm:$0xff] %v593_v47  ;;  %v997_v49 = vmul.f32 %v2098_v2, %v593_v47 }
 0x11a   :  { %974 = vst [vmem:[%s2548_s4 + $0xa8] sm:$0xff] %v673_v48  ;;  %v1013_v50 = vmul.f32 %v2098_v2, %v673_v48  ;;  %v1746_v51 = vpop.eup %1745  ;;  %1759 = vrcp.f32 %v1136_v45  ;;  %v2216_v52 = vpop.f32.mrf.mxu0 }
 0x11b   :  { %v2218_v53 = vpop.f32.mrf.mxu1  ;;  %v1748_v54 = vpop.eup %1747  ;;  %v1121_v55 = vadd.f32 1.0, %v1746_v51  ;;  %1761 = vpow2.f32 %v1521_v44  ;;  %v1522_v56 = vmul.f32 -1.442695, %v997_v49  ;;  %927 = vst [vmem:[%s2547_s3 + $0x30] sm:$0xff] %v2216_v52 }
 0x11c   :  { %943 = vst [vmem:[%s2547_s3 + $0xb0] sm:$0xff] %v2218_v53  ;;  %v1137_v57 = vadd.f32 1.0, %v1748_v54  ;;  %1763 = vpow2.f32 %v1537_v46  ;;  %v1538_v58 = vmul.f32 -1.442695, %v1013_v50  ;;  %v599_v59 = vpop.f32.mrf.mxu0 }
 0x11d   :  { %v679_v60 = vpop.f32.mrf.mxu1  ;;  %1765 = vrcp.f32 %v1121_v55  ;;  %959 = vst [vmem:[%s2548_s4 + $0x30] sm:$0xff] %v599_v59  ;;  %v998_v61 = vmul.f32 %v2098_v2, %v599_v59 }
 0x11e   :  { %975 = vst [vmem:[%s2548_s4 + $0xb0] sm:$0xff] %v679_v60  ;;  %v1014_v62 = vmul.f32 %v2098_v2, %v679_v60  ;;  %v1750_v63 = vpop.eup %1749  ;;  %1767 = vrcp.f32 %v1137_v57  ;;  %v2236_v3 = vpop.f32.mrf.mxu0 }
 0x11f   :  { %v2238_v4 = vpop.f32.mrf.mxu1  ;;  %v1752_v5 = vpop.eup %1751  ;;  %v1122_v6 = vadd.f32 1.0, %v1750_v63  ;;  %1769 = vpow2.f32 %v1522_v56  ;;  %v1523_v9 = vmul.f32 -1.442695, %v998_v61  ;;  %928 = vst [vmem:[%s2547_s3 + $0x38] sm:$0xff] %v2236_v3 }
 0x120   :  { %944 = vst [vmem:[%s2547_s3 + $0xb8] sm:$0xff] %v2238_v4  ;;  %v1138_v10 = vadd.f32 1.0, %v1752_v5  ;;  %1771 = vpow2.f32 %v1538_v58  ;;  %v1539_v11 = vmul.f32 -1.442695, %v1014_v62  ;;  %v603_v12 = vpop.f32.mrf.mxu0 }
 0x121   :  { %v683_v13 = vpop.f32.mrf.mxu1  ;;  %1773 = vrcp.f32 %v1122_v6  ;;  %960 = vst [vmem:[%s2548_s4 + $0x38] sm:$0xff] %v603_v12  ;;  %v999_v14 = vmul.f32 %v2098_v2, %v603_v12 }
 0x122   :  { %976 = vst [vmem:[%s2548_s4 + $0xb8] sm:$0xff] %v683_v13  ;;  %v1015_v17 = vmul.f32 %v2098_v2, %v683_v13  ;;  %v1754_v18 = vpop.eup %1753  ;;  %1775 = vrcp.f32 %v1138_v10  ;;  %v2256_v19 = vpop.f32.mrf.mxu0 }
 0x123   :  { %v2258_v20 = vpop.f32.mrf.mxu1  ;;  %v1756_v21 = vpop.eup %1755  ;;  %v1123_v22 = vadd.f32 1.0, %v1754_v18  ;;  %1777 = vpow2.f32 %v1523_v9  ;;  %v1524_v25 = vmul.f32 -1.442695, %v999_v14  ;;  %929 = vst [vmem:[%s2547_s3 + $0x40] sm:$0xff] %v2256_v19 }
 0x124   :  { %945 = vst [vmem:[%s2547_s3 + $0xc0] sm:$0xff] %v2258_v20  ;;  %v1139_v26 = vadd.f32 1.0, %v1756_v21  ;;  %1779 = vpow2.f32 %v1539_v11  ;;  %v1540_v27 = vmul.f32 -1.442695, %v1015_v17  ;;  %v609_v28 = vpop.f32.mrf.mxu0 }
 0x125   :  { %v689_v29 = vpop.f32.mrf.mxu1  ;;  %1781 = vrcp.f32 %v1123_v22  ;;  %961 = vst [vmem:[%s2548_s4 + $0x40] sm:$0xff] %v609_v28  ;;  %v1000_v30 = vmul.f32 %v2098_v2, %v609_v28 }
 0x126   :  { %977 = vst [vmem:[%s2548_s4 + $0xc0] sm:$0xff] %v689_v29  ;;  %v1016_v33 = vmul.f32 %v2098_v2, %v689_v29  ;;  %v1758_v34 = vpop.eup %1757  ;;  %1783 = vrcp.f32 %v1139_v26  ;;  %v2276_v35 = vpop.f32.mrf.mxu0 }
 0x127   :  { %v2278_v36 = vpop.f32.mrf.mxu1  ;;  %v1760_v37 = vpop.eup %1759  ;;  %v1581_v38 = vpack.c.bf16 %v1758_v34, %v2091_v0  ;;  %1785 = vpow2.f32 %v1524_v25  ;;  %v1525_v39 = vmul.f32 -1.442695, %v1000_v30  ;;  %930 = vst [vmem:[%s2547_s3 + $0x48] sm:$0xff] %v2276_v35 }
 0x128   :  { %v1541_v42 = vmul.f32 -1.442695, %v1016_v33  ;;  %946 = vst [vmem:[%s2547_s3 + $0xc8] sm:$0xff] %v2278_v36  ;;  %v1762_v43 = vpop.eup %1761  ;;  %v1597_v44 = vpack.c.bf16 %v1760_v37, %v2093_v1  ;;  %1787 = vpow2.f32 %v1540_v27  ;;  %v613_v45 = vpop.f32.mrf.mxu0 }
 0x129   :  { %v693_v46 = vpop.f32.mrf.mxu1  ;;  %v1764_v0 = vpop.eup %1763  ;;  %1408 = vst [vmem:[%s2549_s5] sm:$0xff] %v1581_v38  ;;  %v1124_v47 = vadd.f32 1.0, %v1762_v43  ;;  %1789 = vpow2.f32 %v1525_v39  ;;  %962 = vst [vmem:[%s2548_s4 + $0x48] sm:$0xff] %v613_v45  ;;  %v1001_v48 = vmul.f32 %v2098_v2, %v613_v45 }
 0x12a   :  { %978 = vst [vmem:[%s2548_s4 + $0xc8] sm:$0xff] %v693_v46  ;;  %v1017_v1 = vmul.f32 %v2098_v2, %v693_v46  ;;  %v1766_v49 = vpop.eup %1765  ;;  %1424 = vst [vmem:[%s2549_s5 + $0x80] sm:$0xff] %v1597_v44  ;;  %v1140_v50 = vadd.f32 1.0, %v1764_v0  ;;  %1791 = vpow2.f32 %v1541_v42  ;;  %v2304_v51 = vpop.f32.mrf.mxu0 }
 0x12b   :  { %v2306_v54 = vpop.f32.mrf.mxu1  ;;  %v1768_v55 = vpop.eup %1767  ;;  %v1582_v56 = vpack.c.bf16 %v1766_v49, %v2116_v7  ;;  %1793 = vrcp.f32 %v1124_v47  ;;  %v1526_v57 = vmul.f32 -1.442695, %v1001_v48  ;;  %931 = vst [vmem:[%s2547_s3 + $0x50] sm:$0xff] %v2304_v51 }
 0x12c   :  { %v1542_v58 = vmul.f32 -1.442695, %v1017_v1  ;;  %947 = vst [vmem:[%s2547_s3 + $0xd0] sm:$0xff] %v2306_v54  ;;  %v1770_v59 = vpop.eup %1769  ;;  %v1598_v60 = vpack.c.bf16 %v1768_v55, %v2118_v8  ;;  %1795 = vrcp.f32 %v1140_v50  ;;  %v619_v61 = vpop.f32.mrf.mxu0 }
 0x12d   :  { %v699_v62 = vpop.f32.mrf.mxu1  ;;  %v1772_v7 = vpop.eup %1771  ;;  %1409 = vst [vmem:[%s2549_s5 + $0x8] sm:$0xff] %v1582_v56  ;;  %v1125_v63 = vadd.f32 1.0, %v1770_v59  ;;  %1797 = vpow2.f32 %v1526_v57  ;;  %963 = vst [vmem:[%s2548_s4 + $0x50] sm:$0xff] %v619_v61  ;;  %v1002_v5 = vmul.f32 %v2098_v2, %v619_v61 }
 0x12e   :  { %979 = vst [vmem:[%s2548_s4 + $0xd0] sm:$0xff] %v699_v62  ;;  %v1018_v8 = vmul.f32 %v2098_v2, %v699_v62  ;;  %v1774_v6 = vpop.eup %1773  ;;  %1425 = vst [vmem:[%s2549_s5 + $0x88] sm:$0xff] %v1598_v60  ;;  %v1141_v9 = vadd.f32 1.0, %v1772_v7  ;;  %1799 = vpow2.f32 %v1542_v58  ;;  %v2332_v10 = vpop.f32.mrf.mxu0 }
 0x12f   :  { %v2334_v11 = vpop.f32.mrf.mxu1  ;;  %v1776_v12 = vpop.eup %1775  ;;  %v1583_v13 = vpack.c.bf16 %v1774_v6, %v2136_v15  ;;  %1801 = vrcp.f32 %v1125_v63  ;;  %v1527_v14 = vmul.f32 -1.442695, %v1002_v5  ;;  %932 = vst [vmem:[%s2547_s3 + $0x58] sm:$0xff] %v2332_v10 }
 0x130   :  { %v1543_v17 = vmul.f32 -1.442695, %v1018_v8  ;;  %948 = vst [vmem:[%s2547_s3 + $0xd8] sm:$0xff] %v2334_v11  ;;  %v1778_v18 = vpop.eup %1777  ;;  %v1599_v21 = vpack.c.bf16 %v1776_v12, %v2138_v16  ;;  %1803 = vrcp.f32 %v1141_v9  ;;  %v623_v22 = vpop.f32.mrf.mxu0 }
 0x131   :  { %v703_v25 = vpop.f32.mrf.mxu1  ;;  %v1780_v15 = vpop.eup %1779  ;;  %1410 = vst [vmem:[%s2549_s5 + $0x10] sm:$0xff] %v1583_v13  ;;  %v1126_v26 = vadd.f32 1.0, %v1778_v18  ;;  %1805 = vpow2.f32 %v1527_v14  ;;  %964 = vst [vmem:[%s2548_s4 + $0x58] sm:$0xff] %v623_v22  ;;  %v1003_v27 = vmul.f32 %v2098_v2, %v623_v22 }
 0x132   :  { %980 = vst [vmem:[%s2548_s4 + $0xd8] sm:$0xff] %v703_v25  ;;  %v1019_v16 = vmul.f32 %v2098_v2, %v703_v25  ;;  %v1782_v28 = vpop.eup %1781  ;;  %1426 = vst [vmem:[%s2549_s5 + $0x90] sm:$0xff] %v1599_v21  ;;  %v1142_v29 = vadd.f32 1.0, %v1780_v15  ;;  %1807 = vpow2.f32 %v1543_v17  ;;  %v2360_v30 = vpop.f32.mrf.mxu0 }
 0x133   :  { %v2362_v33 = vpop.f32.mrf.mxu1  ;;  %v1784_v34 = vpop.eup %1783  ;;  %v1584_v37 = vpack.c.bf16 %v1782_v28, %v2156_v23  ;;  %1809 = vrcp.f32 %v1126_v26  ;;  %v1528_v38 = vmul.f32 -1.442695, %v1003_v27  ;;  %933 = vst [vmem:[%s2547_s3 + $0x60] sm:$0xff] %v2360_v30 }
 0x134   :  { %v1544_v39 = vmul.f32 -1.442695, %v1019_v16  ;;  %949 = vst [vmem:[%s2547_s3 + $0xe0] sm:$0xff] %v2362_v33  ;;  %v1786_v42 = vpop.eup %1785  ;;  %v1600_v43 = vpack.c.bf16 %v1784_v34, %v2158_v24  ;;  %1811 = vrcp.f32 %v1142_v29  ;;  %v629_v44 = vpop.f32.mrf.mxu0 }
 0x135   :  { %v709_v45 = vpop.f32.mrf.mxu1  ;;  %v1788_v23 = vpop.eup %1787  ;;  %1411 = vst [vmem:[%s2549_s5 + $0x18] sm:$0xff] %v1584_v37  ;;  %v1127_v46 = vadd.f32 1.0, %v1786_v42  ;;  %1813 = vpow2.f32 %v1528_v38  ;;  %965 = vst [vmem:[%s2548_s4 + $0x60] sm:$0xff] %v629_v44  ;;  %v1004_v0 = vmul.f32 %v2098_v2, %v629_v44 }
 0x136   :  { %981 = vst [vmem:[%s2548_s4 + $0xe0] sm:$0xff] %v709_v45  ;;  %v1020_v24 = vmul.f32 %v2098_v2, %v709_v45  ;;  %v1790_v47 = vpop.eup %1789  ;;  %1427 = vst [vmem:[%s2549_s5 + $0x98] sm:$0xff] %v1600_v43  ;;  %v1143_v48 = vadd.f32 1.0, %v1788_v23  ;;  %1815 = vpow2.f32 %v1544_v39  ;;  %v2388_v1 = vpop.f32.mrf.mxu0 }
 0x137   :  { %v2390_v49 = vpop.f32.mrf.mxu1  ;;  %v1792_v50 = vpop.eup %1791  ;;  %1817 = vrcp.f32 %v1127_v46  ;;  %v1128_v55 = vadd.f32 1.0, %v1790_v47  ;;  %v1529_v56 = vmul.f32 -1.442695, %v1004_v0  ;;  %934 = vst [vmem:[%s2547_s3 + $0x68] sm:$0xff] %v2388_v1 }
 0x138   :  { %950 = vst [vmem:[%s2547_s3 + $0xe8] sm:$0xff] %v2390_v49  ;;  %v1794_v57 = vpop.eup %1793  ;;  %1819 = vrcp.f32 %v1143_v48  ;;  %v1144_v58 = vadd.f32 1.0, %v1792_v50  ;;  %v1545_v59 = vmul.f32 -1.442695, %v1020_v24  ;;  %v633_v60 = vpop.f32.mrf.mxu0 }
 0x139   :  { %v713_v61 = vpop.f32.mrf.mxu1  ;;  %v1796_v62 = vpop.eup %1795  ;;  %v1585_v7 = vpack.c.bf16 %v1794_v57, %v2176_v31  ;;  %1821 = vrcp.f32 %v1128_v55  ;;  %966 = vst [vmem:[%s2548_s4 + $0x68] sm:$0xff] %v633_v60  ;;  %v1005_v63 = vmul.f32 %v2098_v2, %v633_v60 }
 0x13a   :  { %982 = vst [vmem:[%s2548_s4 + $0xe8] sm:$0xff] %v713_v61  ;;  %v1021_v5 = vmul.f32 %v2098_v2, %v713_v61  ;;  %v1798_v8 = vpop.eup %1797  ;;  %v1601_v6 = vpack.c.bf16 %v1796_v62, %v2178_v32  ;;  %1823 = vrcp.f32 %v1144_v58  ;;  %v2410_v9 = vpop.f32.mrf.mxu0 }
 0x13b   :  { %v2412_v31 = vpop.f32.mrf.mxu1  ;;  %v1800_v12 = vpop.eup %1799  ;;  %1412 = vst [vmem:[%s2549_s5 + $0x20] sm:$0xff] %v1585_v7  ;;  %v1129_v13 = vadd.f32 1.0, %v1798_v8  ;;  %1825 = vpow2.f32 %v1529_v56  ;;  %v1530_v14 = vmul.f32 -1.442695, %v1005_v63  ;;  %935 = vst [vmem:[%s2547_s3 + $0x70] sm:$0xff] %v2410_v9 }
 0x13c   :  { %951 = vst [vmem:[%s2547_s3 + $0xf0] sm:$0xff] %v2412_v31  ;;  %v1802_v32 = vpop.eup %1801  ;;  %1428 = vst [vmem:[%s2549_s5 + $0xa0] sm:$0xff] %v1601_v6  ;;  %v1145_v17 = vadd.f32 1.0, %v1800_v12  ;;  %1827 = vpow2.f32 %v1545_v59  ;;  %v1546_v18 = vmul.f32 -1.442695, %v1021_v5  ;;  %v639_v21 = vpop.f32.mrf.mxu0 }
 0x13d   :  { %v719_v22 = vpop.f32.mrf.mxu1  ;;  %v1804_v25 = vpop.eup %1803  ;;  %v1586_v15 = vpack.c.bf16 %v1802_v32, %v2196_v40  ;;  %1829 = vrcp.f32 %v1129_v13  ;;  %967 = vst [vmem:[%s2548_s4 + $0x70] sm:$0xff] %v639_v21  ;;  %v1006_v26 = vmul.f32 %v2098_v2, %v639_v21 }
 0x13e   :  { %983 = vst [vmem:[%s2548_s4 + $0xf0] sm:$0xff] %v719_v22  ;;  %v1022_v27 = vmul.f32 %v2098_v2, %v719_v22  ;;  %v1806_v16 = vpop.eup %1805  ;;  %v1602_v28 = vpack.c.bf16 %v1804_v25, %v2198_v41  ;;  %1831 = vrcp.f32 %v1145_v17  ;;  %v2438_v29 = vpop.f32.mrf.mxu0 }
 0x13f   :  { %v2440_v40 = vpop.f32.mrf.mxu1  ;;  %v1808_v34 = vpop.eup %1807  ;;  %1413 = vst [vmem:[%s2549_s5 + $0x28] sm:$0xff] %v1586_v15  ;;  %v1130_v37 = vadd.f32 1.0, %v1806_v16  ;;  %1833 = vpow2.f32 %v1530_v14  ;;  %v1531_v38 = vmul.f32 -1.442695, %v1006_v26  ;;  %936 = vst [vmem:[%s2547_s3 + $0x78] sm:$0xff] %v2438_v29 }
 0x140   :  { %952 = vst [vmem:[%s2547_s3 + $0xf8] sm:$0xff] %v2440_v40  ;;  %v1810_v41 = vpop.eup %1809  ;;  %1429 = vst [vmem:[%s2549_s5 + $0xa8] sm:$0xff] %v1602_v28  ;;  %v1146_v39 = vadd.f32 1.0, %v1808_v34  ;;  %1835 = vpow2.f32 %v1546_v18  ;;  %v1547_v42 = vmul.f32 -1.442695, %v1022_v27  ;;  %v643_v43 = vpop.f32.mrf.mxu0 }
 0x141   :  { %v723_v44 = vpop.f32.mrf.mxu1  ;;  %v1812_v45 = vpop.eup %1811  ;;  %v1587_v23 = vpack.c.bf16 %v1810_v41, %v2216_v52  ;;  %1837 = vrcp.f32 %v1130_v37  ;;  %968 = vst [vmem:[%s2548_s4 + $0x78] sm:$0xff] %v643_v43  ;;  %v1007_v46 = vmul.f32 %v2098_v2, %v643_v43 }
 0x142   :  { %984 = vst [vmem:[%s2548_s4 + $0xf8] sm:$0xff] %v723_v44  ;;  %v1023_v0 = vmul.f32 %v2098_v2, %v723_v44  ;;  %v1814_v24 = vpop.eup %1813  ;;  %v1603_v47 = vpack.c.bf16 %v1812_v45, %v2218_v53  ;;  %1839 = vrcp.f32 %v1146_v39 }
 0x143   :  { %v1816_v48 = vpop.eup %1815  ;;  %1414 = vst [vmem:[%s2549_s5 + $0x30] sm:$0xff] %v1587_v23  ;;  %v1131_v52 = vadd.f32 1.0, %v1814_v24  ;;  %1841 = vpow2.f32 %v1531_v38  ;;  %v1532_v50 = vmul.f32 -1.442695, %v1007_v46 }
 0x144   :  { %v1818_v55 = vpop.eup %1817  ;;  %1430 = vst [vmem:[%s2549_s5 + $0xb0] sm:$0xff] %v1603_v47  ;;  %v1147_v56 = vadd.f32 1.0, %v1816_v48  ;;  %1843 = vpow2.f32 %v1547_v42  ;;  %v1548_v2 = vmul.f32 -1.442695, %v1023_v0 }
 0x145   :  { %v1820_v57 = vpop.eup %1819  ;;  %v1588_v53 = vpack.c.bf16 %v1818_v55, %v2236_v3  ;;  %1845 = vrcp.f32 %v1131_v52 }
 0x146   :  { %v1822_v58 = vpop.eup %1821  ;;  %v1604_v59 = vpack.c.bf16 %v1820_v57, %v2238_v4  ;;  %1847 = vrcp.f32 %v1147_v56 }
 0x147   :  { %v1824_v60 = vpop.eup %1823  ;;  %1415 = vst [vmem:[%s2549_s5 + $0x38] sm:$0xff] %v1588_v53  ;;  %v1589_v61 = vpack.c.bf16 %v1822_v58, %v2256_v19  ;;  %1849 = vpow2.f32 %v1532_v50 }
 0x148   :  { %v1826_v62 = vpop.eup %1825  ;;  %1431 = vst [vmem:[%s2549_s5 + $0xb8] sm:$0xff] %v1604_v59  ;;  %v1605_v3 = vpack.c.bf16 %v1824_v60, %v2258_v20  ;;  %1851 = vpow2.f32 %v1548_v2 }
 0x149   :  { %v1828_v7 = vpop.eup %1827  ;;  %1416 = vst [vmem:[%s2549_s5 + $0x40] sm:$0xff] %v1589_v61  ;;  %v1132_v4 = vadd.f32 1.0, %v1826_v62 }
 0x14a   :  { %v1830_v63 = vpop.eup %1829  ;;  %1432 = vst [vmem:[%s2549_s5 + $0xc0] sm:$0xff] %v1605_v3  ;;  %v1148_v19 = vadd.f32 1.0, %v1828_v7 }
 0x14b   :  { %v1832_v5 = vpop.eup %1831  ;;  %v1590_v8 = vpack.c.bf16 %v1830_v63, %v2276_v35  ;;  %1853 = vrcp.f32 %v1132_v4 }
 0x14c   :  { %v1834_v6 = vpop.eup %1833  ;;  %v1606_v20 = vpack.c.bf16 %v1832_v5, %v2278_v36  ;;  %1855 = vrcp.f32 %v1148_v19 }
 0x14d   :  { %v1836_v12 = vpop.eup %1835  ;;  %1417 = vst [vmem:[%s2549_s5 + $0x48] sm:$0xff] %v1590_v8  ;;  %v1133_v13 = vadd.f32 1.0, %v1834_v6 }
 0x14e   :  { %v1838_v14 = vpop.eup %1837  ;;  %1433 = vst [vmem:[%s2549_s5 + $0xc8] sm:$0xff] %v1606_v20  ;;  %v1149_v32 = vadd.f32 1.0, %v1836_v12 }
 0x14f   :  { %v1840_v17 = vpop.eup %1839  ;;  %v1591_v35 = vpack.c.bf16 %v1838_v14, %v2304_v51  ;;  %1857 = vrcp.f32 %v1133_v13 }
 0x150   :  { %v1842_v18 = vpop.eup %1841  ;;  %v1607_v36 = vpack.c.bf16 %v1840_v17, %v2306_v54  ;;  %1859 = vrcp.f32 %v1149_v32 }
 0x151   :  { %v1844_v21 = vpop.eup %1843  ;;  %1418 = vst [vmem:[%s2549_s5 + $0x50] sm:$0xff] %v1591_v35  ;;  %v1134_v22 = vadd.f32 1.0, %v1842_v18 }
 0x152   :  { %v1846_v25 = vpop.eup %1845  ;;  %1434 = vst [vmem:[%s2549_s5 + $0xd0] sm:$0xff] %v1607_v36  ;;  %v1150_v15 = vadd.f32 1.0, %v1844_v21 }
 0x153   :  { %v1848_v26 = vpop.eup %1847  ;;  %v1592_v51 = vpack.c.bf16 %v1846_v25, %v2332_v10  ;;  %1861 = vrcp.f32 %v1134_v22 }
 0x154   :  { %v1850_v27 = vpop.eup %1849  ;;  %v1608_v54 = vpack.c.bf16 %v1848_v26, %v2334_v11  ;;  %1863 = vrcp.f32 %v1150_v15 }
 0x155   :  { %v1852_v16 = vpop.eup %1851  ;;  %1419 = vst [vmem:[%s2549_s5 + $0x58] sm:$0xff] %v1592_v51  ;;  %v1135_v28 = vadd.f32 1.0, %v1850_v27 }
 0x156   :  { %1435 = vst [vmem:[%s2549_s5 + $0xd8] sm:$0xff] %v1608_v54  ;;  %v1151_v34 = vadd.f32 1.0, %v1852_v16 }
 0x157   :  { %1865 = vrcp.f32 %v1135_v28 }
 0x158   :  { %v1854_v37 = vpop.eup %1853  ;;  %1867 = vrcp.f32 %v1151_v34 }
 0x159   :  { %v1856_v10 = vpop.eup %1855  ;;  %v1593_v38 = vpack.c.bf16 %v1854_v37, %v2360_v30 }
 0x15a   :  { %v1609_v11 = vpack.c.bf16 %v1856_v10, %v2362_v33 }
 0x15b   :  { %1420 = vst [vmem:[%s2549_s5 + $0x60] sm:$0xff] %v1593_v38 }
 0x15c   :  { %v1858_v41 = vpop.eup %1857  ;;  %1436 = vst [vmem:[%s2549_s5 + $0xe0] sm:$0xff] %v1609_v11 }
 0x15d   :  { %v1860_v39 = vpop.eup %1859  ;;  %v1594_v42 = vpack.c.bf16 %v1858_v41, %v2388_v1 }
 0x15e   :  { %v1610_v43 = vpack.c.bf16 %v1860_v39, %v2390_v49 }
 0x15f   :  { %1421 = vst [vmem:[%s2549_s5 + $0x68] sm:$0xff] %v1594_v42 }
 0x160   :  { %v1862_v30 = vpop.eup %1861  ;;  %1437 = vst [vmem:[%s2549_s5 + $0xe8] sm:$0xff] %v1610_v43 }
 0x161   :  { %v1864_v33 = vpop.eup %1863  ;;  %v1595_v44 = vpack.c.bf16 %v1862_v30, %v2410_v9 }
 0x162   :  { %v1611_v45 = vpack.c.bf16 %v1864_v33, %v2412_v31 }
 0x163   :  { %1422 = vst [vmem:[%s2549_s5 + $0x70] sm:$0xff] %v1595_v44 }
 0x164   :  { %v1866_v1 = vpop.eup %1865  ;;  %1438 = vst [vmem:[%s2549_s5 + $0xf0] sm:$0xff] %v1611_v45 }
 0x165   :  { %v1868_v49 = vpop.eup %1867  ;;  %v1596_v23 = vpack.c.bf16 %v1866_v1, %v2438_v29 }
 0x166   :  { %v1612_v46 = vpack.c.bf16 %v1868_v49, %v2440_v40 }
 0x167   :  { %1423 = vst [vmem:[%s2549_s5 + $0x78] sm:$0xff] %v1596_v23 }
 0x168   :  { %1439 = vst [vmem:[%s2549_s5 + $0xf8] sm:$0xff] %v1612_v46 }

// kernel: adagcl_forward.14
= control target key start
LH: loop header
LB: loop body
LE: loop exit
PB: predicated region body
PF: predicated region fallthrough
CT: control target
= control target key end

     0   :  { %v1044_v1 = vmov 0   ;;  %s1684_s2 = inlined_call_operand.vmem [shape: bf16[128,256], index: 2, kind: input, shape index: {}]   ;;  %s1685_s3 = inlined_call_operand.vmem [shape: bf16[128,128], index: 3, kind: input, shape index: {}]   ;;  %s1686_s0 = inlined_call_operand.vmem [shape: f32[256,128], index: 0, kind: input, shape index: {}]   ;;  %s1687_s4 = inlined_call_operand.vmem [shape: f32[256,128], index: 4, kind: output, shape index: {0}]   ;;  %s1688_s1 = inlined_call_operand.vmem [shape: f32[256,128], index: 1, kind: input, shape index: {}]   ;;  %s1689_s5 = inlined_call_operand.vmem [shape: f32[256,128], index: 5, kind: output, shape index: {1}]   ;;  %s1690_s6 = inlined_call_operand.vmem [shape: f32[256,128], index: 6, kind: output, shape index: {2}]  }
   0x1   :  { %v1012_v0 = vld [vmem:[%s1684_s2 + $0x74] ss:$8 sps:$4 sm:$0xff]   ;;  %197 = vmatprep.mubr.bf16.mxu0 %v1044_v1  ;;  %317 = vmatprep.mubr.bf16.mxu1 %v1044_v1  ;;  %v1014_v2 = vld [vmem:[%s1684_s2 + $0x70] ss:$8 sps:$4 sm:$0xff]   ;;  %v1015_v3 = vld [vmem:[%s1684_s2 + $0x64] ss:$8 sps:$4 sm:$0xff]  }
   0x2   :  { %165 = vmatprep.subr.bf16.mxu0 %v1012_v0  ;;  %995 = vmatprep.subr.bf16.mxu1 %v1012_v0  ;;  %v1017_v4 = vld [vmem:[%s1684_s2 + $0x60] ss:$8 sps:$4 sm:$0xff]   ;;  %v1018_v5 = vld [vmem:[%s1684_s2 + $0x54] ss:$8 sps:$4 sm:$0xff]   ;;  %v1020_v6 = vld [vmem:[%s1684_s2 + $0x50] ss:$8 sps:$4 sm:$0xff]  }
   0x3   :  { %166 = vmatpush1.bf16.msra.mxu0 %v1014_v2  ;;  %1003 = vmatpush1.bf16.msra.mxu1 %v1014_v2  ;;  %v1021_v7 = vld [vmem:[%s1684_s2 + $0x44] ss:$8 sps:$4 sm:$0xff]   ;;  %v1023_v8 = vld [vmem:[%s1684_s2 + $0x40] ss:$8 sps:$4 sm:$0xff]   ;;  %v1024_v9 = vld [vmem:[%s1684_s2 + $0x34] ss:$8 sps:$4 sm:$0xff]  }
   0x4   :  { %167 = vmatprep.subr.bf16.mxu0 %v1015_v3  ;;  %996 = vmatprep.subr.bf16.mxu1 %v1015_v3  ;;  %v1026_v10 = vld [vmem:[%s1684_s2 + $0x30] ss:$8 sps:$4 sm:$0xff]   ;;  %v1027_v11 = vld [vmem:[%s1684_s2 + $0x24] ss:$8 sps:$4 sm:$0xff]   ;;  %v1029_v12 = vld [vmem:[%s1684_s2 + $0x20] ss:$8 sps:$4 sm:$0xff]  }
   0x5   :  { %v1030_v13 = vld [vmem:[%s1684_s2 + $0x14] ss:$8 sps:$4 sm:$0xff]   ;;  %v1032_v14 = vld [vmem:[%s1684_s2 + $0x10] ss:$8 sps:$4 sm:$0xff]   ;;  %v1033_v15 = vld [vmem:[%s1684_s2 + $0x4] ss:$8 sps:$4 sm:$0xff]  }
   0x6   :  { %v1035_v16 = vld [vmem:[%s1684_s2] ss:$8 sps:$4 sm:$0xff]   ;;  %v1036_v21 = vld [vmem:[%s1685_s3 + $0x38] sm:$0xff]   ;;  %v1037_v24 = vld [vmem:[%s1685_s3 + $0x30] sm:$0xff]  }
   0x7   :  { %168 = vmatpush1.bf16.msra.mxu0 %v1017_v4  ;;  %1004 = vmatpush1.bf16.msra.mxu1 %v1017_v4  ;;  %v21_v17 = vld [vmem:[%s1686_s0] sm:$0xff]  ;;  %v22_v18 = vld [vmem:[%s1686_s0 + $0x8] sm:$0xff]  ;;  %v23_v25 = vld [vmem:[%s1686_s0 + $0x10] sm:$0xff] }
   0x8   :  { %169 = vmatprep.subr.bf16.mxu0 %v1018_v5  ;;  %997 = vmatprep.subr.bf16.mxu1 %v1018_v5  ;;  %v45_v19 = vld [vmem:[%s1686_s0 + $0xc0] sm:$0xff]  ;;  %v46_v20 = vld [vmem:[%s1686_s0 + $0xc8] sm:$0xff]  ;;  %v53_v22 = vpack.c.bf16 %v22_v18, %v21_v17  ;;  %v24_v26 = vld [vmem:[%s1686_s0 + $0x18] sm:$0xff] }
   0x9   :  { %v65_v23 = vpack.c.bf16 %v46_v20, %v45_v19  ;;  %v47_v27 = vld [vmem:[%s1686_s0 + $0xd0] sm:$0xff]  ;;  %v48_v28 = vld [vmem:[%s1686_s0 + $0xd8] sm:$0xff]  ;;  %v1038_v29 = vld [vmem:[%s1685_s3 + $0x28] sm:$0xff]   ;;  %v54_v30 = vpack.c.bf16 %v24_v26, %v23_v25 }
   0xa   :  { %v66_v31 = vpack.c.bf16 %v48_v28, %v47_v27  ;;  %v25_v32 = vld [vmem:[%s1686_s0 + $0x20] sm:$0xff]  ;;  %v26_v33 = vld [vmem:[%s1686_s0 + $0x28] sm:$0xff]  ;;  %v27_v38 = vld [vmem:[%s1686_s0 + $0x30] sm:$0xff] }
   0xb   :  { %170 = vmatpush1.bf16.msra.mxu0 %v1020_v6  ;;  %1005 = vmatpush1.bf16.msra.mxu1 %v1020_v6  ;;  %v49_v34 = vld [vmem:[%s1686_s0 + $0xe0] sm:$0xff]  ;;  %v50_v35 = vld [vmem:[%s1686_s0 + $0xe8] sm:$0xff]  ;;  %v55_v36 = vpack.c.bf16 %v26_v33, %v25_v32  ;;  %v28_v39 = vld [vmem:[%s1686_s0 + $0x38] sm:$0xff] }
   0xc   :  { %171 = vmatprep.subr.bf16.mxu0 %v1021_v7  ;;  %998 = vmatprep.subr.bf16.mxu1 %v1021_v7  ;;  %v67_v37 = vpack.c.bf16 %v50_v35, %v49_v34  ;;  %v51_v40 = vld [vmem:[%s1686_s0 + $0xf0] sm:$0xff]  ;;  %v52_v41 = vld [vmem:[%s1686_s0 + $0xf8] sm:$0xff]  ;;  %v56_v42 = vpack.c.bf16 %v28_v39, %v27_v38  ;;  %v29_v44 = vld [vmem:[%s1686_s0 + $0x40] sm:$0xff] }
   0xd   :  { %v68_v43 = vpack.c.bf16 %v52_v41, %v51_v40  ;;  %v30_v45 = vld [vmem:[%s1686_s0 + $0x48] sm:$0xff]  ;;  %v31_v47 = vld [vmem:[%s1686_s0 + $0x50] sm:$0xff]  ;;  %v32_v48 = vld [vmem:[%s1686_s0 + $0x58] sm:$0xff] }
   0xe   :  { %v57_v46 = vpack.c.bf16 %v30_v45, %v29_v44  ;;  %v58_v49 = vpack.c.bf16 %v32_v48, %v31_v47  ;;  %v33_v50 = vld [vmem:[%s1686_s0 + $0x60] sm:$0xff]  ;;  %v34_v51 = vld [vmem:[%s1686_s0 + $0x68] sm:$0xff]  ;;  %v35_v53 = vld [vmem:[%s1686_s0 + $0x70] sm:$0xff] }
   0xf   :  { %172 = vmatpush1.bf16.msra.mxu0 %v1023_v8  ;;  %1006 = vmatpush1.bf16.msra.mxu1 %v1023_v8  ;;  %v59_v52 = vpack.c.bf16 %v34_v51, %v33_v50  ;;  %v36_v54 = vld [vmem:[%s1686_s0 + $0x78] sm:$0xff]  ;;  %v37_v56 = vld [vmem:[%s1686_s0 + $0x80] sm:$0xff]  ;;  %v38_v57 = vld [vmem:[%s1686_s0 + $0x88] sm:$0xff] }
  0x10   :  { %173 = vmatprep.subr.bf16.mxu0 %v1024_v9  ;;  %999 = vmatprep.subr.bf16.mxu1 %v1024_v9  ;;  %v60_v55 = vpack.c.bf16 %v36_v54, %v35_v53  ;;  %v61_v58 = vpack.c.bf16 %v38_v57, %v37_v56  ;;  %v39_v59 = vld [vmem:[%s1686_s0 + $0x90] sm:$0xff]  ;;  %v40_v60 = vld [vmem:[%s1686_s0 + $0x98] sm:$0xff]  ;;  %v1039_v61 = vld [vmem:[%s1685_s3 + $0x20] sm:$0xff]  }
  0x11   :  { %v62_v62 = vpack.c.bf16 %v40_v60, %v39_v59  ;;  %v1040_v63 = vld [vmem:[%s1685_s3 + $0x18] sm:$0xff]   ;;  %v41_v0 = vld [vmem:[%s1686_s0 + $0xa0] sm:$0xff]  ;;  %v42_v2 = vld [vmem:[%s1686_s0 + $0xa8] sm:$0xff] }
  0x12   :  { %v1041_v3 = vld [vmem:[%s1685_s3 + $0x10] sm:$0xff]   ;;  %v63_v4 = vpack.c.bf16 %v42_v2, %v41_v0  ;;  %v1042_v5 = vld [vmem:[%s1685_s3 + $0x8] sm:$0xff]   ;;  %v44_v7 = vld [vmem:[%s1686_s0 + $0xb8] sm:$0xff] }
  0x13   :  { %174 = vmatpush1.bf16.msra.mxu0 %v1026_v10  ;;  %1007 = vmatpush1.bf16.msra.mxu1 %v1026_v10  ;;  %v43_v6 = vld [vmem:[%s1686_s0 + $0xb0] sm:$0xff]  ;;  %v1043_v8 = vld [vmem:[%s1685_s3] sm:$0xff]   ;;  %v423_v26 = vld [vmem:[%s1688_s1 + $0x8] sm:$0xff] }
  0x14   :  { %175 = vmatprep.subr.bf16.mxu0 %v1027_v11  ;;  %1000 = vmatprep.subr.bf16.mxu1 %v1027_v11  ;;  %v64_v9 = vpack.c.bf16 %v44_v7, %v43_v6  ;;  %v422_v17 = vld [vmem:[%s1688_s1] sm:$0xff]  ;;  %v447_v28 = vld [vmem:[%s1688_s1 + $0xc8] sm:$0xff]  ;;  %v448_v41 = vld [vmem:[%s1688_s1 + $0xd0] sm:$0xff] }
  0x15   :  { %v424_v44 = vld [vmem:[%s1688_s1 + $0x10] sm:$0xff]  ;;  %v425_v54 = vld [vmem:[%s1688_s1 + $0x18] sm:$0xff] }
  0x16   :  { %v449_v57 = vld [vmem:[%s1688_s1 + $0xd8] sm:$0xff] }
  0x17   :  { %176 = vmatpush1.bf16.msra.mxu0 %v1029_v12  ;;  %1008 = vmatpush1.bf16.msra.mxu1 %v1029_v12 }
  0x18   :  { %177 = vmatprep.subr.bf16.mxu0 %v1030_v13  ;;  %1001 = vmatprep.subr.bf16.mxu1 %v1030_v13 }
  0x1b   :  { %178 = vmatpush1.bf16.msra.mxu0 %v1032_v14  ;;  %1009 = vmatpush1.bf16.msra.mxu1 %v1032_v14 }
  0x1c   :  { %179 = vmatprep.subr.bf16.mxu0 %v1033_v15  ;;  %1002 = vmatprep.subr.bf16.mxu1 %v1033_v15  ;;  %v446_v15 = vld [vmem:[%s1688_s1 + $0xc0] sm:$0xff] }
  0x1f   :  { %180 = vmatpush1.bf16.msra.mxu0 %v1035_v16  ;;  %1010 = vmatpush1.bf16.msra.mxu1 %v1035_v16 }
  0x20   :  { %947 = vmatprep.subr.bf16.mxu1 %v1036_v21 }
  0x22   :  { %198 = vmatmul.mubr.bf16.vlgmr.msra.gmra.mxu0 %v53_v22  ;;  %318 = vmatmul.mubr.bf16.vlgmr.msra.gmra.mxu1 %v65_v23 }
  0x23   :  { %207 = vmatprep.mubr.bf16.mxu0 %v1044_v1  ;;  %327 = vmatprep.mubr.bf16.mxu1 %v1044_v1 }
  0x24   :  { %948 = vmatpush3.bf16.msra.mxu1 %v1036_v21 }
  0x25   :  { %949 = vmatprep.subr.bf16.mxu1 %v1037_v24 }
  0x28   :  { %950 = vmatpush3.bf16.msra.mxu1 %v1037_v24 }
  0x29   :  { %951 = vmatprep.subr.bf16.mxu1 %v1038_v29 }
  0x2a   :  { %208 = vmatmul.mubr.bf16.gmra.mxu0 %v54_v30  ;;  %328 = vmatmul.mubr.bf16.gmra.mxu1 %v66_v31 }
  0x2b   :  { %217 = vmatprep.mubr.bf16.mxu0 %v1044_v1  ;;  %337 = vmatprep.mubr.bf16.mxu1 %v1044_v1 }
  0x2c   :  { %952 = vmatpush3.bf16.msra.mxu1 %v1038_v29 }
  0x2d   :  { %953 = vmatprep.subr.bf16.mxu1 %v1039_v61 }
  0x30   :  { %954 = vmatpush3.bf16.msra.mxu1 %v1039_v61 }
  0x31   :  { %955 = vmatprep.subr.bf16.mxu1 %v1040_v63 }
  0x32   :  { %218 = vmatmul.mubr.bf16.gmra.mxu0 %v55_v36  ;;  %338 = vmatmul.mubr.bf16.gmra.mxu1 %v67_v37 }
  0x33   :  { %227 = vmatprep.mubr.bf16.mxu0 %v1044_v1  ;;  %347 = vmatprep.mubr.bf16.mxu1 %v1044_v1 }
  0x34   :  { %956 = vmatpush3.bf16.msra.mxu1 %v1040_v63 }
  0x35   :  { %957 = vmatprep.subr.bf16.mxu1 %v1041_v3 }
  0x38   :  { %958 = vmatpush3.bf16.msra.mxu1 %v1041_v3 }
  0x39   :  { %959 = vmatprep.subr.bf16.mxu1 %v1042_v5 }
  0x3a   :  { %228 = vmatmul.mubr.bf16.gmra.mxu0 %v56_v42  ;;  %348 = vmatmul.mubr.bf16.gmra.mxu1 %v68_v43 }
  0x3b   :  { %237 = vmatprep.mubr.bf16.mxu0 %v1044_v1 }
  0x3c   :  { %960 = vmatpush3.bf16.msra.mxu1 %v1042_v5 }
  0x3d   :  { %961 = vmatprep.subr.bf16.mxu1 %v1043_v8 }
  0x40   :  { %962 = vmatpush3.bf16.msra.mxu1 %v1043_v8  ;;  %v450_v8 = vld [vmem:[%s1688_s1 + $0xe0] sm:$0xff] }
  0x42   :  { %238 = vmatmul.mubr.bf16.gmra.mxu0 %v57_v46 }
  0x43   :  { %247 = vmatprep.mubr.bf16.mxu0 %v1044_v1 }
  0x4a   :  { %248 = vmatmul.mubr.bf16.gmra.mxu0 %v58_v49 }
  0x4b   :  { %257 = vmatprep.mubr.bf16.mxu0 %v1044_v1 }
  0x52   :  { %258 = vmatmul.mubr.bf16.gmra.mxu0 %v59_v52 }
  0x53   :  { %267 = vmatprep.mubr.bf16.mxu0 %v1044_v1 }
  0x5a   :  { %268 = vmatmul.mubr.bf16.gmra.mxu0 %v60_v55 }
  0x5b   :  { %277 = vmatprep.mubr.bf16.mxu0 %v1044_v1 }
  0x62   :  { %278 = vmatmul.mubr.bf16.gmra.mxu0 %v61_v58 }
  0x63   :  { %287 = vmatprep.mubr.bf16.mxu0 %v1044_v1 }
  0x6a   :  { %288 = vmatmul.mubr.bf16.gmra.mxu0 %v62_v62 }
  0x6b   :  { %297 = vmatprep.mubr.bf16.mxu0 %v1044_v1 }
  0x72   :  { %298 = vmatmul.mubr.bf16.gmra.mxu0 %v63_v4 }
  0x73   :  { %307 = vmatprep.mubr.bf16.mxu0 %v1044_v1 }
  0x7a   :  { %308 = vmatmul.mubr.bf16.gmra.mxu0 %v64_v9 }
  0xe2   :  { %v199_v10 = vpop.f32.mrf.mxu0  ;;  %v319_v11 = vpop.f32.mrf.mxu1 }
  0xe3   :  { %v358_v12 = vmax.f32 %v199_v10, 0.0  ;;  %v406_v1 = vmax.f32 %v319_v11, 0.0  ;;  %v426_v11 = vld [vmem:[%s1688_s1 + $0x20] sm:$0xff] }
  0xe4   :  { %v201_v13 = vpop.f32.mrf.mxu0  ;;  %v321_v14 = vpop.f32.mrf.mxu1 }
  0xe5   :  { %759 = vst [vmem:[%s1687_s4] sm:$0xff] %v358_v12  ;;  %v359_v16 = vmax.f32 %v201_v13, 0.0  ;;  %783 = vst [vmem:[%s1687_s4 + $0xc0] sm:$0xff] %v406_v1  ;;  %v407_v18 = vmax.f32 %v321_v14, 0.0 }
  0xe6   :  { %v203_v19 = vpop.f32.mrf.mxu0  ;;  %v323_v20 = vpop.f32.mrf.mxu1 }
  0xe7   :  { %791 = vst [vmem:[%s1689_s5] sm:$0xff] %v359_v16  ;;  %v360_v21 = vmax.f32 %v203_v19, 0.0  ;;  %v478_v22 = vmul.f32 %v446_v15, %v407_v18  ;;  %815 = vst [vmem:[%s1689_s5 + $0xc0] sm:$0xff] %v407_v18  ;;  %v408_v23 = vmax.f32 %v323_v20, 0.0  ;;  %v454_v24 = vmul.f32 %v422_v17, %v359_v16  ;;  %v427_v20 = vld [vmem:[%s1688_s1 + $0x28] sm:$0xff] }
  0xe8   :  { %v205_v25 = vpop.f32.mrf.mxu0  ;;  %v325_v27 = vpop.f32.mrf.mxu1 }
  0xe9   :  { %760 = vst [vmem:[%s1687_s4 + $0x8] sm:$0xff] %v360_v21  ;;  %v361_v29 = vmax.f32 %v205_v25, 0.0  ;;  %v1291_v30 = vadd.f32 %v478_v22, %v406_v1  ;;  %784 = vst [vmem:[%s1687_s4 + $0xc8] sm:$0xff] %v408_v23  ;;  %v409_v31 = vmax.f32 %v325_v27, 0.0  ;;  %v486_v38 = vadd.f32 %v454_v24, %v358_v12 }
  0xea   :  { %v209_v32 = vpop.f32.mrf.mxu0  ;;  %v329_v33 = vpop.f32.mrf.mxu1 }
  0xeb   :  { %v455_v34 = vmul.f32 %v423_v26, %v361_v29  ;;  %792 = vst [vmem:[%s1689_s5 + $0x8] sm:$0xff] %v361_v29  ;;  %v362_v35 = vmax.f32 %v209_v32, 0.0  ;;  %v479_v36 = vmul.f32 %v447_v28, %v409_v31  ;;  %816 = vst [vmem:[%s1689_s5 + $0xc8] sm:$0xff] %v409_v31  ;;  %v410_v37 = vmax.f32 %v329_v33, 0.0 }
  0xec   :  { %v211_v39 = vpop.f32.mrf.mxu0  ;;  %v331_v40 = vpop.f32.mrf.mxu1 }
  0xed   :  { %v487_v42 = vadd.f32 %v455_v34, %v360_v21  ;;  %761 = vst [vmem:[%s1687_s4 + $0x10] sm:$0xff] %v362_v35  ;;  %v363_v43 = vmax.f32 %v211_v39, 0.0  ;;  %v1311_v45 = vadd.f32 %v479_v36, %v408_v23  ;;  %785 = vst [vmem:[%s1687_s4 + $0xd0] sm:$0xff] %v410_v37  ;;  %v411_v46 = vmax.f32 %v331_v40, 0.0  ;;  %v451_v23 = vld [vmem:[%s1688_s1 + $0xe8] sm:$0xff] }
  0xee   :  { %v213_v47 = vpop.f32.mrf.mxu0  ;;  %v333_v48 = vpop.f32.mrf.mxu1 }
  0xef   :  { %793 = vst [vmem:[%s1689_s5 + $0x10] sm:$0xff] %v363_v43  ;;  %v364_v49 = vmax.f32 %v213_v47, 0.0  ;;  %v518_v50 = vpack.c.bf16 %v487_v42, %v486_v38  ;;  %v480_v51 = vmul.f32 %v448_v41, %v411_v46  ;;  %817 = vst [vmem:[%s1689_s5 + $0xd0] sm:$0xff] %v411_v46  ;;  %v456_v52 = vmul.f32 %v424_v44, %v363_v43  ;;  %v452_v38 = vld [vmem:[%s1688_s1 + $0xf0] sm:$0xff] }
  0xf0   :  { %v215_v53 = vpop.f32.mrf.mxu0  ;;  %v412_v55 = vmax.f32 %v333_v48, 0.0  ;;  %v335_v56 = vpop.f32.mrf.mxu1  ;;  %v530_v58 = vpack.c.bf16 %v1311_v45, %v1291_v30  ;;  %v428_v43 = vld [vmem:[%s1688_s1 + $0x30] sm:$0xff] }
  0xf1   :  { %762 = vst [vmem:[%s1687_s4 + $0x18] sm:$0xff] %v364_v49  ;;  %v365_v59 = vmax.f32 %v215_v53, 0.0  ;;  %963 = vmatprep.mubr.bf16.mxu1 %v518_v50  ;;  %v1333_v60 = vadd.f32 %v480_v51, %v410_v37  ;;  %v413_v61 = vmax.f32 %v335_v56, 0.0  ;;  %v488_v5 = vadd.f32 %v456_v52, %v362_v35  ;;  %v429_v51 = vld [vmem:[%s1688_s1 + $0x38] sm:$0xff] }
  0xf2   :  { %v219_v62 = vpop.f32.mrf.mxu0  ;;  %786 = vst [vmem:[%s1687_s4 + $0xd8] sm:$0xff] %v412_v55  ;;  %v339_v63 = vpop.f32.mrf.mxu1 }
  0xf3   :  { %v457_v0 = vmul.f32 %v425_v54, %v365_v59  ;;  %794 = vst [vmem:[%s1689_s5 + $0x18] sm:$0xff] %v365_v59  ;;  %v366_v2 = vmax.f32 %v219_v62, 0.0  ;;  %v481_v3 = vmul.f32 %v449_v57, %v413_v61  ;;  %818 = vst [vmem:[%s1689_s5 + $0xd8] sm:$0xff] %v413_v61  ;;  %v414_v4 = vmax.f32 %v339_v63, 0.0  ;;  %v453_v54 = vld [vmem:[%s1688_s1 + $0xf8] sm:$0xff] }
  0xf4   :  { %v221_v6 = vpop.f32.mrf.mxu0  ;;  %v341_v7 = vpop.f32.mrf.mxu1 }
  0xf5   :  { %v489_v9 = vadd.f32 %v457_v0, %v364_v49  ;;  %763 = vst [vmem:[%s1687_s4 + $0x20] sm:$0xff] %v366_v2  ;;  %v367_v10 = vmax.f32 %v221_v6, 0.0  ;;  %v1353_v12 = vadd.f32 %v481_v3, %v412_v55  ;;  %787 = vst [vmem:[%s1687_s4 + $0xe0] sm:$0xff] %v414_v4  ;;  %v415_v1 = vmax.f32 %v341_v7, 0.0 }
  0xf6   :  { %v223_v13 = vpop.f32.mrf.mxu0  ;;  %v343_v14 = vpop.f32.mrf.mxu1 }
  0xf7   :  { %v519_v15 = vpack.c.bf16 %v489_v9, %v488_v5  ;;  %795 = vst [vmem:[%s1689_s5 + $0x20] sm:$0xff] %v367_v10  ;;  %v368_v16 = vmax.f32 %v223_v13, 0.0  ;;  %v482_v17 = vmul.f32 %v450_v8, %v415_v1  ;;  %819 = vst [vmem:[%s1689_s5 + $0xe0] sm:$0xff] %v415_v1  ;;  %v458_v18 = vmul.f32 %v426_v11, %v367_v10  ;;  %v430_v8 = vld [vmem:[%s1688_s1 + $0x40] sm:$0xff] }
  0xf8   :  { %v225_v19 = vpop.f32.mrf.mxu0  ;;  %v416_v21 = vmax.f32 %v343_v14, 0.0  ;;  %v345_v22 = vpop.f32.mrf.mxu1  ;;  %v531_v24 = vpack.c.bf16 %v1353_v12, %v1333_v60  ;;  %v431_v14 = vld [vmem:[%s1688_s1 + $0x48] sm:$0xff] }
  0xf9   :  { %764 = vst [vmem:[%s1687_s4 + $0x28] sm:$0xff] %v368_v16  ;;  %v369_v25 = vmax.f32 %v225_v19, 0.0  ;;  %964 = vmatmul.mubr.bf16.vlgmr.msra.gmra.mxu1 %v519_v15  ;;  %v1375_v26 = vadd.f32 %v482_v17, %v414_v4  ;;  %v417_v27 = vmax.f32 %v345_v22, 0.0  ;;  %v490_v35 = vadd.f32 %v458_v18, %v366_v2 }
  0xfa   :  { %v229_v28 = vpop.f32.mrf.mxu0  ;;  %788 = vst [vmem:[%s1687_s4 + $0xe8] sm:$0xff] %v416_v21  ;;  %v349_v29 = vpop.f32.mrf.mxu1 }
  0xfb   :  { %v459_v31 = vmul.f32 %v427_v20, %v369_v25  ;;  %796 = vst [vmem:[%s1689_s5 + $0x28] sm:$0xff] %v369_v25  ;;  %v370_v32 = vmax.f32 %v229_v28, 0.0  ;;  %v483_v33 = vmul.f32 %v451_v23, %v417_v27  ;;  %820 = vst [vmem:[%s1689_s5 + $0xe8] sm:$0xff] %v417_v27  ;;  %v418_v34 = vmax.f32 %v349_v29, 0.0  ;;  %v432_v25 = vld [vmem:[%s1688_s1 + $0x50] sm:$0xff] }
  0xfc   :  { %v231_v36 = vpop.f32.mrf.mxu0  ;;  %v351_v37 = vpop.f32.mrf.mxu1 }
  0xfd   :  { %v491_v39 = vadd.f32 %v459_v31, %v368_v16  ;;  %765 = vst [vmem:[%s1687_s4 + $0x30] sm:$0xff] %v370_v32  ;;  %v371_v40 = vmax.f32 %v231_v36, 0.0  ;;  %v1392_v41 = vadd.f32 %v483_v33, %v416_v21  ;;  %789 = vst [vmem:[%s1687_s4 + $0xf0] sm:$0xff] %v418_v34  ;;  %v419_v42 = vmax.f32 %v351_v37, 0.0 }
  0xfe   :  { %v233_v44 = vpop.f32.mrf.mxu0  ;;  %v353_v46 = vpop.f32.mrf.mxu1 }
  0xff   :  { %797 = vst [vmem:[%s1689_s5 + $0x30] sm:$0xff] %v371_v40  ;;  %v372_v47 = vmax.f32 %v233_v44, 0.0  ;;  %v520_v48 = vpack.c.bf16 %v491_v39, %v490_v35  ;;  %v484_v49 = vmul.f32 %v452_v38, %v419_v42  ;;  %821 = vst [vmem:[%s1689_s5 + $0xf0] sm:$0xff] %v419_v42  ;;  %v420_v52 = vmax.f32 %v353_v46, 0.0 }
 0x100   :  { %v235_v50 = vpop.f32.mrf.mxu0  ;;  %v355_v53 = vpop.f32.mrf.mxu1  ;;  %v532_v55 = vpack.c.bf16 %v1392_v41, %v1375_v26  ;;  %v460_v56 = vmul.f32 %v428_v43, %v371_v40  ;;  %v434_v43 = vld [vmem:[%s1688_s1 + $0x60] sm:$0xff] }
 0x101   :  { %766 = vst [vmem:[%s1687_s4 + $0x38] sm:$0xff] %v372_v47  ;;  %v373_v57 = vmax.f32 %v235_v50, 0.0  ;;  %967 = vmatprep.mubr.bf16.mxu1 %v520_v48  ;;  %v1417_v59 = vadd.f32 %v484_v49, %v418_v34  ;;  %v421_v61 = vmax.f32 %v355_v53, 0.0  ;;  %790 = vst [vmem:[%s1687_s4 + $0xf8] sm:$0xff] %v420_v52  ;;  %v435_v49 = vld [vmem:[%s1688_s1 + $0x68] sm:$0xff] }
 0x102   :  { %v239_v62 = vpop.f32.mrf.mxu0  ;;  %v492_v4 = vadd.f32 %v460_v56, %v370_v32  ;;  %v433_v32 = vld [vmem:[%s1688_s1 + $0x58] sm:$0xff] }
 0x103   :  { %v461_v63 = vmul.f32 %v429_v51, %v373_v57  ;;  %798 = vst [vmem:[%s1689_s5 + $0x38] sm:$0xff] %v373_v57  ;;  %v374_v0 = vmax.f32 %v239_v62, 0.0  ;;  %v485_v2 = vmul.f32 %v453_v54, %v421_v61  ;;  %822 = vst [vmem:[%s1689_s5 + $0xf8] sm:$0xff] %v421_v61 }
 0x104   :  { %v241_v3 = vpop.f32.mrf.mxu0 }
 0x105   :  { %v493_v5 = vadd.f32 %v461_v63, %v372_v47  ;;  %767 = vst [vmem:[%s1687_s4 + $0x40] sm:$0xff] %v374_v0  ;;  %v375_v6 = vmax.f32 %v241_v3, 0.0  ;;  %v1431_v7 = vadd.f32 %v485_v2, %v420_v52  ;;  %v436_v63 = vld [vmem:[%s1688_s1 + $0x70] sm:$0xff] }
 0x106   :  { %v243_v9 = vpop.f32.mrf.mxu0 }
 0x107   :  { %799 = vst [vmem:[%s1689_s5 + $0x40] sm:$0xff] %v375_v6  ;;  %v376_v10 = vmax.f32 %v243_v9, 0.0  ;;  %v521_v11 = vpack.c.bf16 %v493_v5, %v492_v4  ;;  %v533_v1 = vpack.c.bf16 %v1431_v7, %v1417_v59  ;;  %v462_v15 = vmul.f32 %v430_v8, %v375_v6  ;;  %v437_v5 = vld [vmem:[%s1688_s1 + $0x78] sm:$0xff] }
 0x108   :  { %v245_v13 = vpop.f32.mrf.mxu0 }
 0x109   :  { %768 = vst [vmem:[%s1687_s4 + $0x48] sm:$0xff] %v376_v10  ;;  %v377_v16 = vmax.f32 %v245_v13, 0.0  ;;  %968 = vmatmul.mubr.bf16.gmra.mxu1 %v521_v11  ;;  %v494_v21 = vadd.f32 %v462_v15, %v374_v0 }
 0x10a   :  { %v249_v17 = vpop.f32.mrf.mxu0 }
 0x10b   :  { %v463_v18 = vmul.f32 %v431_v14, %v377_v16  ;;  %800 = vst [vmem:[%s1689_s5 + $0x48] sm:$0xff] %v377_v16  ;;  %v378_v19 = vmax.f32 %v249_v17, 0.0  ;;  %v438_v17 = vld [vmem:[%s1688_s1 + $0x80] sm:$0xff] }
 0x10c   :  { %v251_v20 = vpop.f32.mrf.mxu0 }
 0x10d   :  { %v495_v22 = vadd.f32 %v463_v18, %v376_v10  ;;  %769 = vst [vmem:[%s1687_s4 + $0x50] sm:$0xff] %v378_v19  ;;  %v379_v23 = vmax.f32 %v251_v20, 0.0 }
 0x10e   :  { %v253_v27 = vpop.f32.mrf.mxu0 }
 0x10f   :  { %801 = vst [vmem:[%s1689_s5 + $0x50] sm:$0xff] %v379_v23  ;;  %v380_v28 = vmax.f32 %v253_v27, 0.0  ;;  %v522_v29 = vpack.c.bf16 %v495_v22, %v494_v21  ;;  %v464_v33 = vmul.f32 %v432_v25, %v379_v23  ;;  %v439_v22 = vld [vmem:[%s1688_s1 + $0x88] sm:$0xff] }
 0x110   :  { %v255_v31 = vpop.f32.mrf.mxu0 }
 0x111   :  { %770 = vst [vmem:[%s1687_s4 + $0x58] sm:$0xff] %v380_v28  ;;  %v381_v34 = vmax.f32 %v255_v31, 0.0  ;;  %971 = vmatprep.mubr.bf16.mxu1 %v522_v29  ;;  %v496_v39 = vadd.f32 %v464_v33, %v378_v19 }
 0x112   :  { %v259_v35 = vpop.f32.mrf.mxu0 }
 0x113   :  { %v465_v36 = vmul.f32 %v433_v32, %v381_v34  ;;  %802 = vst [vmem:[%s1689_s5 + $0x58] sm:$0xff] %v381_v34  ;;  %v382_v37 = vmax.f32 %v259_v35, 0.0  ;;  %v440_v35 = vld [vmem:[%s1688_s1 + $0x90] sm:$0xff] }
 0x114   :  { %v261_v38 = vpop.f32.mrf.mxu0 }
 0x115   :  { %v497_v40 = vadd.f32 %v465_v36, %v380_v28  ;;  %771 = vst [vmem:[%s1687_s4 + $0x60] sm:$0xff] %v382_v37  ;;  %v383_v42 = vmax.f32 %v261_v38, 0.0 }
 0x116   :  { %v263_v44 = vpop.f32.mrf.mxu0 }
 0x117   :  { %803 = vst [vmem:[%s1689_s5 + $0x60] sm:$0xff] %v383_v42  ;;  %v384_v46 = vmax.f32 %v263_v44, 0.0  ;;  %v523_v47 = vpack.c.bf16 %v497_v40, %v496_v39  ;;  %v466_v50 = vmul.f32 %v434_v43, %v383_v42  ;;  %v441_v40 = vld [vmem:[%s1688_s1 + $0x98] sm:$0xff] }
 0x118   :  { %v265_v48 = vpop.f32.mrf.mxu0 }
 0x119   :  { %772 = vst [vmem:[%s1687_s4 + $0x68] sm:$0xff] %v384_v46  ;;  %v385_v51 = vmax.f32 %v265_v48, 0.0  ;;  %972 = vmatmul.mubr.bf16.gmra.mxu1 %v523_v47  ;;  %v498_v57 = vadd.f32 %v466_v50, %v382_v37 }
 0x11a   :  { %v269_v52 = vpop.f32.mrf.mxu0 }
 0x11b   :  { %v467_v53 = vmul.f32 %v435_v49, %v385_v51  ;;  %804 = vst [vmem:[%s1689_s5 + $0x68] sm:$0xff] %v385_v51  ;;  %v386_v54 = vmax.f32 %v269_v52, 0.0  ;;  %v442_v52 = vld [vmem:[%s1688_s1 + $0xa0] sm:$0xff] }
 0x11c   :  { %v271_v56 = vpop.f32.mrf.mxu0 }
 0x11d   :  { %v499_v61 = vadd.f32 %v467_v53, %v384_v46  ;;  %773 = vst [vmem:[%s1687_s4 + $0x70] sm:$0xff] %v386_v54  ;;  %v387_v62 = vmax.f32 %v271_v56, 0.0 }
 0x11e   :  { %v273_v0 = vpop.f32.mrf.mxu0 }
 0x11f   :  { %805 = vst [vmem:[%s1689_s5 + $0x70] sm:$0xff] %v387_v62  ;;  %v388_v2 = vmax.f32 %v273_v0, 0.0  ;;  %v524_v3 = vpack.c.bf16 %v499_v61, %v498_v57  ;;  %v468_v6 = vmul.f32 %v436_v63, %v387_v62  ;;  %v443_v61 = vld [vmem:[%s1688_s1 + $0xa8] sm:$0xff] }
 0x120   :  { %v275_v4 = vpop.f32.mrf.mxu0 }
 0x121   :  { %774 = vst [vmem:[%s1687_s4 + $0x78] sm:$0xff] %v388_v2  ;;  %v389_v8 = vmax.f32 %v275_v4, 0.0  ;;  %975 = vmatprep.mubr.bf16.mxu1 %v524_v3  ;;  %v500_v14 = vadd.f32 %v468_v6, %v386_v54 }
 0x122   :  { %v279_v9 = vpop.f32.mrf.mxu0 }
 0x123   :  { %v469_v10 = vmul.f32 %v437_v5, %v389_v8  ;;  %806 = vst [vmem:[%s1689_s5 + $0x78] sm:$0xff] %v389_v8  ;;  %v390_v11 = vmax.f32 %v279_v9, 0.0  ;;  %v444_v9 = vld [vmem:[%s1688_s1 + $0xb0] sm:$0xff] }
 0x124   :  { %v281_v13 = vpop.f32.mrf.mxu0 }
 0x125   :  { %v501_v15 = vadd.f32 %v469_v10, %v388_v2  ;;  %775 = vst [vmem:[%s1687_s4 + $0x80] sm:$0xff] %v390_v11  ;;  %v391_v16 = vmax.f32 %v281_v13, 0.0 }
 0x126   :  { %v283_v18 = vpop.f32.mrf.mxu0 }
 0x127   :  { %807 = vst [vmem:[%s1689_s5 + $0x80] sm:$0xff] %v391_v16  ;;  %v392_v19 = vmax.f32 %v283_v18, 0.0  ;;  %v525_v20 = vpack.c.bf16 %v501_v15, %v500_v14  ;;  %v470_v23 = vmul.f32 %v438_v17, %v391_v16  ;;  %v445_v15 = vld [vmem:[%s1688_s1 + $0xb8] sm:$0xff] }
 0x128   :  { %v285_v21 = vpop.f32.mrf.mxu0 }
 0x129   :  { %776 = vst [vmem:[%s1687_s4 + $0x88] sm:$0xff] %v392_v19  ;;  %v393_v25 = vmax.f32 %v285_v21, 0.0  ;;  %976 = vmatmul.mubr.bf16.gmra.mxu1 %v525_v20  ;;  %v502_v32 = vadd.f32 %v470_v23, %v390_v11 }
 0x12a   :  { %v289_v27 = vpop.f32.mrf.mxu0 }
 0x12b   :  { %v471_v28 = vmul.f32 %v439_v22, %v393_v25  ;;  %808 = vst [vmem:[%s1689_s5 + $0x88] sm:$0xff] %v393_v25  ;;  %v394_v29 = vmax.f32 %v289_v27, 0.0 }
 0x12c   :  { %v291_v31 = vpop.f32.mrf.mxu0 }
 0x12d   :  { %v503_v33 = vadd.f32 %v471_v28, %v392_v19  ;;  %777 = vst [vmem:[%s1687_s4 + $0x90] sm:$0xff] %v394_v29  ;;  %v395_v34 = vmax.f32 %v291_v31, 0.0 }
 0x12e   :  { %v293_v36 = vpop.f32.mrf.mxu0 }
 0x12f   :  { %809 = vst [vmem:[%s1689_s5 + $0x90] sm:$0xff] %v395_v34  ;;  %v396_v37 = vmax.f32 %v293_v36, 0.0  ;;  %v526_v38 = vpack.c.bf16 %v503_v33, %v502_v32  ;;  %v472_v42 = vmul.f32 %v440_v35, %v395_v34 }
 0x130   :  { %v295_v39 = vpop.f32.mrf.mxu0 }
 0x131   :  { %778 = vst [vmem:[%s1687_s4 + $0x98] sm:$0xff] %v396_v37  ;;  %v397_v43 = vmax.f32 %v295_v39, 0.0  ;;  %979 = vmatprep.mubr.bf16.mxu1 %v526_v38  ;;  %v504_v49 = vadd.f32 %v472_v42, %v394_v29 }
 0x132   :  { %v299_v44 = vpop.f32.mrf.mxu0 }
 0x133   :  { %v473_v46 = vmul.f32 %v441_v40, %v397_v43  ;;  %810 = vst [vmem:[%s1689_s5 + $0x98] sm:$0xff] %v397_v43  ;;  %v398_v47 = vmax.f32 %v299_v44, 0.0 }
 0x134   :  { %v301_v48 = vpop.f32.mrf.mxu0 }
 0x135   :  { %v505_v50 = vadd.f32 %v473_v46, %v396_v37  ;;  %779 = vst [vmem:[%s1687_s4 + $0xa0] sm:$0xff] %v398_v47  ;;  %v399_v51 = vmax.f32 %v301_v48, 0.0 }
 0x136   :  { %v303_v53 = vpop.f32.mrf.mxu0 }
 0x137   :  { %811 = vst [vmem:[%s1689_s5 + $0xa0] sm:$0xff] %v399_v51  ;;  %v400_v54 = vmax.f32 %v303_v53, 0.0  ;;  %v527_v56 = vpack.c.bf16 %v505_v50, %v504_v49  ;;  %v474_v62 = vmul.f32 %v442_v52, %v399_v51 }
 0x138   :  { %v305_v57 = vpop.f32.mrf.mxu0 }
 0x139   :  { %780 = vst [vmem:[%s1687_s4 + $0xa8] sm:$0xff] %v400_v54  ;;  %v401_v63 = vmax.f32 %v305_v57, 0.0  ;;  %980 = vmatmul.mubr.bf16.gmra.mxu1 %v527_v56  ;;  %v506_v5 = vadd.f32 %v474_v62, %v398_v47 }
 0x13a   :  { %v309_v0 = vpop.f32.mrf.mxu0 }
 0x13b   :  { %v475_v2 = vmul.f32 %v443_v61, %v401_v63  ;;  %812 = vst [vmem:[%s1689_s5 + $0xa8] sm:$0xff] %v401_v63  ;;  %v402_v3 = vmax.f32 %v309_v0, 0.0 }
 0x13c   :  { %v311_v4 = vpop.f32.mrf.mxu0 }
 0x13d   :  { %v507_v6 = vadd.f32 %v475_v2, %v400_v54  ;;  %781 = vst [vmem:[%s1687_s4 + $0xb0] sm:$0xff] %v402_v3  ;;  %v403_v8 = vmax.f32 %v311_v4, 0.0 }
 0x13e   :  { %v313_v10 = vpop.f32.mrf.mxu0 }
 0x13f   :  { %813 = vst [vmem:[%s1689_s5 + $0xb0] sm:$0xff] %v403_v8  ;;  %v404_v11 = vmax.f32 %v313_v10, 0.0  ;;  %v528_v13 = vpack.c.bf16 %v507_v6, %v506_v5  ;;  %v476_v16 = vmul.f32 %v444_v9, %v403_v8 }
 0x140   :  { %v315_v14 = vpop.f32.mrf.mxu0 }
 0x141   :  { %782 = vst [vmem:[%s1687_s4 + $0xb8] sm:$0xff] %v404_v11  ;;  %v405_v17 = vmax.f32 %v315_v14, 0.0  ;;  %983 = vmatprep.mubr.bf16.mxu1 %v528_v13  ;;  %v508_v19 = vadd.f32 %v476_v16, %v402_v3 }
 0x143   :  { %v477_v18 = vmul.f32 %v445_v15, %v405_v17  ;;  %814 = vst [vmem:[%s1689_s5 + $0xb8] sm:$0xff] %v405_v17 }
 0x145   :  { %v509_v20 = vadd.f32 %v477_v18, %v404_v11 }
 0x147   :  { %v529_v21 = vpack.c.bf16 %v509_v20, %v508_v19 }
 0x149   :  { %984 = vmatmul.mubr.bf16.gmra.mxu1 %v529_v21 }
 0x14a   :  { %987 = vmatprep.mubr.bf16.mxu1 %v530_v58 }
 0x151   :  { %988 = vmatmul.mubr.bf16.gmra.mxu1 %v531_v24 }
 0x152   :  { %991 = vmatprep.mubr.bf16.mxu1 %v532_v55 }
 0x159   :  { %992 = vmatmul.mubr.bf16.gmra.mxu1 %v533_v1 }
 0x1b9   :  { %v965_v22 = vpop.f32.mrf.mxu1 }
 0x1ba   :  { %v825_v23 = vmax.f32 %v965_v22, 0.0 }
 0x1bb   :  { %v632_v25 = vpop.f32.mrf.mxu1 }
 0x1bc   :  { %857 = vst [vmem:[%s1690_s6 + $0x10] sm:$0xff] %v825_v23  ;;  %v823_v30 = vmax.f32 %v632_v25, 0.0 }
 0x1bd   :  { %v966_v45 = vpop.f32.mrf.mxu1 }
 0x1be   :  { %855 = vst [vmem:[%s1690_s6] sm:$0xff] %v823_v30  ;;  %v826_v58 = vmax.f32 %v966_v45, 0.0 }
 0x1bf   :  { %v635_v60 = vpop.f32.mrf.mxu1 }
 0x1c0   :  { %858 = vst [vmem:[%s1690_s6 + $0x18] sm:$0xff] %v826_v58  ;;  %v824_v12 = vmax.f32 %v635_v60, 0.0 }
 0x1c2   :  { %856 = vst [vmem:[%s1690_s6 + $0x8] sm:$0xff] %v824_v12 }
 0x1c9   :  { %v969_v24 = vpop.f32.mrf.mxu1 }
 0x1ca   :  { %v829_v26 = vmax.f32 %v969_v24, 0.0 }
 0x1cb   :  { %v648_v41 = vpop.f32.mrf.mxu1 }
 0x1cc   :  { %861 = vst [vmem:[%s1690_s6 + $0x30] sm:$0xff] %v829_v26  ;;  %v827_v55 = vmax.f32 %v648_v41, 0.0 }
 0x1cd   :  { %v970_v59 = vpop.f32.mrf.mxu1 }
 0x1ce   :  { %859 = vst [vmem:[%s1690_s6 + $0x20] sm:$0xff] %v827_v55  ;;  %v830_v7 = vmax.f32 %v970_v59, 0.0 }
 0x1cf   :  { %v651_v1 = vpop.f32.mrf.mxu1 }
 0x1d0   :  { %862 = vst [vmem:[%s1690_s6 + $0x38] sm:$0xff] %v830_v7  ;;  %v828_v27 = vmax.f32 %v651_v1, 0.0 }
 0x1d2   :  { %860 = vst [vmem:[%s1690_s6 + $0x28] sm:$0xff] %v828_v27 }
 0x1d9   :  { %v973_v28 = vpop.f32.mrf.mxu1 }
 0x1da   :  { %v833_v29 = vmax.f32 %v973_v28, 0.0 }
 0x1db   :  { %v664_v31 = vpop.f32.mrf.mxu1 }
 0x1dc   :  { %865 = vst [vmem:[%s1690_s6 + $0x50] sm:$0xff] %v833_v29  ;;  %v831_v32 = vmax.f32 %v664_v31, 0.0 }
 0x1dd   :  { %v974_v33 = vpop.f32.mrf.mxu1 }
 0x1de   :  { %863 = vst [vmem:[%s1690_s6 + $0x40] sm:$0xff] %v831_v32  ;;  %v834_v34 = vmax.f32 %v974_v33, 0.0 }
 0x1df   :  { %v667_v35 = vpop.f32.mrf.mxu1 }
 0x1e0   :  { %866 = vst [vmem:[%s1690_s6 + $0x58] sm:$0xff] %v834_v34  ;;  %v832_v36 = vmax.f32 %v667_v35, 0.0 }
 0x1e2   :  { %864 = vst [vmem:[%s1690_s6 + $0x48] sm:$0xff] %v832_v36 }
 0x1e9   :  { %v977_v37 = vpop.f32.mrf.mxu1 }
 0x1ea   :  { %v837_v38 = vmax.f32 %v977_v37, 0.0 }
 0x1eb   :  { %v680_v39 = vpop.f32.mrf.mxu1 }
 0x1ec   :  { %869 = vst [vmem:[%s1690_s6 + $0x70] sm:$0xff] %v837_v38  ;;  %v835_v40 = vmax.f32 %v680_v39, 0.0 }
 0x1ed   :  { %v978_v42 = vpop.f32.mrf.mxu1 }
 0x1ee   :  { %867 = vst [vmem:[%s1690_s6 + $0x60] sm:$0xff] %v835_v40  ;;  %v838_v43 = vmax.f32 %v978_v42, 0.0 }
 0x1ef   :  { %v683_v44 = vpop.f32.mrf.mxu1 }
 0x1f0   :  { %870 = vst [vmem:[%s1690_s6 + $0x78] sm:$0xff] %v838_v43  ;;  %v836_v46 = vmax.f32 %v683_v44, 0.0 }
 0x1f2   :  { %868 = vst [vmem:[%s1690_s6 + $0x68] sm:$0xff] %v836_v46 }
 0x1f9   :  { %v981_v47 = vpop.f32.mrf.mxu1 }
 0x1fa   :  { %v841_v48 = vmax.f32 %v981_v47, 0.0 }
 0x1fb   :  { %v696_v49 = vpop.f32.mrf.mxu1 }
 0x1fc   :  { %873 = vst [vmem:[%s1690_s6 + $0x90] sm:$0xff] %v841_v48  ;;  %v839_v50 = vmax.f32 %v696_v49, 0.0 }
 0x1fd   :  { %v982_v51 = vpop.f32.mrf.mxu1 }
 0x1fe   :  { %871 = vst [vmem:[%s1690_s6 + $0x80] sm:$0xff] %v839_v50  ;;  %v842_v52 = vmax.f32 %v982_v51, 0.0 }
 0x1ff   :  { %v699_v53 = vpop.f32.mrf.mxu1 }
 0x200   :  { %874 = vst [vmem:[%s1690_s6 + $0x98] sm:$0xff] %v842_v52  ;;  %v840_v54 = vmax.f32 %v699_v53, 0.0 }
 0x202   :  { %872 = vst [vmem:[%s1690_s6 + $0x88] sm:$0xff] %v840_v54 }
 0x209   :  { %v985_v56 = vpop.f32.mrf.mxu1 }
 0x20a   :  { %v845_v57 = vmax.f32 %v985_v56, 0.0 }
 0x20b   :  { %v712_v61 = vpop.f32.mrf.mxu1 }
 0x20c   :  { %877 = vst [vmem:[%s1690_s6 + $0xb0] sm:$0xff] %v845_v57  ;;  %v843_v62 = vmax.f32 %v712_v61, 0.0 }
 0x20d   :  { %v986_v63 = vpop.f32.mrf.mxu1 }
 0x20e   :  { %875 = vst [vmem:[%s1690_s6 + $0xa0] sm:$0xff] %v843_v62  ;;  %v846_v0 = vmax.f32 %v986_v63, 0.0 }
 0x20f   :  { %v715_v2 = vpop.f32.mrf.mxu1 }
 0x210   :  { %878 = vst [vmem:[%s1690_s6 + $0xb8] sm:$0xff] %v846_v0  ;;  %v844_v3 = vmax.f32 %v715_v2, 0.0 }
 0x211   :  { %v989_v4 = vpop.f32.mrf.mxu1 }
 0x212   :  { %876 = vst [vmem:[%s1690_s6 + $0xa8] sm:$0xff] %v844_v3  ;;  %v849_v5 = vmax.f32 %v989_v4, 0.0 }
 0x213   :  { %v728_v6 = vpop.f32.mrf.mxu1 }
 0x214   :  { %881 = vst [vmem:[%s1690_s6 + $0xd0] sm:$0xff] %v849_v5  ;;  %v847_v8 = vmax.f32 %v728_v6, 0.0 }
 0x215   :  { %v990_v9 = vpop.f32.mrf.mxu1 }
 0x216   :  { %879 = vst [vmem:[%s1690_s6 + $0xc0] sm:$0xff] %v847_v8  ;;  %v850_v10 = vmax.f32 %v990_v9, 0.0 }
 0x217   :  { %v731_v11 = vpop.f32.mrf.mxu1 }
 0x218   :  { %882 = vst [vmem:[%s1690_s6 + $0xd8] sm:$0xff] %v850_v10  ;;  %v848_v13 = vmax.f32 %v731_v11, 0.0 }
 0x219   :  { %v993_v14 = vpop.f32.mrf.mxu1 }
 0x21a   :  { %880 = vst [vmem:[%s1690_s6 + $0xc8] sm:$0xff] %v848_v13  ;;  %v853_v15 = vmax.f32 %v993_v14, 0.0 }
 0x21b   :  { %v744_v16 = vpop.f32.mrf.mxu1 }
 0x21c   :  { %885 = vst [vmem:[%s1690_s6 + $0xf0] sm:$0xff] %v853_v15  ;;  %v851_v17 = vmax.f32 %v744_v16, 0.0 }
 0x21d   :  { %v994_v18 = vpop.f32.mrf.mxu1 }
 0x21e   :  { %883 = vst [vmem:[%s1690_s6 + $0xe0] sm:$0xff] %v851_v17  ;;  %v854_v19 = vmax.f32 %v994_v18, 0.0 }
 0x21f   :  { %v747_v20 = vpop.f32.mrf.mxu1 }
 0x220   :  { %886 = vst [vmem:[%s1690_s6 + $0xf8] sm:$0xff] %v854_v19  ;;  %v852_v21 = vmax.f32 %v747_v20, 0.0 }
 0x222   :  { %884 = vst [vmem:[%s1690_s6 + $0xe8] sm:$0xff] %v852_v21 }

// kernel: adagcl_forward.15
= control target key start
LH: loop header
LB: loop body
LE: loop exit
PB: predicated region body
PF: predicated region fallthrough
CT: control target
= control target key end

     0   :  { %vm483_vm0 = vcmask 7168   ;;  %s1115_s1 = inlined_call_operand.vmem [shape: f32[128,128], index: 1, kind: input, shape index: {}]   ;;  %s1116_s0 = inlined_call_operand.vmem [shape: f32[128,128], index: 0, kind: input, shape index: {}]   ;;  %s1117_s2 = inlined_call_operand.vmem [shape: f32[128,128], index: 2, kind: output, shape index: {0}]   ;;  %s1118_s3 = inlined_call_operand.vmem [shape: bf16[128,128], index: 3, kind: output, shape index: {1}]   ;;  %s1119_s4 = inlined_call_operand.vmem [shape: bf16[128,128], index: 4, kind: output, shape index: {2}]   ;;  %s1120_s6 = inlined_call_operand.vmem [shape: f32[1,1,128], index: 6, kind: output, shape index: {4}]   ;;  %s1121_s5 = inlined_call_operand.vmem [shape: f32[1,128,1], index: 5, kind: output, shape index: {3}]  }
   0x1   :  { %v55_v0 = vld [vmem:[%s1115_s1 + $0x70] sm:$0xff]  ;;  %v56_v1 = vld [vmem:[%s1115_s1 + $0x78] sm:$0xff]  ;;  %v53_v2 = vld [vmem:[%s1115_s1 + $0x60] sm:$0xff] }
   0x2   :  { %v840_v3 = vpack.c.bf16 %v56_v1, %v55_v0  ;;  %v54_v4 = vld [vmem:[%s1115_s1 + $0x68] sm:$0xff]  ;;  %v41_v6 = vld [vmem:[%s1115_s1] sm:$0xff]  ;;  %v51_v10 = vld [vmem:[%s1115_s1 + $0x50] sm:$0xff] }
   0x3   :  { %v845_v5 = vpack.c.bf16 %v54_v4, %v53_v2  ;;  %v42_v7 = vld [vmem:[%s1115_s1 + $0x8] sm:$0xff]  ;;  %v17_v8 = vld [vmem:[%s1116_s0] sm:$0xff]  ;;  %v52_v11 = vld [vmem:[%s1115_s1 + $0x58] sm:$0xff] }
   0x4   :  { %732 = vmatprep.subr.bf16.mxu0 %v840_v3  ;;  %v18_v9 = vld [vmem:[%s1116_s0 + $0x8] sm:$0xff]  ;;  %v57_v12 = vpack.c.bf16 %v42_v7, %v41_v6  ;;  %v871_v14 = vpack.c.bf16 %v52_v11, %v51_v10  ;;  %v29_v15 = vld [vmem:[%s1116_s0 + $0x60] sm:$0xff]  ;;  %v31_v17 = vld [vmem:[%s1116_s0 + $0x70] sm:$0xff] }
   0x5   :  { %733 = vmatpush3.bf16.xpose.msra.mxu0 %v840_v3  ;;  %v868_v13 = vpack.c.bf16 %v18_v9, %v17_v8  ;;  %v30_v16 = vld [vmem:[%s1116_s0 + $0x68] sm:$0xff]  ;;  %v32_v18 = vld [vmem:[%s1116_s0 + $0x78] sm:$0xff]  ;;  %v49_v21 = vld [vmem:[%s1115_s1 + $0x40] sm:$0xff] }
   0x6   :  { %734 = vmatprep.subr.bf16.mxu0 %v845_v5  ;;  %780 = vmatprep.mubr.bf16.mxu1 %v57_v12  ;;  %v885_v19 = vpack.c.bf16 %v32_v18, %v31_v17  ;;  %v39_v20 = vpack.c.bf16 %v30_v16, %v29_v15  ;;  %v50_v22 = vld [vmem:[%s1115_s1 + $0x48] sm:$0xff]  ;;  %v27_v24 = vld [vmem:[%s1116_s0 + $0x50] sm:$0xff]  ;;  %v28_v25 = vld [vmem:[%s1116_s0 + $0x58] sm:$0xff] }
   0x7   :  { %748 = vmatprep.mubr.bf16.mxu0 %v868_v13  ;;  %v61_v23 = vpack.c.bf16 %v50_v22, %v49_v21  ;;  %v38_v26 = vpack.c.bf16 %v28_v25, %v27_v24  ;;  %v47_v27 = vld [vmem:[%s1115_s1 + $0x30] sm:$0xff]  ;;  %v48_v28 = vld [vmem:[%s1115_s1 + $0x38] sm:$0xff]  ;;  %v25_v30 = vld [vmem:[%s1116_s0 + $0x40] sm:$0xff] }
   0x8   :  { %764 = vmatprep.subr.bf16.mxu1 %v885_v19  ;;  %v60_v29 = vpack.c.bf16 %v48_v28, %v47_v27  ;;  %v26_v31 = vld [vmem:[%s1116_s0 + $0x48] sm:$0xff]  ;;  %v45_v33 = vld [vmem:[%s1115_s1 + $0x20] sm:$0xff]  ;;  %v23_v36 = vld [vmem:[%s1116_s0 + $0x30] sm:$0xff] }
   0x9   :  { %765 = vmatpush3.bf16.xpose.msra.mxu1 %v885_v19  ;;  %v37_v32 = vpack.c.bf16 %v26_v31, %v25_v30  ;;  %v46_v34 = vld [vmem:[%s1115_s1 + $0x28] sm:$0xff]  ;;  %v24_v37 = vld [vmem:[%s1116_s0 + $0x38] sm:$0xff]  ;;  %v43_v39 = vld [vmem:[%s1115_s1 + $0x10] sm:$0xff] }
   0xa   :  { %766 = vmatprep.subr.bf16.mxu1 %v39_v20  ;;  %v59_v35 = vpack.c.bf16 %v46_v34, %v45_v33  ;;  %v36_v38 = vpack.c.bf16 %v24_v37, %v23_v36  ;;  %v44_v40 = vld [vmem:[%s1115_s1 + $0x18] sm:$0xff]  ;;  %v21_v42 = vld [vmem:[%s1116_s0 + $0x20] sm:$0xff]  ;;  %v22_v43 = vld [vmem:[%s1116_s0 + $0x28] sm:$0xff] }
   0xb   :  { %v58_v41 = vpack.c.bf16 %v44_v40, %v43_v39  ;;  %v35_v44 = vpack.c.bf16 %v22_v43, %v21_v42  ;;  %v19_v45 = vld [vmem:[%s1116_s0 + $0x10] sm:$0xff]  ;;  %v20_v46 = vld [vmem:[%s1116_s0 + $0x18] sm:$0xff] }
   0xc   :  { %v34_v47 = vpack.c.bf16 %v20_v46, %v19_v45 }
   0xd   :  { %735 = vmatpush3.bf16.xpose.msra.mxu0 %v845_v5 }
   0xe   :  { %736 = vmatprep.subr.bf16.mxu0 %v871_v14 }
  0x11   :  { %767 = vmatpush3.bf16.xpose.msra.mxu1 %v39_v20 }
  0x12   :  { %768 = vmatprep.subr.bf16.mxu1 %v38_v26 }
  0x15   :  { %737 = vmatpush3.bf16.xpose.msra.mxu0 %v871_v14 }
  0x16   :  { %738 = vmatprep.subr.bf16.mxu0 %v61_v23 }
  0x19   :  { %769 = vmatpush3.bf16.xpose.msra.mxu1 %v38_v26 }
  0x1a   :  { %770 = vmatprep.subr.bf16.mxu1 %v37_v32 }
  0x1d   :  { %739 = vmatpush3.bf16.xpose.msra.mxu0 %v61_v23 }
  0x1e   :  { %740 = vmatprep.subr.bf16.mxu0 %v60_v29 }
  0x21   :  { %771 = vmatpush3.bf16.xpose.msra.mxu1 %v37_v32 }
  0x22   :  { %772 = vmatprep.subr.bf16.mxu1 %v36_v38 }
  0x25   :  { %741 = vmatpush3.bf16.xpose.msra.mxu0 %v60_v29 }
  0x26   :  { %742 = vmatprep.subr.bf16.mxu0 %v59_v35 }
  0x29   :  { %773 = vmatpush3.bf16.xpose.msra.mxu1 %v36_v38 }
  0x2a   :  { %774 = vmatprep.subr.bf16.mxu1 %v35_v44 }
  0x2d   :  { %743 = vmatpush3.bf16.xpose.msra.mxu0 %v59_v35 }
  0x2e   :  { %744 = vmatprep.subr.bf16.mxu0 %v58_v41 }
  0x31   :  { %775 = vmatpush3.bf16.xpose.msra.mxu1 %v35_v44 }
  0x32   :  { %776 = vmatprep.subr.bf16.mxu1 %v34_v47 }
  0x35   :  { %745 = vmatpush3.bf16.xpose.msra.mxu0 %v58_v41 }
  0x36   :  { %746 = vmatprep.subr.bf16.mxu0 %v57_v12 }
  0x39   :  { %777 = vmatpush3.bf16.xpose.msra.mxu1 %v34_v47 }
  0x3a   :  { %778 = vmatprep.subr.bf16.mxu1 %v868_v13 }
  0x3d   :  { %747 = vmatpush3.bf16.xpose.msra.mxu0 %v57_v12 }
  0x41   :  { %779 = vmatpush3.bf16.xpose.msra.mxu1 %v868_v13 }
  0x44   :  { %749 = vmatmul.mubr.bf16.vlgmr.msra.gmra.mxu0 %v34_v47 }
  0x45   :  { %752 = vmatprep.mubr.bf16.mxu0 %v35_v44 }
  0x48   :  { %781 = vmatmul.mubr.bf16.vlgmr.msra.gmra.mxu1 %v58_v41 }
  0x49   :  { %784 = vmatprep.mubr.bf16.mxu1 %v59_v35 }
  0x4c   :  { %753 = vmatmul.mubr.bf16.gmra.mxu0 %v36_v38 }
  0x4d   :  { %756 = vmatprep.mubr.bf16.mxu0 %v37_v32 }
  0x50   :  { %785 = vmatmul.mubr.bf16.gmra.mxu1 %v60_v29 }
  0x51   :  { %788 = vmatprep.mubr.bf16.mxu1 %v61_v23 }
  0x54   :  { %757 = vmatmul.mubr.bf16.gmra.mxu0 %v38_v26 }
  0x55   :  { %760 = vmatprep.mubr.bf16.mxu0 %v39_v20 }
  0x58   :  { %789 = vmatmul.mubr.bf16.gmra.mxu1 %v871_v14 }
  0x59   :  { %792 = vmatprep.mubr.bf16.mxu1 %v845_v5 }
  0x5c   :  { %761 = vmatmul.mubr.bf16.gmra.mxu0 %v885_v19 }
  0x60   :  { %793 = vmatmul.mubr.bf16.gmra.mxu1 %v840_v3 }
 0x104   :  { %v750_v48 = vpop.f32.mrf.mxu0 }
 0x105   :  { %164 = vst [vmem:[%s1117_s2 + $0x10] sm:$0xff] %v750_v48  ;;  %v437_v49 = vand.u32 2147483647, %v750_v48 }
 0x106   :  { %v99_v50 = vpop.f32.mrf.mxu0 }
 0x107   :  { %162 = vst [vmem:[%s1117_s2] sm:$0xff] %v99_v50  ;;  %455 = vadd.xlane.f32.xlu1 %v437_v49  ;;  %v435_v51 = vand.u32 2147483647, %v99_v50 }
 0x108   :  { %v751_v52 = vpop.f32.mrf.mxu0  ;;  %v782_v61 = vpop.f32.mrf.mxu1 }
 0x109   :  { %165 = vst [vmem:[%s1117_s2 + $0x18] sm:$0xff] %v751_v52  ;;  %v614_v53 = vpack.c.bf16 %v751_v52, %v750_v48  ;;  %451 = vadd.xlane.f32.xlu0 %v435_v51  ;;  %v438_v54 = vand.u32 2147483647, %v751_v52 }
 0x10a   :  { %v102_v55 = vpop.f32.mrf.mxu0  ;;  %v292_v1 = vpop.f32.mrf.mxu1 }
 0x10b   :  { %686 = vst [vmem:[%s1118_s3 + $0x8] sm:$0xff] %v614_v53   ;;  %163 = vst [vmem:[%s1117_s2 + $0x8] sm:$0xff] %v102_v55  ;;  %v609_v56 = vpack.c.bf16 %v102_v55, %v99_v50  ;;  %457 = vadd.xlane.f32.xlu1 %v438_v54  ;;  %v436_v57 = vand.u32 2147483647, %v102_v55 }
 0x10c   :  { %v754_v58 = vpop.f32.mrf.mxu0  ;;  %v783_v7 = vpop.f32.mrf.mxu1 }
 0x10d   :  { %610 = vst [vmem:[%s1118_s3] sm:$0xff] %v609_v56   ;;  %168 = vst [vmem:[%s1117_s2 + $0x30] sm:$0xff] %v754_v58  ;;  %453 = vadd.xlane.f32.xlu0 %v436_v57  ;;  %v500_v59 = vadd.f32 %v436_v57, %v435_v51  ;;  %v441_v63 = vand.u32 2147483647, %v754_v58  ;;  %v654_v11 = vpack.c.bf16 %v783_v7, %v782_v61 }
 0x10e   :  { %v115_v60 = vpop.f32.mrf.mxu0  ;;  %v295_v13 = vpop.f32.mrf.mxu1 }
 0x10f   :  { %v501_v62 = vadd.f32 %v500_v59, %v437_v49  ;;  %166 = vst [vmem:[%s1117_s2 + $0x20] sm:$0xff] %v115_v60  ;;  %v439_v4 = vand.u32 2147483647, %v115_v60  ;;  %693 = vst [vmem:[%s1119_s4 + $0x8] sm:$0xff] %v654_v11   ;;  %v649_v15 = vpack.c.bf16 %v295_v13, %v292_v1 }
 0x110   :  { %v755_v0 = vpop.f32.mrf.mxu0  ;;  %v786_v17 = vpop.f32.mrf.mxu1 }
 0x111   :  { %169 = vst [vmem:[%s1117_s2 + $0x38] sm:$0xff] %v755_v0  ;;  %v624_v2 = vpack.c.bf16 %v755_v0, %v754_v58  ;;  %463 = vadd.xlane.f32.xlu0 %v441_v63  ;;  %v442_v3 = vand.u32 2147483647, %v755_v0  ;;  %v502_v5 = vadd.f32 %v501_v62, %v438_v54  ;;  %650 = vst [vmem:[%s1119_s4] sm:$0xff] %v649_v15  }
 0x112   :  { %v118_v6 = vpop.f32.mrf.mxu0  ;;  %v308_v21 = vpop.f32.mrf.mxu1 }
 0x113   :  { %688 = vst [vmem:[%s1118_s3 + $0x18] sm:$0xff] %v624_v2   ;;  %167 = vst [vmem:[%s1117_s2 + $0x28] sm:$0xff] %v118_v6  ;;  %v619_v8 = vpack.c.bf16 %v118_v6, %v115_v60  ;;  %465 = vadd.xlane.f32.xlu1 %v442_v3  ;;  %v503_v9 = vadd.f32 %v502_v5, %v439_v4  ;;  %v440_v10 = vand.u32 2147483647, %v118_v6 }
 0x114   :  { %v758_v12 = vpop.f32.mrf.mxu0  ;;  %v787_v27 = vpop.f32.mrf.mxu1 }
 0x115   :  { %687 = vst [vmem:[%s1118_s3 + $0x10] sm:$0xff] %v619_v8   ;;  %172 = vst [vmem:[%s1117_s2 + $0x50] sm:$0xff] %v758_v12  ;;  %459 = vadd.xlane.f32.xlu0 %v439_v4  ;;  %v504_v14 = vadd.f32 %v503_v9, %v440_v10  ;;  %v445_v19 = vand.u32 2147483647, %v758_v12  ;;  %v664_v31 = vpack.c.bf16 %v787_v27, %v786_v17 }
 0x116   :  { %v131_v16 = vpop.f32.mrf.mxu0  ;;  %v311_v33 = vpop.f32.mrf.mxu1 }
 0x117   :  { %170 = vst [vmem:[%s1117_s2 + $0x40] sm:$0xff] %v131_v16  ;;  %461 = vadd.xlane.f32.xlu1 %v440_v10  ;;  %v505_v18 = vadd.f32 %v504_v14, %v441_v63  ;;  %v443_v24 = vand.u32 2147483647, %v131_v16  ;;  %695 = vst [vmem:[%s1119_s4 + $0x18] sm:$0xff] %v664_v31   ;;  %v659_v35 = vpack.c.bf16 %v311_v33, %v308_v21 }
 0x118   :  { %v759_v20 = vpop.f32.mrf.mxu0  ;;  %v790_v37 = vpop.f32.mrf.mxu1 }
 0x119   :  { %173 = vst [vmem:[%s1117_s2 + $0x58] sm:$0xff] %v759_v20  ;;  %v634_v22 = vpack.c.bf16 %v759_v20, %v758_v12  ;;  %471 = vadd.xlane.f32.xlu0 %v445_v19  ;;  %v446_v23 = vand.u32 2147483647, %v759_v20  ;;  %v506_v25 = vadd.f32 %v505_v18, %v442_v3  ;;  %694 = vst [vmem:[%s1119_s4 + $0x10] sm:$0xff] %v659_v35  }
 0x11a   :  { %v134_v26 = vpop.f32.mrf.mxu0  ;;  %v324_v41 = vpop.f32.mrf.mxu1 }
 0x11b   :  { %690 = vst [vmem:[%s1118_s3 + $0x28] sm:$0xff] %v634_v22   ;;  %171 = vst [vmem:[%s1117_s2 + $0x48] sm:$0xff] %v134_v26  ;;  %v629_v28 = vpack.c.bf16 %v134_v26, %v131_v16  ;;  %473 = vadd.xlane.f32.xlu1 %v446_v23  ;;  %v507_v29 = vadd.f32 %v506_v25, %v443_v24  ;;  %v444_v30 = vand.u32 2147483647, %v134_v26 }
 0x11c   :  { %v762_v32 = vpop.f32.mrf.mxu0  ;;  %v791_v46 = vpop.f32.mrf.mxu1 }
 0x11d   :  { %689 = vst [vmem:[%s1118_s3 + $0x20] sm:$0xff] %v629_v28   ;;  %176 = vst [vmem:[%s1117_s2 + $0x70] sm:$0xff] %v762_v32  ;;  %467 = vadd.xlane.f32.xlu0 %v443_v24  ;;  %v508_v34 = vadd.f32 %v507_v29, %v444_v30  ;;  %v449_v45 = vand.u32 2147483647, %v762_v32  ;;  %v674_v50 = vpack.c.bf16 %v791_v46, %v790_v37 }
 0x11e   :  { %v147_v36 = vpop.f32.mrf.mxu0  ;;  %v327_v51 = vpop.f32.mrf.mxu1 }
 0x11f   :  { %174 = vst [vmem:[%s1117_s2 + $0x60] sm:$0xff] %v147_v36  ;;  %469 = vadd.xlane.f32.xlu1 %v444_v30  ;;  %v509_v38 = vadd.f32 %v508_v34, %v445_v19  ;;  %v447_v39 = vand.u32 2147483647, %v147_v36  ;;  %697 = vst [vmem:[%s1119_s4 + $0x28] sm:$0xff] %v674_v50   ;;  %v669_v53 = vpack.c.bf16 %v327_v51, %v324_v41 }
 0x120   :  { %v763_v40 = vpop.f32.mrf.mxu0  ;;  %v794_v54 = vpop.f32.mrf.mxu1 }
 0x121   :  { %177 = vst [vmem:[%s1117_s2 + $0x78] sm:$0xff] %v763_v40  ;;  %v644_v42 = vpack.c.bf16 %v763_v40, %v762_v32  ;;  %v510_v43 = vadd.f32 %v509_v38, %v446_v23  ;;  %475 = vadd.xlane.f32.xlu0 %v447_v39  ;;  %v450_v55 = vand.u32 2147483647, %v763_v40  ;;  %696 = vst [vmem:[%s1119_s4 + $0x20] sm:$0xff] %v669_v53  }
 0x122   :  { %v150_v44 = vpop.f32.mrf.mxu0  ;;  %v340_v57 = vpop.f32.mrf.mxu1 }
 0x123   :  { %692 = vst [vmem:[%s1118_s3 + $0x38] sm:$0xff] %v644_v42   ;;  %v511_v47 = vadd.f32 %v510_v43, %v447_v39  ;;  %175 = vst [vmem:[%s1117_s2 + $0x68] sm:$0xff] %v150_v44  ;;  %v639_v48 = vpack.c.bf16 %v150_v44, %v147_v36  ;;  %v448_v49 = vand.u32 2147483647, %v150_v44 }
 0x124   :  { %v795_v59 = vpop.f32.mrf.mxu1 }
 0x125   :  { %691 = vst [vmem:[%s1118_s3 + $0x30] sm:$0xff] %v639_v48   ;;  %479 = vadd.xlane.f32.xlu0 %v449_v45  ;;  %477 = vadd.xlane.f32.xlu1 %v448_v49  ;;  %v512_v52 = vadd.f32 %v511_v47, %v448_v49  ;;  %v684_v61 = vpack.c.bf16 %v795_v59, %v794_v54 }
 0x126   :  { %v343_v62 = vpop.f32.mrf.mxu1 }
 0x127   :  { %v513_v56 = vadd.f32 %v512_v52, %v449_v45  ;;  %699 = vst [vmem:[%s1119_s4 + $0x38] sm:$0xff] %v684_v61   ;;  %v679_v0 = vpack.c.bf16 %v343_v62, %v340_v57 }
 0x129   :  { %481 = vadd.xlane.f32.xlu1 %v450_v55  ;;  %v514_v58 = vadd.f32 %v513_v56, %v450_v55  ;;  %698 = vst [vmem:[%s1119_s4 + $0x30] sm:$0xff] %v679_v0  }
 0x12b   :  { %v515_v60 = vrot.slane %v514_v58, 4 }
 0x12d   :  { %v516_v63 = vadd.f32 %v515_v60, %v514_v58 }
 0x12f   :  { %v517_v1 = vrot.slane %v516_v63, 2 }
 0x131   :  { %v518_v2 = vadd.f32 %v517_v1, %v516_v63 }
 0x133   :  { %v519_v3 = vrot.slane %v518_v2, 1 }
 0x135   :  { %v520_v4 = vadd.f32 %v519_v3, %v518_v2 }
 0x137   :  { %521 = vst [vmem:[%s1120_s6] sm:$0x1] %v520_v4 }
 0x190   :  { %v456_v5 = vpop.xlane.xlu1 %455 }
 0x191   :  { %486 = vst.msk [vmem:[%s1121_s5 + $0x10] sm:$0xff] %vm483_vm0, %v456_v5 }
 0x192   :  { %v452_v6 = vpop.xlane.xlu0 %451 }
 0x193   :  { %484 = vst.msk [vmem:[%s1121_s5] sm:$0xff] %vm483_vm0, %v452_v6 }
 0x194   :  { %v458_v7 = vpop.xlane.xlu1 %457 }
 0x195   :  { %487 = vst.msk [vmem:[%s1121_s5 + $0x18] sm:$0xff] %vm483_vm0, %v458_v7 }
 0x196   :  { %v454_v8 = vpop.xlane.xlu0 %453 }
 0x197   :  { %485 = vst.msk [vmem:[%s1121_s5 + $0x8] sm:$0xff] %vm483_vm0, %v454_v8 }
 0x19a   :  { %v464_v9 = vpop.xlane.xlu0 %463 }
 0x19b   :  { %490 = vst.msk [vmem:[%s1121_s5 + $0x30] sm:$0xff] %vm483_vm0, %v464_v9 }
 0x19c   :  { %v466_v10 = vpop.xlane.xlu1 %465 }
 0x19d   :  { %491 = vst.msk [vmem:[%s1121_s5 + $0x38] sm:$0xff] %vm483_vm0, %v466_v10 }
 0x19e   :  { %v460_v11 = vpop.xlane.xlu0 %459 }
 0x19f   :  { %488 = vst.msk [vmem:[%s1121_s5 + $0x20] sm:$0xff] %vm483_vm0, %v460_v11 }
 0x1a0   :  { %v462_v12 = vpop.xlane.xlu1 %461 }
 0x1a1   :  { %489 = vst.msk [vmem:[%s1121_s5 + $0x28] sm:$0xff] %vm483_vm0, %v462_v12 }
 0x1a2   :  { %v472_v13 = vpop.xlane.xlu0 %471 }
 0x1a3   :  { %494 = vst.msk [vmem:[%s1121_s5 + $0x50] sm:$0xff] %vm483_vm0, %v472_v13 }
 0x1a4   :  { %v474_v14 = vpop.xlane.xlu1 %473 }
 0x1a5   :  { %495 = vst.msk [vmem:[%s1121_s5 + $0x58] sm:$0xff] %vm483_vm0, %v474_v14 }
 0x1a6   :  { %v468_v15 = vpop.xlane.xlu0 %467 }
 0x1a7   :  { %492 = vst.msk [vmem:[%s1121_s5 + $0x40] sm:$0xff] %vm483_vm0, %v468_v15 }
 0x1a8   :  { %v470_v16 = vpop.xlane.xlu1 %469 }
 0x1a9   :  { %493 = vst.msk [vmem:[%s1121_s5 + $0x48] sm:$0xff] %vm483_vm0, %v470_v16 }
 0x1aa   :  { %v476_v17 = vpop.xlane.xlu0 %475 }
 0x1ab   :  { %496 = vst.msk [vmem:[%s1121_s5 + $0x60] sm:$0xff] %vm483_vm0, %v476_v17 }
 0x1ae   :  { %v480_v18 = vpop.xlane.xlu0 %479  ;;  %v478_v19 = vpop.xlane.xlu1 %477 }
 0x1af   :  { %498 = vst.msk [vmem:[%s1121_s5 + $0x70] sm:$0xff] %vm483_vm0, %v480_v18  ;;  %497 = vst.msk [vmem:[%s1121_s5 + $0x68] sm:$0xff] %vm483_vm0, %v478_v19 }
 0x1b2   :  { %v482_v20 = vpop.xlane.xlu1 %481 }
 0x1b3   :  { %499 = vst.msk [vmem:[%s1121_s5 + $0x78] sm:$0xff] %vm483_vm0, %v482_v20 }

// kernel: adagcl_forward.16
= control target key start
LH: loop header
LB: loop body
LE: loop exit
PB: predicated region body
PF: predicated region fallthrough
CT: control target
= control target key end

     0   :  { %v559_v1 = vmov 0   ;;  %s724_s1 = inlined_call_operand.vmem [shape: bf16[128,128], index: 1, kind: input, shape index: {}]   ;;  %s725_s0 = inlined_call_operand.vmem [shape: bf16[128,128], index: 0, kind: input, shape index: {}]   ;;  %s726_s2 = inlined_call_operand.vmem [shape: f32[128,1], index: 2, kind: input, shape index: {}]   ;;  %s727_s3 = inlined_call_operand.vmem [shape: f32[128,128], index: 3, kind: output, shape index: {}]  }
   0x1   :  { %v543_v0 = vld [vmem:[%s724_s1 + $0x38] sm:$0xff]   ;;  %542 = vset.pattern.permute.xlu1 %v559_v1  ;;  %541 = vset.pattern.permute.xlu0 %v559_v1  ;;  %v544_v2 = vld [vmem:[%s724_s1 + $0x30] sm:$0xff]   ;;  %v545_v3 = vld [vmem:[%s724_s1 + $0x28] sm:$0xff]  }
   0x2   :  { %491 = vmatprep.subr.bf16.mxu0 %v543_v0  ;;  %523 = vmatprep.subr.bf16.mxu1 %v543_v0  ;;  %v546_v4 = vld [vmem:[%s724_s1 + $0x20] sm:$0xff]   ;;  %v547_v7 = vld [vmem:[%s724_s1 + $0x18] sm:$0xff]   ;;  %v548_v8 = vld [vmem:[%s724_s1 + $0x10] sm:$0xff]  }
   0x3   :  { %492 = vmatpush3.bf16.msra.mxu0 %v543_v0  ;;  %531 = vmatpush3.bf16.msra.mxu1 %v543_v0  ;;  %v551_v5 = vld [vmem:[%s725_s0] sm:$0xff]   ;;  %v329_v9 = vld [vmem:[%s726_s2 + $0x10] sm:$0xff]  ;;  %v330_v11 = vld [vmem:[%s726_s2 + $0x18] sm:$0xff] }
   0x4   :  { %493 = vmatprep.subr.bf16.mxu0 %v544_v2  ;;  %524 = vmatprep.subr.bf16.mxu1 %v544_v2  ;;  %v552_v6 = vld [vmem:[%s725_s0 + $0x20] sm:$0xff]   ;;  %v328_v12 = vld [vmem:[%s726_s2 + $0x8] sm:$0xff]  ;;  %v334_v17 = vld [vmem:[%s726_s2 + $0x38] sm:$0xff] }
   0x5   :  { %507 = vmatprep.mubr.bf16.mxu0 %v551_v5  ;;  %515 = vmatprep.mubr.bf16.mxu1 %v552_v6  ;;  %v327_v10 = vld [vmem:[%s726_s2] sm:$0xff]  ;;  %v549_v13 = vld [vmem:[%s724_s1 + $0x8] sm:$0xff]   ;;  %v333_v18 = vld [vmem:[%s726_s2 + $0x30] sm:$0xff] }
   0x6   :  { %355 = vperm.xlu1 %542, %v329_v9   ;;  %345 = vperm.xlu0 %541, %v327_v10   ;;  %v332_v14 = vld [vmem:[%s726_s2 + $0x28] sm:$0xff]  ;;  %v331_v15 = vld [vmem:[%s726_s2 + $0x20] sm:$0xff]  ;;  %v555_v23 = vld [vmem:[%s725_s0 + $0x10] sm:$0xff]  }
   0x7   :  { %494 = vmatpush3.bf16.msra.mxu0 %v544_v2  ;;  %532 = vmatpush3.bf16.msra.mxu1 %v544_v2  ;;  %v550_v16 = vld [vmem:[%s724_s1] sm:$0xff]   ;;  %v553_v19 = vld [vmem:[%s725_s0 + $0x8] sm:$0xff]   ;;  %v556_v24 = vld [vmem:[%s725_s0 + $0x30] sm:$0xff]  }
   0x8   :  { %495 = vmatprep.subr.bf16.mxu0 %v545_v3  ;;  %525 = vmatprep.subr.bf16.mxu1 %v545_v3  ;;  %v554_v20 = vld [vmem:[%s725_s0 + $0x28] sm:$0xff]   ;;  %v335_v22 = vld [vmem:[%s726_s2 + $0x40] sm:$0xff]  ;;  %v338_v25 = vld [vmem:[%s726_s2 + $0x58] sm:$0xff] }
   0x9   :  { %v336_v21 = vld [vmem:[%s726_s2 + $0x48] sm:$0xff]  ;;  %v337_v26 = vld [vmem:[%s726_s2 + $0x50] sm:$0xff]  ;;  %v557_v27 = vld [vmem:[%s725_s0 + $0x18] sm:$0xff]  }
   0xa   :  { %360 = vperm.xlu1 %542, %v330_v11   ;;  %350 = vperm.xlu0 %541, %v328_v12   ;;  %v558_v28 = vld [vmem:[%s725_s0 + $0x38] sm:$0xff]   ;;  %v340_v29 = vld [vmem:[%s726_s2 + $0x68] sm:$0xff]  ;;  %v339_v30 = vld [vmem:[%s726_s2 + $0x60] sm:$0xff] }
   0xb   :  { %496 = vmatpush3.bf16.msra.mxu0 %v545_v3  ;;  %533 = vmatpush3.bf16.msra.mxu1 %v545_v3  ;;  %v342_v31 = vld [vmem:[%s726_s2 + $0x78] sm:$0xff]  ;;  %v341_v32 = vld [vmem:[%s726_s2 + $0x70] sm:$0xff] }
   0xc   :  { %497 = vmatprep.subr.bf16.mxu0 %v546_v4  ;;  %526 = vmatprep.subr.bf16.mxu1 %v546_v4 }
   0xe   :  { %370 = vperm.xlu1 %542, %v332_v14   ;;  %365 = vperm.xlu0 %541, %v331_v15  }
   0xf   :  { %498 = vmatpush3.bf16.msra.mxu0 %v546_v4  ;;  %534 = vmatpush3.bf16.msra.mxu1 %v546_v4 }
  0x10   :  { %499 = vmatprep.subr.bf16.mxu0 %v547_v7  ;;  %527 = vmatprep.subr.bf16.mxu1 %v547_v7 }
  0x12   :  { %380 = vperm.xlu1 %542, %v334_v17   ;;  %375 = vperm.xlu0 %541, %v333_v18  }
  0x13   :  { %500 = vmatpush3.bf16.msra.mxu0 %v547_v7  ;;  %535 = vmatpush3.bf16.msra.mxu1 %v547_v7 }
  0x14   :  { %501 = vmatprep.subr.bf16.mxu0 %v548_v8  ;;  %528 = vmatprep.subr.bf16.mxu1 %v548_v8 }
  0x16   :  { %390 = vperm.xlu1 %542, %v336_v21   ;;  %385 = vperm.xlu0 %541, %v335_v22  }
  0x17   :  { %502 = vmatpush3.bf16.msra.mxu0 %v548_v8  ;;  %536 = vmatpush3.bf16.msra.mxu1 %v548_v8 }
  0x18   :  { %503 = vmatprep.subr.bf16.mxu0 %v549_v13  ;;  %529 = vmatprep.subr.bf16.mxu1 %v549_v13 }
  0x1a   :  { %400 = vperm.xlu1 %542, %v338_v25   ;;  %395 = vperm.xlu0 %541, %v337_v26  }
  0x1b   :  { %504 = vmatpush3.bf16.msra.mxu0 %v549_v13  ;;  %537 = vmatpush3.bf16.msra.mxu1 %v549_v13 }
  0x1c   :  { %505 = vmatprep.subr.bf16.mxu0 %v550_v16  ;;  %530 = vmatprep.subr.bf16.mxu1 %v550_v16 }
  0x1e   :  { %410 = vperm.xlu1 %542, %v340_v29   ;;  %405 = vperm.xlu0 %541, %v339_v30  }
  0x1f   :  { %506 = vmatpush3.bf16.msra.mxu0 %v550_v16  ;;  %538 = vmatpush3.bf16.msra.mxu1 %v550_v16 }
  0x22   :  { %508 = vmatmul.mubr.bf16.vlgmr.msra.gmra.mxu0 %v553_v19  ;;  %516 = vmatmul.mubr.bf16.vlgmr.msra.gmra.mxu1 %v554_v20 }
  0x23   :  { %511 = vmatprep.mubr.bf16.mxu0 %v555_v23  ;;  %519 = vmatprep.mubr.bf16.mxu1 %v556_v24 }
  0x24   :  { %420 = vperm.xlu1 %542, %v342_v31   ;;  %415 = vperm.xlu0 %541, %v341_v32  }
  0x2a   :  { %512 = vmatmul.mubr.bf16.gmra.mxu0 %v557_v27  ;;  %520 = vmatmul.mubr.bf16.gmra.mxu1 %v558_v28 }
  0x81   :  { %v346_v33 = vpop.permute.xlu0 %345  ;;  %v356_v34 = vpop.permute.xlu1 %355 }
  0x85   :  { %v351_v35 = vpop.permute.xlu0 %350  ;;  %v361_v36 = vpop.permute.xlu1 %360 }
  0x89   :  { %v366_v37 = vpop.permute.xlu0 %365  ;;  %v371_v38 = vpop.permute.xlu1 %370 }
  0x8d   :  { %v376_v39 = vpop.permute.xlu0 %375  ;;  %v381_v40 = vpop.permute.xlu1 %380 }
  0x91   :  { %v386_v41 = vpop.permute.xlu0 %385  ;;  %v391_v42 = vpop.permute.xlu1 %390 }
  0x95   :  { %v396_v43 = vpop.permute.xlu0 %395  ;;  %v401_v46 = vpop.permute.xlu1 %400 }
  0x99   :  { %v406_v49 = vpop.permute.xlu0 %405  ;;  %v411_v58 = vpop.permute.xlu1 %410 }
  0x9f   :  { %v416_v63 = vpop.permute.xlu0 %415  ;;  %v421_v8 = vpop.permute.xlu1 %420 }
  0xe2   :  { %v509_v44 = vpop.f32.mrf.mxu0  ;;  %v517_v45 = vpop.f32.mrf.mxu1 }
  0xe3   :  { %v425_v50 = vmul.f32 %v509_v44, %v356_v34  ;;  %v433_v51 = vmul.f32 %v517_v45, %v396_v43 }
  0xe4   :  { %v213_v47 = vpop.f32.mrf.mxu0  ;;  %v245_v48 = vpop.f32.mrf.mxu1 }
  0xe5   :  { %441 = vst [vmem:[%s727_s3 + $0x10] sm:$0xff] %v425_v50  ;;  %449 = vst [vmem:[%s727_s3 + $0x50] sm:$0xff] %v433_v51  ;;  %v423_v54 = vmul.f32 %v346_v33, %v213_v47  ;;  %v431_v55 = vmul.f32 %v386_v41, %v245_v48 }
  0xe6   :  { %v510_v52 = vpop.f32.mrf.mxu0  ;;  %v518_v53 = vpop.f32.mrf.mxu1 }
  0xe7   :  { %439 = vst [vmem:[%s727_s3] sm:$0xff] %v423_v54  ;;  %447 = vst [vmem:[%s727_s3 + $0x40] sm:$0xff] %v431_v55  ;;  %v426_v59 = vmul.f32 %v510_v52, %v361_v36  ;;  %v434_v60 = vmul.f32 %v518_v53, %v401_v46 }
  0xe8   :  { %v216_v56 = vpop.f32.mrf.mxu0  ;;  %v248_v57 = vpop.f32.mrf.mxu1 }
  0xe9   :  { %442 = vst [vmem:[%s727_s3 + $0x18] sm:$0xff] %v426_v59  ;;  %450 = vst [vmem:[%s727_s3 + $0x58] sm:$0xff] %v434_v60  ;;  %v424_v0 = vmul.f32 %v351_v35, %v216_v56  ;;  %v432_v1 = vmul.f32 %v391_v42, %v248_v57 }
  0xea   :  { %v513_v61 = vpop.f32.mrf.mxu0  ;;  %v521_v62 = vpop.f32.mrf.mxu1 }
  0xeb   :  { %440 = vst [vmem:[%s727_s3 + $0x8] sm:$0xff] %v424_v0  ;;  %448 = vst [vmem:[%s727_s3 + $0x48] sm:$0xff] %v432_v1  ;;  %v429_v4 = vmul.f32 %v513_v61, %v376_v39  ;;  %v437_v5 = vmul.f32 %v521_v62, %v416_v63 }
  0xec   :  { %v229_v2 = vpop.f32.mrf.mxu0  ;;  %v261_v3 = vpop.f32.mrf.mxu1 }
  0xed   :  { %445 = vst [vmem:[%s727_s3 + $0x30] sm:$0xff] %v429_v4  ;;  %453 = vst [vmem:[%s727_s3 + $0x70] sm:$0xff] %v437_v5  ;;  %v427_v9 = vmul.f32 %v366_v37, %v229_v2  ;;  %v435_v10 = vmul.f32 %v406_v49, %v261_v3 }
  0xee   :  { %v514_v6 = vpop.f32.mrf.mxu0  ;;  %v522_v7 = vpop.f32.mrf.mxu1 }
  0xef   :  { %443 = vst [vmem:[%s727_s3 + $0x20] sm:$0xff] %v427_v9  ;;  %451 = vst [vmem:[%s727_s3 + $0x60] sm:$0xff] %v435_v10  ;;  %v430_v13 = vmul.f32 %v514_v6, %v381_v40  ;;  %v438_v14 = vmul.f32 %v522_v7, %v421_v8 }
  0xf0   :  { %v232_v11 = vpop.f32.mrf.mxu0  ;;  %v264_v12 = vpop.f32.mrf.mxu1 }
  0xf1   :  { %446 = vst [vmem:[%s727_s3 + $0x38] sm:$0xff] %v430_v13  ;;  %454 = vst [vmem:[%s727_s3 + $0x78] sm:$0xff] %v438_v14  ;;  %v428_v15 = vmul.f32 %v371_v38, %v232_v11  ;;  %v436_v16 = vmul.f32 %v411_v58, %v264_v12 }
  0xf3   :  { %444 = vst [vmem:[%s727_s3 + $0x28] sm:$0xff] %v428_v15  ;;  %452 = vst [vmem:[%s727_s3 + $0x68] sm:$0xff] %v436_v16 }

</bundles_post_ra>
